<compile_context>
chip_gen: v6e
topology: v6e:2x2x1
jax: 0.10.0
libtpu: 0.0.40
codegen_flags: <defaults>
</compile_context>

<pallas_src>
import math

import jax
import jax.numpy as jnp
from jax import lax
from jax.experimental import pallas as pl
from jax.experimental.pallas import tpu as pltpu


# ----------------------------------------------------------------------------
# Fused Pallas kernel: logits = W @ x_tile + b ; one_hot(argmax over classes)
# ----------------------------------------------------------------------------
def _head_kernel(w_ref, b_ref, x_ref, o_ref):
    # w_ref: (nb_class, C_in)     b_ref: (nb_class, 1)
    # x_ref: (1, C_in, tS)        o_ref: (1, nb_class, tS) int8
    x = x_ref[0]                                     # (C_in, tS)
    w = w_ref[...]                                   # (nb_class, C_in) f32

    # 1x1x1 conv == per-voxel matmul.  HIGHEST precision is free here (tiny K,
    # fully hidden under the input DMA) and matches the f32 reference exactly.
    logits = jnp.dot(
        w, x,
        preferred_element_type=jnp.float32,
        precision=lax.Precision.HIGHEST,
    ) + b_ref[...]                                   # (nb_class, tS) f32

    # softmax(dim=class) is monotone per voxel -> argmax(logits) == argmax(softmax).
    # Pairwise running max/argmax over class rows; strict '>' keeps the
    # first-index tie-break of torch.argmax.  Only (1, tS) temporaries live.
    nb_class, tS = logits.shape
    best = logits[0:1, :]                            # (1, tS)
    idx = jnp.zeros((1, tS), dtype=jnp.int32)        # (1, tS)
    for c in range(1, nb_class):                     # static, tiny unroll
        row = logits[c:c + 1, :]
        better = row > best
        best = jnp.where(better, row, best)
        idx = jnp.where(better, jnp.int32(c), idx)

    cls = lax.broadcasted_iota(jnp.int32, (nb_class, tS), 0)
    o_ref[0] = (cls == idx).astype(o_ref.dtype)      # one-hot, int8


# ----------------------------------------------------------------------------
# Wrapper matching torch Head.forward semantics (NCDHW in, NCDHW one-hot out)
# ----------------------------------------------------------------------------
def head_forward(x, w, b):
    """x: (N, C_in, D, H, W) f32/bf16; w: (nb_class, C_in, 1, 1, 1) f32; b: (nb_class,) f32.

    Returns (N, nb_class, D, H, W) int8 one-hot of argmax(softmax(conv(x)), dim=1).
    """
    N, C_in, D, H, W = x.shape
    nb_class = w.shape[0]
    S = D * H * W

    # NCDHW -> (N, C_in, S): already class/channel-major, no transpose needed.
    xf = x.reshape(N, C_in, S)

    LANE = 128
    MAX_TS = 8192   # ~1 MiB f32 input tile -> ~2 MiB double-buffered; fits every gen.
    if S % LANE == 0:
        # Hot path: no padding, no output slice.  Ragged last blocks (when
        # MAX_TS does not divide S) are handled by Pallas (masked writeback).
        S_arr = S
        xs = xf
    else:
        # Rare unaligned path: one-time pad up to the lane width.
        S_arr = ((S + LANE - 1) // LANE) * LANE
        xs = jnp.pad(xf, ((0, 0), (0, 0), (0, S_arr - S)))
    tS = min(MAX_TS, S_arr)

    wm = w.reshape(nb_class, C_in)
    bm = b.reshape(nb_class, 1)

    grid = (N, pl.cdiv(S_arr, tS))
    out = pl.pallas_call(
        _head_kernel,
        out_shape=jax.ShapeDtypeStruct((N, nb_class, S_arr), jnp.int8),
        grid=grid,
        in_specs=[
            pl.BlockSpec((nb_class, C_in), lambda n, s: (0, 0)),   # weights (resident)
            pl.BlockSpec((nb_class, 1), lambda n, s: (0, 0)),      # bias (resident)
            pl.BlockSpec((1, C_in, tS), lambda n, s: (n, 0, s)),   # input tile
        ],
        out_specs=pl.BlockSpec((1, nb_class, tS), lambda n, s: (n, 0, s)),
        compiler_params=pltpu.CompilerParams(
            dimension_semantics=("parallel", "parallel"),
        ),
    )(wm, bm, xs)

    if S_arr != S:
        out = out[:, :, :S]
    return out.reshape(N, nb_class, D, H, W)


# ----------------------------------------------------------------------------
# Main
# ----------------------------------------------------------------------------
if __name__ == "__main__":
    nb_class = 3
    N, C_in, D, H, W = 2, 32, 16, 16, 16

    key = jax.random.PRNGKey(0)
    kx, kw, kb = jax.random.split(key, 3)
    x = jax.random.normal(kx, (N, C_in, D, H, W), jnp.float32)
    scale = 1.0 / math.sqrt(C_in)
    w = scale * jax.random.normal(kw, (nb_class, C_in, 1, 1, 1), jnp.float32)
    b = scale * jax.random.normal(kb, (nb_class,), jnp.float32)

    out = jax.jit(head_forward)(x, w, b)
    out = jax.block_until_ready(out)

    # Sanity checks.
    assert out.shape == (N, nb_class, D, H, W)
    assert out.dtype == jnp.int8
    out_i32 = out.astype(jnp.int32)
    assert bool(jnp.all(jnp.sum(out_i32, axis=1) == 1))       # valid one-hot

    # Reference agreement (both sides use HIGHEST-precision f32 matmuls now).
    logits_ref = jnp.einsum(
        "ncdhw,kc->nkdhw", x, w.reshape(nb_class, C_in),
        precision=lax.Precision.HIGHEST,
    ) + b.reshape(1, nb_class, 1, 1, 1)
    ref_idx = jnp.argmax(logits_ref, axis=1)
    got_idx = jnp.argmax(out_i32, axis=1)
    agree = float(jnp.mean((ref_idx == got_idx).astype(jnp.float32)))
    assert agree >= 0.995, f"argmax agreement too low: {agree}"

    print("KERNEL_OK")
</pallas_src>

<mosaic_0001>
module attributes {stable_mosaic.version = 11 : i64} {
  func.func @_head_kernel(%arg0: i32, %arg1: i32, %arg2: memref<3x32xf32, #tpu.memory_space<vmem>>, %arg3: memref<3x1xf32, #tpu.memory_space<vmem>>, %arg4: memref<1x32x4096xf32, #tpu.memory_space<vmem>>, %arg5: memref<1x3x4096xi8, #tpu.memory_space<vmem>>) attributes {dimension_semantics = [#tpu.dimension_semantics<parallel>, #tpu.dimension_semantics<parallel>], iteration_bounds = array<i64: 2, 1>, scalar_prefetch = 0 : i64, scratch_operands = 0 : i64, tpu.core_type = #tpu.core_type<tc>, window_params = [{pipeline_mode = #tpu.pipeline_mode<synchronous>, transform_indices = @transform_0, window_bounds = array<i64: 3, 32>}, {pipeline_mode = #tpu.pipeline_mode<synchronous>, transform_indices = @transform_1, window_bounds = array<i64: 3, 1>}, {transform_indices = @transform_2, window_bounds = array<i64: 1, 32, 4096>}, {transform_indices = @transform_3, window_bounds = array<i64: 1, 3, 4096>}]} {
    %c0 = arith.constant 0 : index
    %c0_0 = arith.constant 0 : index
    %c0_1 = arith.constant 0 : index
    %0 = vector.load %arg4[%c0, %c0_0, %c0_1] : memref<1x32x4096xf32, #tpu.memory_space<vmem>>, vector<1x32x4096xf32>
    %1 = vector.shape_cast %0 : vector<1x32x4096xf32> to vector<32x4096xf32>
    %c0_2 = arith.constant 0 : index
    %c0_3 = arith.constant 0 : index
    %2 = vector.load %arg2[%c0_2, %c0_3] : memref<3x32xf32, #tpu.memory_space<vmem>>, vector<3x32xf32>
    %cst = arith.constant dense<0.000000e+00> : vector<3x4096xf32>
    %3 = tpu.matmul %2, %1, %cst {dimension_numbers = #tpu.dot_dimension_numbers<[1], [0], [0], [1], [0, 0, 1, 1], [], []>, precision = #tpu.contract_precision<fp32>} : vector<3x32xf32>, vector<32x4096xf32>, vector<3x4096xf32> -> vector<3x4096xf32>
    %c0_4 = arith.constant 0 : index
    %c0_5 = arith.constant 0 : index
    %4 = vector.load %arg3[%c0_4, %c0_5] : memref<3x1xf32, #tpu.memory_space<vmem>>, vector<3x1xf32>
    %5 = vector.broadcast %4 : vector<3x1xf32> to vector<3x4096xf32>
    %6 = arith.addf %3, %5 : vector<3x4096xf32>
    %7 = vector.extract_strided_slice %6 {offsets = [0, 0], sizes = [1, 4096], strides = [1, 1]} : vector<3x4096xf32> to vector<1x4096xf32>
    %c0_i32 = arith.constant 0 : i32
    %8 = vector.broadcast %c0_i32 : i32 to vector<1x4096xi32>
    %9 = vector.extract_strided_slice %6 {offsets = [1, 0], sizes = [1, 4096], strides = [1, 1]} : vector<3x4096xf32> to vector<1x4096xf32>
    %10 = arith.cmpf ogt, %9, %7 : vector<1x4096xf32>
    %11 = arith.select %10, %9, %7 : vector<1x4096xi1>, vector<1x4096xf32>
    %c1_i32 = arith.constant 1 : i32
    %12 = vector.broadcast %c1_i32 : i32 to vector<1x4096xi32>
    %13 = arith.select %10, %12, %8 : vector<1x4096xi1>, vector<1x4096xi32>
    %14 = vector.extract_strided_slice %6 {offsets = [2, 0], sizes = [1, 4096], strides = [1, 1]} : vector<3x4096xf32> to vector<1x4096xf32>
    %15 = arith.cmpf ogt, %14, %11 : vector<1x4096xf32>
    %c2_i32 = arith.constant 2 : i32
    %16 = vector.broadcast %c2_i32 : i32 to vector<1x4096xi32>
    %17 = arith.select %15, %16, %13 : vector<1x4096xi1>, vector<1x4096xi32>
    %18 = tpu.iota {dimensions = array<i32: 0>} : vector<3x4096xi32>
    %19 = vector.broadcast %17 : vector<1x4096xi32> to vector<3x4096xi32>
    %20 = arith.cmpi eq, %18, %19 : vector<3x4096xi32>
    %21 = arith.extui %20 : vector<3x4096xi1> to vector<3x4096xi8>
    %c0_6 = arith.constant 0 : index
    %c0_7 = arith.constant 0 : index
    %c0_8 = arith.constant 0 : index
    %22 = vector.load %arg5[%c0_6, %c0_7, %c0_8] : memref<1x3x4096xi8, #tpu.memory_space<vmem>>, vector<1x3x4096xi8>
    %23 = vector.shape_cast %22 : vector<1x3x4096xi8> to vector<3x4096xi8>
    %24 = vector.shape_cast %21 : vector<3x4096xi8> to vector<1x3x4096xi8>
    tpu.vector_store %arg5[%c0_6, %c0_7, %c0_8], %24 {strides = array<i32>} : memref<1x3x4096xi8, #tpu.memory_space<vmem>>, vector<1x3x4096xi8>,
    return
  }
  func.func @transform_0(%arg0: i32, %arg1: i32) -> (i32, i32) {
    %c0_i32 = arith.constant 0 : i32
    %c0_i32_0 = arith.constant 0 : i32
    %c0_i32_1 = arith.constant 0 : i32
    return %c0_i32, %c0_i32_0 : i32, i32
  }
  func.func @transform_1(%arg0: i32, %arg1: i32) -> (i32, i32) {
    %c0_i32 = arith.constant 0 : i32
    %c0_i32_0 = arith.constant 0 : i32
    %c0_i32_1 = arith.constant 0 : i32
    return %c0_i32, %c0_i32_0 : i32, i32
  }
  func.func @transform_2(%arg0: i32, %arg1: i32) -> (i32, i32, i32) {
    %c0_i32 = arith.constant 0 : i32
    %c0_i32_0 = arith.constant 0 : i32
    return %arg0, %c0_i32, %arg1 : i32, i32, i32
  }
  func.func @transform_3(%arg0: i32, %arg1: i32) -> (i32, i32, i32) {
    %c0_i32 = arith.constant 0 : i32
    %c0_i32_0 = arith.constant 0 : i32
    return %arg0, %c0_i32, %arg1 : i32, i32, i32
  }
}

</mosaic_0001>

<bundles_post_ra>
// kernel: head_forward.1
= control target key start
LH: loop header
LB: loop body
LE: loop exit
PB: predicated region body
PF: predicated region fallthrough
CT: control target
= control target key end

     0   :  { %s10085_s12 = smov 0   ;;  %s10087_s13 = smov 0   ;;  %s13586_s0 = inlined_call_operand.vmem [shape: f32[3,32], index: 0, kind: input, shape index: {}]   ;;  %s13587_s1 = inlined_call_operand.vmem [shape: f32[3,1], index: 1, kind: input, shape index: {}]   ;;  %s13588_s2 = inlined_call_operand.vmem [shape: f32[2,32,4096], index: 2, kind: input, shape index: {}]   ;;  %s13589_s3 = inlined_call_operand.vmem [shape: s8[2,3,4096], index: 3, kind: output, shape index: {}]  }
   0x1   :  { %s10089_s14 = smov 0  }
   0x2 LB: > { %s25_s15 = sadd.s32 1, %s10056_s13  ;;  %p10003_p0 = scmp.ge.s32.totalorder %s10060_s14, 1  ;;  %s10060_s14 = sphi %s10089_s14, %s13_s14   ;;  %s10056_s13 = sphi %s10087_s13, %s13848_s13   ;;  %s10052_s12 = sphi %s10085_s12, %s13847_s12  }
   0x3   : > { %p27_p1 = scmp.ge.s32.totalorder %s25_s15, 2  ;;  %p158_p2 = scmp.lt.s32.totalorder %s10060_s14, 3 }
   0x5   : > { %s13850_s15 = smov (%p27_p1, %s25_s15), 0  ;;  %p159_p3 = pnand %p10003_p0, %p158_p2 }
   0x7   : > { %162 = sbr.rel (%p159_p3) target bundleno = 728 (0x2d8), region = 32 }
   0xc   : > { %p190_p4 = scmp.lt.s32.totalorder %s10052_s12, 1  ;;  %v338_v0 = vld [vmem:[%s13586_s0] sm:$0x7]  ;;  %vm345_vm0 = vcmask 261120   ;;  %v13612_v1 = vmov 0.0   ;;  %v13590_v5 = vmov 0  }
   0xd   : > { %421 = vmatprep.mubr.f32.mxu0 %v13612_v1  ;;  %v347_v2 = vsel %vm345_vm0, %v338_v0, 0  ;;  %537 = vmatprep.mubr.f32.mxu1 %v13612_v1  ;;  %v339_v3 = vld [vmem:[%s13587_s1] sm:$0x7]  ;;  %vm9875_vm9 = vcmask 1040384   ;;  %vm9876_vm10 = vsmask.f32 512 }
   0xe   : > { %s13852_s12 = smov (!%p190_p4, %s10052_s12), 1  ;;  %v10113_v4 = vand.u32 4294901760, %v347_v2  ;;  %10037 = vset.pattern.permute.xlu0 %v13590_v5  ;;  %vm9878_vm11 = vcmask 1041409   ;;  %vm9879_vm12 = vsmask.f32 1536  ;;  %vm11834_vm14 = vmand %vm9875_vm9, %vm9876_vm10 }
   0xf   : > { %342 = vperm.xlu0 %10037, %v339_v3   ;;  %s10009_s20 = sshll.u32 %s13852_s12, 10  ;;  %vm11848_vm15 = vmand %vm9878_vm11, %vm9879_vm12  ;;  %s10006_s24 = sshll.u32 %s13852_s12, 5 }
  0x10   : > { %v10118_v6 = vsub.f32 %v347_v2, %v10113_v4  ;;  %s10123_s23 = scalar_lea.vmem %s13588_s2, %s10009_s20  ;;  %s12294_s27 = scalar_lea.vmem %s13589_s3, %s10006_s24 }
  0x11   : > { %v307_v7 = vld [vmem:[%s10123_s23 + $0x308] sm:$0xff]  ;;  %v306_v8 = vld [vmem:[%s10123_s23 + $0x300] sm:$0xff]  ;;  %v309_v58 = vld [vmem:[%s10123_s23 + $0x318] sm:$0xff] }
  0x12   : > { %v275_v9 = vld [vmem:[%s10123_s23 + $0x208] sm:$0xff]  ;;  %v10129_v10 = vand.u32 4294901760, %v10118_v6  ;;  %v10131_v11 = vand.u32 4294901760, %v307_v7  ;;  %v10133_v12 = vand.u32 4294901760, %v306_v8  ;;  %v274_v14 = vld [vmem:[%s10123_s23 + $0x200] sm:$0xff]  ;;  %v308_v59 = vld [vmem:[%s10123_s23 + $0x310] sm:$0xff] }
  0x13   : > { %v10135_v13 = vand.u32 4294901760, %v275_v9  ;;  %v243_v15 = vld [vmem:[%s10123_s23 + $0x108] sm:$0xff]  ;;  %v242_v16 = vld [vmem:[%s10123_s23 + $0x100] sm:$0xff]  ;;  %v10140_v17 = vand.u32 4294901760, %v274_v14  ;;  %v277_v60 = vld [vmem:[%s10123_s23 + $0x218] sm:$0xff]  ;;  %v10231_v61 = vand.u32 4294901760, %v309_v58 }
  0x14   : > { %v10142_v18 = vand.u32 4294901760, %v243_v15  ;;  %v10144_v19 = vand.u32 4294901760, %v242_v16  ;;  %v211_v20 = vld [vmem:[%s10123_s23 + $0x8] sm:$0xff]  ;;  %v210_v21 = vld [vmem:[%s10123_s23] sm:$0xff]  ;;  %v425_v22 = vsub.f32 %v10118_v6, %v10129_v10  ;;  %374 = vmatprep.subr.mxu0 %v10131_v11  ;;  %v10154_v24 = vsub.f32 %v307_v7, %v10131_v11  ;;  %v276_v63 = vld [vmem:[%s10123_s23 + $0x210] sm:$0xff] }
  0x15   : > { %v10151_v23 = vand.u32 4294901760, %v211_v20  ;;  %v10156_v25 = vand.u32 4294901760, %v210_v21  ;;  %v10159_v26 = vsub.f32 %v306_v8, %v10133_v12  ;;  %376 = vmatpush1.msra.mxu0 %v10133_v12  ;;  %v10163_v27 = vsub.f32 %v275_v9, %v10135_v13  ;;  %v245_v2 = vld [vmem:[%s10123_s23 + $0x118] sm:$0xff]  ;;  %v244_v3 = vld [vmem:[%s10123_s23 + $0x110] sm:$0xff] }
  0x16   : > { %v10165_v28 = vand.u32 4294901760, %v425_v22  ;;  %v10168_v29 = vsub.f32 %v274_v14, %v10140_v17  ;;  %v10171_v30 = vsub.f32 %v243_v15, %v10142_v18  ;;  %378 = vmatprep.subr.mxu0 %v10135_v13  ;;  %v459_v31 = vand.u32 4294901760, %v10154_v24  ;;  %v213_v8 = vld [vmem:[%s10123_s23 + $0x18] sm:$0xff] }
  0x17   : > { %v465_v32 = vand.u32 4294901760, %v10159_v26  ;;  %v10177_v33 = vsub.f32 %v242_v16, %v10144_v19  ;;  %v10180_v34 = vsub.f32 %v211_v20, %v10151_v23  ;;  %380 = vmatpush1.msra.mxu0 %v10140_v17  ;;  %v471_v35 = vand.u32 4294901760, %v10163_v27  ;;  %v212_v16 = vld [vmem:[%s10123_s23 + $0x10] sm:$0xff] }
  0x18   : > { %13628 = vst [vmem:[#allocation2_spill] sm:$0xff] %v10165_v28  ;;  %v477_v36 = vand.u32 4294901760, %v10168_v29  ;;  %v483_v37 = vand.u32 4294901760, %v10171_v30  ;;  %v10187_v38 = vsub.f32 %v210_v21, %v10156_v25  ;;  %382 = vmatprep.subr.mxu0 %v10142_v18  ;;  %v460_v39 = vsub.f32 %v10154_v24, %v459_v31 }
  0x19   : > { %v466_v40 = vsub.f32 %v10159_v26, %v465_v32  ;;  %v489_v41 = vand.u32 4294901760, %v10177_v33  ;;  %v495_v42 = vand.u32 4294901760, %v10180_v34  ;;  %384 = vmatpush1.msra.mxu0 %v10144_v19  ;;  %v472_v43 = vsub.f32 %v10163_v27, %v471_v35 }
  0x1a   : > { %v478_v44 = vsub.f32 %v10168_v29, %v477_v36  ;;  %v484_v45 = vsub.f32 %v10171_v30, %v483_v37  ;;  %v501_v46 = vand.u32 4294901760, %v10187_v38  ;;  %386 = vmatprep.subr.mxu0 %v10151_v23  ;;  %v461_v47 = vand.u32 4294901760, %v460_v39 }
  0x1b   : > { %v467_v48 = vand.u32 4294901760, %v466_v40  ;;  %v490_v49 = vsub.f32 %v10177_v33, %v489_v41  ;;  %v496_v50 = vsub.f32 %v10180_v34, %v495_v42  ;;  %388 = vmatpush1.msra.mxu0 %v10156_v25  ;;  %v473_v51 = vand.u32 4294901760, %v472_v43 }
  0x1c   : > { %v479_v52 = vand.u32 4294901760, %v478_v44  ;;  %v502_v53 = vsub.f32 %v10187_v38, %v501_v46  ;;  %462 = vmatprep.subr.mxu1 %v461_v47  ;;  %571 = vmatprep.subr.mxu0 %v10154_v24  ;;  %v485_v54 = vand.u32 4294901760, %v484_v45  ;;  %v10235_v62 = vand.u32 4294901760, %v308_v59 }
  0x1d   : > { %468 = vmatpush1.msra.mxu1 %v467_v48  ;;  %427 = vmatmul.mubr.f32.vlgmr.msra.gmra.mxu0 %v10165_v28  ;;  %v491_v55 = vand.u32 4294901760, %v490_v49  ;;  %v497_v56 = vand.u32 4294901760, %v496_v50  ;;  %v10240_v0 = vand.u32 4294901760, %v277_v60  ;;  %v10248_v7 = vand.u32 4294901760, %v276_v63  ;;  %v311_v48 = vld [vmem:[%s10123_s23 + $0x328] sm:$0xff]  ;;  %v310_v49 = vld [vmem:[%s10123_s23 + $0x320] sm:$0xff] }
  0x1e   : > { %474 = vmatprep.subr.mxu1 %v473_v51  ;;  %574 = vmatpush1.msra.mxu0 %v10159_v26  ;;  %v503_v57 = vand.u32 4294901760, %v502_v53  ;;  %v10252_v9 = vsub.f32 %v309_v58, %v10231_v61  ;;  %v10258_v14 = vsub.f32 %v308_v59, %v10235_v62  ;;  %v10260_v15 = vand.u32 4294901760, %v245_v2  ;;  %v279_v50 = vld [vmem:[%s10123_s23 + $0x228] sm:$0xff]  ;;  %v278_v53 = vld [vmem:[%s10123_s23 + $0x220] sm:$0xff] }
  0x1f   : > { %480 = vmatpush1.msra.mxu1 %v479_v52  ;;  %577 = vmatprep.subr.mxu0 %v10163_v27  ;;  %v10266_v20 = vand.u32 4294901760, %v244_v3  ;;  %v10269_v21 = vsub.f32 %v277_v60, %v10240_v0  ;;  %v10274_v22 = vand.u32 4294901760, %v213_v8  ;;  %v10279_v24 = vsub.f32 %v276_v63, %v10248_v7  ;;  %v215_v58 = vld [vmem:[%s10123_s23 + $0x28] sm:$0xff] }
  0x20   : > { %486 = vmatprep.subr.mxu1 %v485_v54  ;;  %580 = vmatpush1.msra.mxu0 %v10168_v29  ;;  %v1002_v26 = vand.u32 4294901760, %v10252_v9  ;;  %v10282_v27 = vand.u32 4294901760, %v212_v16  ;;  %v1008_v29 = vand.u32 4294901760, %v10258_v14  ;;  %v10369_v51 = vand.u32 4294901760, %v311_v48 }
  0x21   : > { %492 = vmatpush1.msra.mxu1 %v491_v55  ;;  %583 = vmatprep.subr.mxu0 %v10171_v30  ;;  %v10289_v30 = vsub.f32 %v245_v2, %v10260_v15  ;;  %v10373_v52 = vand.u32 4294901760, %v310_v49  ;;  %v10378_v54 = vand.u32 4294901760, %v279_v50  ;;  %v247_v55 = vld [vmem:[%s10123_s23 + $0x128] sm:$0xff]  ;;  %v214_v2 = vld [vmem:[%s10123_s23 + $0x20] sm:$0xff] }
  0x22   : > { %498 = vmatprep.subr.mxu1 %v497_v56  ;;  %586 = vmatpush1.msra.mxu0 %v10177_v33  ;;  %v10302_v33 = vsub.f32 %v213_v8, %v10274_v22  ;;  %v246_v56 = vld [vmem:[%s10123_s23 + $0x120] sm:$0xff]  ;;  %v10392_v59 = vsub.f32 %v311_v48, %v10369_v51  ;;  %v10400_v63 = vand.u32 4294901760, %v247_v55  ;;  %v217_v48 = vld [vmem:[%s10123_s23 + $0x38] sm:$0xff] }
  0x23   : > { %504 = vmatpush1.msra.mxu1 %v503_v57  ;;  %589 = vmatprep.subr.mxu0 %v10180_v34  ;;  %v10310_v34 = vsub.f32 %v212_v16, %v10282_v27  ;;  %v10388_v57 = vand.u32 4294901760, %v278_v53  ;;  %v10398_v60 = vsub.f32 %v310_v49, %v10373_v52  ;;  %v10409_v8 = vsub.f32 %v279_v50, %v10378_v54 }
  0x24   : > { %539 = vmatmul.mubr.f32.vlgmr.msra.gmra.mxu1 %v10113_v4  ;;  %659 = vmatprep.subr.mxu1 %v10131_v11  ;;  %v1545_v16 = vand.u32 4294901760, %v10392_v59 }
  0x25   : > { %592 = vmatpush1.msra.mxu0 %v10187_v38  ;;  %625 = vmatprep.mubr.f32.mxu0 %v13612_v1  ;;  %v1044_v40 = vand.u32 4294901760, %v10310_v34 }
  0x26   : > { %661 = vmatpush1.msra.mxu1 %v10133_v12  ;;  %628 = vmatmul.mubr.f32.vlgmr.msra.gmra.mxu0 %v10118_v6 }
  0x27   : > { %663 = vmatprep.subr.mxu1 %v10135_v13  ;;  %743 = vmatprep.subr.mxu0 %v459_v31  ;;  %v10295_v31 = vsub.f32 %v244_v3, %v10266_v20  ;;  %v10406_v3 = vand.u32 4294901760, %v246_v56 }
  0x28   : > { %665 = vmatpush1.msra.mxu1 %v10140_v17  ;;  %747 = vmatpush1.msra.mxu0 %v465_v32  ;;  %v1014_v32 = vand.u32 4294901760, %v10269_v21 }
  0x29   : > { %667 = vmatprep.subr.mxu1 %v10142_v18  ;;  %751 = vmatprep.subr.mxu0 %v471_v35  ;;  %v1020_v35 = vand.u32 4294901760, %v10279_v24  ;;  %v1032_v38 = vand.u32 4294901760, %v10295_v31 }
  0x2a   : > { %669 = vmatpush1.msra.mxu1 %v10144_v19  ;;  %755 = vmatpush1.msra.mxu0 %v477_v36  ;;  %v1009_v36 = vsub.f32 %v10258_v14, %v1008_v29 }
  0x2b   : > { %671 = vmatprep.subr.mxu1 %v10151_v23  ;;  %759 = vmatprep.subr.mxu0 %v483_v37  ;;  %v1015_v37 = vsub.f32 %v10269_v21, %v1014_v32 }
  0x2c   : > { %673 = vmatpush1.msra.mxu1 %v10156_v25  ;;  %706 = vmatprep.mubr.f32.mxu1 %v13612_v1 }
  0x2d   : > { %763 = vmatpush1.msra.mxu0 %v489_v41  ;;  %710 = vmatmul.mubr.f32.vlgmr.msra.gmra.mxu1 %v10129_v10 }
  0x2e   : > { %767 = vmatprep.subr.mxu0 %v495_v42  ;;  %837 = vmatprep.subr.mxu1 %v10131_v11  ;;  %v1003_v11 = vsub.f32 %v10252_v9, %v1002_v26  ;;  %v1033_v42 = vsub.f32 %v10295_v31, %v1032_v38 }
  0x2f   : > { %771 = vmatpush1.msra.mxu0 %v501_v46  ;;  %804 = vmatprep.mubr.f32.mxu0 %v13612_v1 }
  0x30   : > { %839 = vmatpush1.msra.mxu1 %v10133_v12  ;;  %806 = vmatmul.mubr.f32.vlgmr.msra.gmra.mxu0 %v10113_v4  ;;  %v1026_v12 = vand.u32 4294901760, %v10289_v30  ;;  %v1004_v39 = vand.u32 4294901760, %v1003_v11  ;;  %v1034_v45 = vand.u32 4294901760, %v1033_v42  ;;  %v281_v42 = vld [vmem:[%s10123_s23 + $0x238] sm:$0xff] }
  0x31   : > { %841 = vmatprep.subr.mxu1 %v10135_v13  ;;  %917 = vmatprep.subr.mxu0 %v10231_v61  ;;  %v1038_v13 = vand.u32 4294901760, %v10302_v33 }
  0x32   : > { %843 = vmatpush1.msra.mxu1 %v10140_v17  ;;  %919 = vmatpush1.msra.mxu0 %v10235_v62  ;;  %v1021_v17 = vsub.f32 %v10279_v24, %v1020_v35  ;;  %v1027_v41 = vsub.f32 %v10289_v30, %v1026_v12 }
  0x33   : > { %845 = vmatprep.subr.mxu1 %v10142_v18  ;;  %921 = vmatprep.subr.mxu0 %v10240_v0  ;;  %v1010_v18 = vand.u32 4294901760, %v1009_v36 }
  0x34   : > { %847 = vmatpush1.msra.mxu1 %v10144_v19  ;;  %923 = vmatpush1.msra.mxu0 %v10248_v7  ;;  %v1016_v19 = vand.u32 4294901760, %v1015_v37  ;;  %v1022_v43 = vand.u32 4294901760, %v1021_v17  ;;  %v1028_v44 = vand.u32 4294901760, %v1027_v41  ;;  %v313_v41 = vld [vmem:[%s10123_s23 + $0x338] sm:$0xff] }
  0x35   : > { %849 = vmatprep.subr.mxu1 %v10151_v23  ;;  %925 = vmatprep.subr.mxu0 %v10260_v15  ;;  %v1039_v23 = vsub.f32 %v10302_v33, %v1038_v13 }
  0x36   : > { %851 = vmatpush1.msra.mxu1 %v10156_v25  ;;  %884 = vmatprep.mubr.f32.mxu1 %v13612_v1  ;;  %v1045_v25 = vsub.f32 %v10310_v34, %v1044_v40 }
  0x37   : > { %927 = vmatpush1.msra.mxu0 %v10266_v20  ;;  %886 = vmatmul.mubr.f32.vlgmr.msra.gmra.mxu1 %v10113_v4  ;;  %v1040_v46 = vand.u32 4294901760, %v1039_v23  ;;  %v10509_v23 = vand.u32 4294901760, %v313_v41 }
  0x38   : > { %929 = vmatprep.subr.mxu0 %v10274_v22  ;;  %1005 = vmatprep.subr.mxu1 %v1004_v39  ;;  %v1046_v47 = vand.u32 4294901760, %v1045_v25  ;;  %v280_v25 = vld [vmem:[%s10123_s23 + $0x230] sm:$0xff] }
  0x39   : > { %931 = vmatpush1.msra.mxu0 %v10282_v27  ;;  %1011 = vmatpush1.msra.mxu1 %v1010_v18  ;;  %v10532_v49 = vsub.f32 %v313_v41, %v10509_v23  ;;  %v219_v41 = vld [vmem:[%s10123_s23 + $0x48] sm:$0xff] }
  0x3a   : > { %964 = vmatprep.mubr.f32.mxu0 %v13612_v1  ;;  %1017 = vmatprep.subr.mxu1 %v1016_v19  ;;  %v312_v19 = vld [vmem:[%s10123_s23 + $0x330] sm:$0xff] }
  0x3b   : > { %1114 = vmatprep.subr.mxu0 %v10252_v9  ;;  %970 = vmatmul.mubr.f32.vlgmr.msra.gmra.mxu0 %v10165_v28  ;;  %v10414_v9 = vand.u32 4294901760, %v215_v58 }
  0x3c   : > { %1023 = vmatpush1.msra.mxu1 %v1022_v43  ;;  %1117 = vmatpush1.msra.mxu0 %v10258_v14  ;;  %v10419_v14 = vsub.f32 %v278_v53, %v10388_v57  ;;  %v10513_v43 = vand.u32 4294901760, %v312_v19 }
  0x3d   : > { %1029 = vmatprep.subr.mxu1 %v1028_v44  ;;  %1120 = vmatprep.subr.mxu0 %v10269_v21  ;;  %v10422_v21 = vand.u32 4294901760, %v214_v2  ;;  %v10518_v44 = vand.u32 4294901760, %v281_v42 }
  0x3e   : > { %1035 = vmatpush1.msra.mxu1 %v1034_v45  ;;  %1123 = vmatpush1.msra.mxu0 %v10279_v24  ;;  %v1551_v24 = vand.u32 4294901760, %v10398_v60  ;;  %v249_v45 = vld [vmem:[%s10123_s23 + $0x138] sm:$0xff]  ;;  %v10538_v50 = vsub.f32 %v312_v19, %v10513_v43 }
  0x3f   : > { %1041 = vmatprep.subr.mxu1 %v1040_v46  ;;  %1126 = vmatprep.subr.mxu0 %v10289_v30  ;;  %v1557_v30 = vand.u32 4294901760, %v10409_v8  ;;  %v248_v46 = vld [vmem:[%s10123_s23 + $0x130] sm:$0xff]  ;;  %v10540_v53 = vand.u32 4294901760, %v249_v45 }
  0x40   : > { %1047 = vmatpush1.msra.mxu1 %v1046_v47  ;;  %1080 = vmatprep.mubr.f32.mxu1 %v13612_v1  ;;  %v1552_v11 = vsub.f32 %v10398_v60, %v1551_v24  ;;  %v10528_v47 = vand.u32 4294901760, %v280_v25 }
  0x41   : > { %1129 = vmatpush1.msra.mxu0 %v10295_v31  ;;  %1082 = vmatmul.mubr.f32.vlgmr.msra.gmra.mxu1 %v10113_v4  ;;  %v10442_v31 = vsub.f32 %v215_v58, %v10414_v9  ;;  %v10549_v58 = vsub.f32 %v281_v42, %v10518_v44 }
  0x42   : > { %1132 = vmatprep.subr.mxu0 %v10302_v33  ;;  %1202 = vmatprep.subr.mxu1 %v10231_v61  ;;  %v1563_v33 = vand.u32 4294901760, %v10419_v14 }
  0x43   : > { %1135 = vmatpush1.msra.mxu0 %v10310_v34  ;;  %1168 = vmatprep.mubr.f32.mxu0 %v13612_v1  ;;  %v1558_v34 = vsub.f32 %v10409_v8, %v1557_v30 }
  0x44   : > { %1204 = vmatpush1.msra.mxu1 %v10235_v62  ;;  %1171 = vmatmul.mubr.f32.vlgmr.msra.gmra.mxu0 %v10118_v6 }
  0x45   : > { %1206 = vmatprep.subr.mxu1 %v10240_v0  ;;  %1286 = vmatprep.subr.mxu0 %v1002_v26  ;;  %v10429_v26 = vsub.f32 %v247_v55, %v10400_v63  ;;  %v216_v55 = vld [vmem:[%s10123_s23 + $0x30] sm:$0xff] }
  0x46   : > { %1208 = vmatpush1.msra.mxu1 %v10248_v7  ;;  %1290 = vmatpush1.msra.mxu0 %v1008_v29  ;;  %v10435_v29 = vsub.f32 %v246_v56, %v10406_v3  ;;  %v10546_v56 = vand.u32 4294901760, %v248_v46 }
  0x47   : > { %1210 = vmatprep.subr.mxu1 %v10260_v15  ;;  %1294 = vmatprep.subr.mxu0 %v1014_v32  ;;  %v10450_v32 = vsub.f32 %v214_v2, %v10422_v21  ;;  %v2088_v2 = vand.u32 4294901760, %v10532_v49 }
  0x48   : > { %1212 = vmatpush1.msra.mxu1 %v10266_v20  ;;  %1298 = vmatpush1.msra.mxu0 %v1020_v35  ;;  %v1575_v35 = vand.u32 4294901760, %v10435_v29 }
  0x49   : > { %1214 = vmatprep.subr.mxu1 %v10274_v22  ;;  %1302 = vmatprep.subr.mxu0 %v1026_v12  ;;  %v1587_v12 = vand.u32 4294901760, %v10450_v32 }
  0x4a   : > { %1216 = vmatpush1.msra.mxu1 %v10282_v27  ;;  %1249 = vmatprep.mubr.f32.mxu1 %v13612_v1 }
  0x4b   : > { %1306 = vmatpush1.msra.mxu0 %v1032_v38  ;;  %1253 = vmatmul.mubr.f32.vlgmr.msra.gmra.mxu1 %v10129_v10  ;;  %v1576_v38 = vsub.f32 %v10435_v29, %v1575_v35 }
  0x4c   : > { %1310 = vmatprep.subr.mxu0 %v1038_v13  ;;  %1380 = vmatprep.subr.mxu1 %v10231_v61  ;;  %v1546_v61 = vsub.f32 %v10392_v59, %v1545_v16 }
  0x4d   : > { %1314 = vmatpush1.msra.mxu0 %v1044_v40  ;;  %1347 = vmatprep.mubr.f32.mxu0 %v13612_v1  ;;  %v1577_v17 = vand.u32 4294901760, %v1576_v38  ;;  %v283_v38 = vld [vmem:[%s10123_s23 + $0x248] sm:$0xff] }
  0x4e   : > { %1382 = vmatpush1.msra.mxu1 %v10235_v62  ;;  %1349 = vmatmul.mubr.f32.vlgmr.msra.gmra.mxu0 %v10113_v4  ;;  %v1569_v62 = vand.u32 4294901760, %v10429_v26  ;;  %v1547_v36 = vand.u32 4294901760, %v1546_v61 }
  0x4f   : > { %1384 = vmatprep.subr.mxu1 %v10240_v0  ;;  %1460 = vmatprep.subr.mxu0 %v10369_v51  ;;  %v1581_v0 = vand.u32 4294901760, %v10442_v31 }
  0x50   : > { %1386 = vmatpush1.msra.mxu1 %v10248_v7  ;;  %1462 = vmatpush1.msra.mxu0 %v10373_v52  ;;  %v1564_v7 = vsub.f32 %v10419_v14, %v1563_v33  ;;  %v1570_v37 = vsub.f32 %v10429_v26, %v1569_v62 }
  0x51   : > { %1388 = vmatprep.subr.mxu1 %v10260_v15  ;;  %1464 = vmatprep.subr.mxu0 %v10378_v54  ;;  %v1553_v15 = vand.u32 4294901760, %v1552_v11 }
  0x52   : > { %1390 = vmatpush1.msra.mxu1 %v10266_v20  ;;  %1466 = vmatpush1.msra.mxu0 %v10388_v57  ;;  %v1559_v20 = vand.u32 4294901760, %v1558_v34  ;;  %v1565_v13 = vand.u32 4294901760, %v1564_v7  ;;  %v1571_v39 = vand.u32 4294901760, %v1570_v37  ;;  %v315_v37 = vld [vmem:[%s10123_s23 + $0x348] sm:$0xff] }
  0x53   : > { %1392 = vmatprep.subr.mxu1 %v10274_v22  ;;  %1468 = vmatprep.subr.mxu0 %v10400_v63  ;;  %v1582_v22 = vsub.f32 %v10442_v31, %v1581_v0 }
  0x54   : > { %1394 = vmatpush1.msra.mxu1 %v10282_v27  ;;  %1427 = vmatprep.mubr.f32.mxu1 %v13612_v1  ;;  %v1588_v27 = vsub.f32 %v10450_v32, %v1587_v12 }
  0x55   : > { %1470 = vmatpush1.msra.mxu0 %v10406_v3  ;;  %1429 = vmatmul.mubr.f32.vlgmr.msra.gmra.mxu1 %v10113_v4  ;;  %v1583_v40 = vand.u32 4294901760, %v1582_v22  ;;  %v10649_v22 = vand.u32 4294901760, %v315_v37 }
  0x56   : > { %1472 = vmatprep.subr.mxu0 %v10414_v9  ;;  %1548 = vmatprep.subr.mxu1 %v1547_v36  ;;  %v1589_v18 = vand.u32 4294901760, %v1588_v27  ;;  %v282_v27 = vld [vmem:[%s10123_s23 + $0x240] sm:$0xff] }
  0x57   : > { %1474 = vmatpush1.msra.mxu0 %v10422_v21  ;;  %1554 = vmatpush1.msra.mxu1 %v1553_v15  ;;  %v10672_v19 = vsub.f32 %v315_v37, %v10649_v22  ;;  %v221_v37 = vld [vmem:[%s10123_s23 + $0x58] sm:$0xff] }
  0x58   : > { %1507 = vmatprep.mubr.f32.mxu0 %v13612_v1  ;;  %1560 = vmatprep.subr.mxu1 %v1559_v20  ;;  %v314_v20 = vld [vmem:[%s10123_s23 + $0x340] sm:$0xff] }
  0x59   : > { %1657 = vmatprep.subr.mxu0 %v10392_v59  ;;  %1513 = vmatmul.mubr.f32.vlgmr.msra.gmra.mxu0 %v10165_v28  ;;  %v10554_v59 = vand.u32 4294901760, %v217_v48 }
  0x5a   : > { %1566 = vmatpush1.msra.mxu1 %v1565_v13  ;;  %1660 = vmatpush1.msra.mxu0 %v10398_v60  ;;  %v10559_v60 = vsub.f32 %v280_v25, %v10528_v47  ;;  %v10653_v13 = vand.u32 4294901760, %v314_v20 }
  0x5b   : > { %1572 = vmatprep.subr.mxu1 %v1571_v39  ;;  %1663 = vmatprep.subr.mxu0 %v10409_v8  ;;  %v10562_v8 = vand.u32 4294901760, %v216_v55  ;;  %v10658_v39 = vand.u32 4294901760, %v283_v38 }
  0x5c   : > { %1578 = vmatpush1.msra.mxu1 %v1577_v17  ;;  %1666 = vmatpush1.msra.mxu0 %v10419_v14  ;;  %v2094_v14 = vand.u32 4294901760, %v10538_v50  ;;  %v251_v17 = vld [vmem:[%s10123_s23 + $0x148] sm:$0xff]  ;;  %v10678_v42 = vsub.f32 %v314_v20, %v10653_v13 }
  0x5d   : > { %1584 = vmatprep.subr.mxu1 %v1583_v40  ;;  %1669 = vmatprep.subr.mxu0 %v10429_v26  ;;  %v2100_v26 = vand.u32 4294901760, %v10549_v58  ;;  %v250_v40 = vld [vmem:[%s10123_s23 + $0x140] sm:$0xff]  ;;  %v10680_v25 = vand.u32 4294901760, %v251_v17 }
  0x5e   : > { %1590 = vmatpush1.msra.mxu1 %v1589_v18  ;;  %1623 = vmatprep.mubr.f32.mxu1 %v13612_v1  ;;  %v2095_v61 = vsub.f32 %v10538_v50, %v2094_v14  ;;  %v10668_v18 = vand.u32 4294901760, %v282_v27 }
  0x5f   : > { %1672 = vmatpush1.msra.mxu0 %v10435_v29  ;;  %1625 = vmatmul.mubr.f32.vlgmr.msra.gmra.mxu1 %v10113_v4  ;;  %v10582_v29 = vsub.f32 %v217_v48, %v10554_v59  ;;  %v10689_v48 = vsub.f32 %v283_v38, %v10658_v39 }
  0x60   : > { %1675 = vmatprep.subr.mxu0 %v10442_v31  ;;  %1745 = vmatprep.subr.mxu1 %v10369_v51  ;;  %v2106_v31 = vand.u32 4294901760, %v10559_v60 }
  0x61   : > { %1678 = vmatpush1.msra.mxu0 %v10450_v32  ;;  %1711 = vmatprep.mubr.f32.mxu0 %v13612_v1  ;;  %v2101_v32 = vsub.f32 %v10549_v58, %v2100_v26 }
  0x62   : > { %1747 = vmatpush1.msra.mxu1 %v10373_v52  ;;  %1714 = vmatmul.mubr.f32.vlgmr.msra.gmra.mxu0 %v10118_v6 }
  0x63   : > { %1749 = vmatprep.subr.mxu1 %v10378_v54  ;;  %1829 = vmatprep.subr.mxu0 %v1545_v16  ;;  %v10569_v16 = vsub.f32 %v249_v45, %v10540_v53  ;;  %v218_v45 = vld [vmem:[%s10123_s23 + $0x40] sm:$0xff] }
  0x64   : > { %1751 = vmatpush1.msra.mxu1 %v10388_v57  ;;  %1833 = vmatpush1.msra.mxu0 %v1551_v24  ;;  %v10575_v24 = vsub.f32 %v248_v46, %v10546_v56  ;;  %v10686_v46 = vand.u32 4294901760, %v250_v40 }
  0x65   : > { %1753 = vmatprep.subr.mxu1 %v10400_v63  ;;  %1837 = vmatprep.subr.mxu0 %v1557_v30  ;;  %v10590_v30 = vsub.f32 %v216_v55, %v10562_v8  ;;  %v2631_v55 = vand.u32 4294901760, %v10672_v19 }
  0x66   : > { %1755 = vmatpush1.msra.mxu1 %v10406_v3  ;;  %1841 = vmatpush1.msra.mxu0 %v1563_v33  ;;  %v2118_v33 = vand.u32 4294901760, %v10575_v24 }
  0x67   : > { %1757 = vmatprep.subr.mxu1 %v10414_v9  ;;  %1845 = vmatprep.subr.mxu0 %v1569_v62  ;;  %v2130_v62 = vand.u32 4294901760, %v10590_v30 }
  0x68   : > { %1759 = vmatpush1.msra.mxu1 %v10422_v21  ;;  %1792 = vmatprep.mubr.f32.mxu1 %v13612_v1 }
  0x69   : > { %1849 = vmatpush1.msra.mxu0 %v1575_v35  ;;  %1796 = vmatmul.mubr.f32.vlgmr.msra.gmra.mxu1 %v10129_v10  ;;  %v2119_v35 = vsub.f32 %v10575_v24, %v2118_v33 }
  0x6a   : > { %1853 = vmatprep.subr.mxu0 %v1581_v0  ;;  %1923 = vmatprep.subr.mxu1 %v10369_v51  ;;  %v2089_v51 = vsub.f32 %v10532_v49, %v2088_v2 }
  0x6b   : > { %1857 = vmatpush1.msra.mxu0 %v1587_v12  ;;  %1890 = vmatprep.mubr.f32.mxu0 %v13612_v1  ;;  %v2120_v7 = vand.u32 4294901760, %v2119_v35  ;;  %v285_v35 = vld [vmem:[%s10123_s23 + $0x258] sm:$0xff] }
  0x6c   : > { %1925 = vmatpush1.msra.mxu1 %v10373_v52  ;;  %1892 = vmatmul.mubr.f32.vlgmr.msra.gmra.mxu0 %v10113_v4  ;;  %v2112_v52 = vand.u32 4294901760, %v10569_v16  ;;  %v2090_v11 = vand.u32 4294901760, %v2089_v51 }
  0x6d   : > { %1927 = vmatprep.subr.mxu1 %v10378_v54  ;;  %2003 = vmatprep.subr.mxu0 %v10509_v23  ;;  %v2124_v54 = vand.u32 4294901760, %v10582_v29 }
  0x6e   : > { %1929 = vmatpush1.msra.mxu1 %v10388_v57  ;;  %2005 = vmatpush1.msra.mxu0 %v10513_v43  ;;  %v2107_v57 = vsub.f32 %v10559_v60, %v2106_v31  ;;  %v2113_v34 = vsub.f32 %v10569_v16, %v2112_v52 }
  0x6f   : > { %1931 = vmatprep.subr.mxu1 %v10400_v63  ;;  %2007 = vmatprep.subr.mxu0 %v10518_v44  ;;  %v2096_v63 = vand.u32 4294901760, %v2095_v61 }
  0x70   : > { %1933 = vmatpush1.msra.mxu1 %v10406_v3  ;;  %2009 = vmatpush1.msra.mxu0 %v10528_v47  ;;  %v2102_v3 = vand.u32 4294901760, %v2101_v32  ;;  %v2108_v0 = vand.u32 4294901760, %v2107_v57  ;;  %v2114_v36 = vand.u32 4294901760, %v2113_v34  ;;  %v317_v34 = vld [vmem:[%s10123_s23 + $0x358] sm:$0xff] }
  0x71   : > { %1935 = vmatprep.subr.mxu1 %v10414_v9  ;;  %2011 = vmatprep.subr.mxu0 %v10540_v53  ;;  %v2125_v9 = vsub.f32 %v10582_v29, %v2124_v54 }
  0x72   : > { %1937 = vmatpush1.msra.mxu1 %v10422_v21  ;;  %1970 = vmatprep.mubr.f32.mxu1 %v13612_v1  ;;  %v2131_v21 = vsub.f32 %v10590_v30, %v2130_v62 }
  0x73   : > { %2013 = vmatpush1.msra.mxu0 %v10546_v56  ;;  %1972 = vmatmul.mubr.f32.vlgmr.msra.gmra.mxu1 %v10113_v4  ;;  %v2126_v12 = vand.u32 4294901760, %v2125_v9  ;;  %v10789_v9 = vand.u32 4294901760, %v317_v34 }
  0x74   : > { %2015 = vmatprep.subr.mxu0 %v10554_v59  ;;  %2091 = vmatprep.subr.mxu1 %v2090_v11  ;;  %v2132_v15 = vand.u32 4294901760, %v2131_v21  ;;  %v284_v21 = vld [vmem:[%s10123_s23 + $0x250] sm:$0xff] }
  0x75   : > { %2017 = vmatpush1.msra.mxu0 %v10562_v8  ;;  %2097 = vmatpush1.msra.mxu1 %v2096_v63  ;;  %v10812_v20 = vsub.f32 %v317_v34, %v10789_v9  ;;  %v223_v34 = vld [vmem:[%s10123_s23 + $0x68] sm:$0xff] }
  0x76   : > { %2050 = vmatprep.mubr.f32.mxu0 %v13612_v1  ;;  %2103 = vmatprep.subr.mxu1 %v2102_v3  ;;  %v316_v3 = vld [vmem:[%s10123_s23 + $0x350] sm:$0xff] }
  0x77   : > { %2200 = vmatprep.subr.mxu0 %v10532_v49  ;;  %2056 = vmatmul.mubr.f32.vlgmr.msra.gmra.mxu0 %v10165_v28  ;;  %v10694_v49 = vand.u32 4294901760, %v219_v41 }
  0x78   : > { %2109 = vmatpush1.msra.mxu1 %v2108_v0  ;;  %2203 = vmatpush1.msra.mxu0 %v10538_v50  ;;  %v10699_v50 = vsub.f32 %v282_v27, %v10668_v18  ;;  %v10793_v0 = vand.u32 4294901760, %v316_v3 }
  0x79   : > { %2115 = vmatprep.subr.mxu1 %v2114_v36  ;;  %2206 = vmatprep.subr.mxu0 %v10549_v58  ;;  %v10702_v58 = vand.u32 4294901760, %v218_v45  ;;  %v10798_v36 = vand.u32 4294901760, %v285_v35 }
  0x7a   : > { %2121 = vmatpush1.msra.mxu1 %v2120_v7  ;;  %2209 = vmatpush1.msra.mxu0 %v10559_v60  ;;  %v2637_v60 = vand.u32 4294901760, %v10678_v42  ;;  %v253_v7 = vld [vmem:[%s10123_s23 + $0x158] sm:$0xff]  ;;  %v10818_v38 = vsub.f32 %v316_v3, %v10793_v0 }
  0x7b   : > { %2127 = vmatprep.subr.mxu1 %v2126_v12  ;;  %2212 = vmatprep.subr.mxu0 %v10569_v16  ;;  %v2643_v16 = vand.u32 4294901760, %v10689_v48  ;;  %v252_v12 = vld [vmem:[%s10123_s23 + $0x150] sm:$0xff]  ;;  %v10820_v27 = vand.u32 4294901760, %v253_v7 }
  0x7c   : > { %2133 = vmatpush1.msra.mxu1 %v2132_v15  ;;  %2166 = vmatprep.mubr.f32.mxu1 %v13612_v1  ;;  %v2638_v51 = vsub.f32 %v10678_v42, %v2637_v60  ;;  %v10808_v15 = vand.u32 4294901760, %v284_v21 }
  0x7d   : > { %2215 = vmatpush1.msra.mxu0 %v10575_v24  ;;  %2168 = vmatmul.mubr.f32.vlgmr.msra.gmra.mxu1 %v10113_v4  ;;  %v10722_v24 = vsub.f32 %v219_v41, %v10694_v49  ;;  %v10829_v41 = vsub.f32 %v285_v35, %v10798_v36 }
  0x7e   : > { %2218 = vmatprep.subr.mxu0 %v10582_v29  ;;  %2288 = vmatprep.subr.mxu1 %v10509_v23  ;;  %v2649_v29 = vand.u32 4294901760, %v10699_v50 }
  0x7f   : > { %2221 = vmatpush1.msra.mxu0 %v10590_v30  ;;  %2254 = vmatprep.mubr.f32.mxu0 %v13612_v1  ;;  %v2644_v30 = vsub.f32 %v10689_v48, %v2643_v16 }
  0x80   : > { %2290 = vmatpush1.msra.mxu1 %v10513_v43  ;;  %2257 = vmatmul.mubr.f32.vlgmr.msra.gmra.mxu0 %v10118_v6 }
  0x81   : > { %2292 = vmatprep.subr.mxu1 %v10518_v44  ;;  %2372 = vmatprep.subr.mxu0 %v2088_v2  ;;  %v10709_v2 = vsub.f32 %v251_v17, %v10680_v25  ;;  %v220_v17 = vld [vmem:[%s10123_s23 + $0x50] sm:$0xff] }
  0x82   : > { %2294 = vmatpush1.msra.mxu1 %v10528_v47  ;;  %2376 = vmatpush1.msra.mxu0 %v2094_v14  ;;  %v10715_v14 = vsub.f32 %v250_v40, %v10686_v46  ;;  %v10826_v40 = vand.u32 4294901760, %v252_v12 }
  0x83   : > { %2296 = vmatprep.subr.mxu1 %v10540_v53  ;;  %2380 = vmatprep.subr.mxu0 %v2100_v26  ;;  %v10730_v26 = vsub.f32 %v218_v45, %v10702_v58  ;;  %v3174_v45 = vand.u32 4294901760, %v10812_v20 }
  0x84   : > { %2298 = vmatpush1.msra.mxu1 %v10546_v56  ;;  %2384 = vmatpush1.msra.mxu0 %v2106_v31  ;;  %v2661_v31 = vand.u32 4294901760, %v10715_v14 }
  0x85   : > { %2300 = vmatprep.subr.mxu1 %v10554_v59  ;;  %2388 = vmatprep.subr.mxu0 %v2112_v52  ;;  %v2673_v52 = vand.u32 4294901760, %v10730_v26 }
  0x86   : > { %2302 = vmatpush1.msra.mxu1 %v10562_v8  ;;  %2335 = vmatprep.mubr.f32.mxu1 %v13612_v1 }
  0x87   : > { %2392 = vmatpush1.msra.mxu0 %v2118_v33  ;;  %2339 = vmatmul.mubr.f32.vlgmr.msra.gmra.mxu1 %v10129_v10  ;;  %v2662_v33 = vsub.f32 %v10715_v14, %v2661_v31 }
  0x88   : > { %2396 = vmatprep.subr.mxu0 %v2124_v54  ;;  %2466 = vmatprep.subr.mxu1 %v10509_v23  ;;  %v2632_v23 = vsub.f32 %v10672_v19, %v2631_v55 }
  0x89   : > { %2400 = vmatpush1.msra.mxu0 %v2130_v62  ;;  %2433 = vmatprep.mubr.f32.mxu0 %v13612_v1  ;;  %v2663_v57 = vand.u32 4294901760, %v2662_v33  ;;  %v287_v33 = vld [vmem:[%s10123_s23 + $0x268] sm:$0xff] }
  0x8a   : > { %2468 = vmatpush1.msra.mxu1 %v10513_v43  ;;  %2435 = vmatmul.mubr.f32.vlgmr.msra.gmra.mxu0 %v10113_v4  ;;  %v2655_v43 = vand.u32 4294901760, %v10709_v2  ;;  %v2633_v61 = vand.u32 4294901760, %v2632_v23 }
  0x8b   : > { %2470 = vmatprep.subr.mxu1 %v10518_v44  ;;  %2546 = vmatprep.subr.mxu0 %v10649_v22  ;;  %v2667_v44 = vand.u32 4294901760, %v10722_v24 }
  0x8c   : > { %2472 = vmatpush1.msra.mxu1 %v10528_v47  ;;  %2548 = vmatpush1.msra.mxu0 %v10653_v13  ;;  %v2650_v47 = vsub.f32 %v10699_v50, %v2649_v29  ;;  %v2656_v32 = vsub.f32 %v10709_v2, %v2655_v43 }
  0x8d   : > { %2474 = vmatprep.subr.mxu1 %v10540_v53  ;;  %2550 = vmatprep.subr.mxu0 %v10658_v39  ;;  %v2639_v53 = vand.u32 4294901760, %v2638_v51 }
  0x8e   : > { %2476 = vmatpush1.msra.mxu1 %v10546_v56  ;;  %2552 = vmatpush1.msra.mxu0 %v10668_v18  ;;  %v2645_v56 = vand.u32 4294901760, %v2644_v30  ;;  %v2651_v54 = vand.u32 4294901760, %v2650_v47  ;;  %v2657_v11 = vand.u32 4294901760, %v2656_v32  ;;  %v319_v32 = vld [vmem:[%s10123_s23 + $0x368] sm:$0xff] }
  0x8f   : > { %2478 = vmatprep.subr.mxu1 %v10554_v59  ;;  %2554 = vmatprep.subr.mxu0 %v10680_v25  ;;  %v2668_v59 = vsub.f32 %v10722_v24, %v2667_v44 }
  0x90   : > { %2480 = vmatpush1.msra.mxu1 %v10562_v8  ;;  %2513 = vmatprep.mubr.f32.mxu1 %v13612_v1  ;;  %v2674_v8 = vsub.f32 %v10730_v26, %v2673_v52 }
  0x91   : > { %2556 = vmatpush1.msra.mxu0 %v10686_v46  ;;  %2515 = vmatmul.mubr.f32.vlgmr.msra.gmra.mxu1 %v10113_v4  ;;  %v2669_v62 = vand.u32 4294901760, %v2668_v59  ;;  %v10929_v59 = vand.u32 4294901760, %v319_v32 }
  0x92   : > { %2558 = vmatprep.subr.mxu0 %v10694_v49  ;;  %2634 = vmatprep.subr.mxu1 %v2633_v61  ;;  %v2675_v63 = vand.u32 4294901760, %v2674_v8  ;;  %v286_v8 = vld [vmem:[%s10123_s23 + $0x260] sm:$0xff] }
  0x93   : > { %2560 = vmatpush1.msra.mxu0 %v10702_v58  ;;  %2640 = vmatpush1.msra.mxu1 %v2639_v53  ;;  %v10952_v3 = vsub.f32 %v319_v32, %v10929_v59  ;;  %v225_v32 = vld [vmem:[%s10123_s23 + $0x78] sm:$0xff] }
  0x94   : > { %2593 = vmatprep.mubr.f32.mxu0 %v13612_v1  ;;  %2646 = vmatprep.subr.mxu1 %v2645_v56  ;;  %v318_v56 = vld [vmem:[%s10123_s23 + $0x360] sm:$0xff] }
  0x95   : > { %2743 = vmatprep.subr.mxu0 %v10672_v19  ;;  %2599 = vmatmul.mubr.f32.vlgmr.msra.gmra.mxu0 %v10165_v28  ;;  %v10834_v19 = vand.u32 4294901760, %v221_v37 }
  0x96   : > { %2652 = vmatpush1.msra.mxu1 %v2651_v54  ;;  %2746 = vmatpush1.msra.mxu0 %v10678_v42  ;;  %v10839_v42 = vsub.f32 %v284_v21, %v10808_v15  ;;  %v10933_v54 = vand.u32 4294901760, %v318_v56 }
  0x97   : > { %2658 = vmatprep.subr.mxu1 %v2657_v11  ;;  %2749 = vmatprep.subr.mxu0 %v10689_v48  ;;  %v10842_v48 = vand.u32 4294901760, %v220_v17  ;;  %v10938_v11 = vand.u32 4294901760, %v287_v33 }
  0x98   : > { %2664 = vmatpush1.msra.mxu1 %v2663_v57  ;;  %2752 = vmatpush1.msra.mxu0 %v10699_v50  ;;  %v3180_v50 = vand.u32 4294901760, %v10818_v38  ;;  %v255_v57 = vld [vmem:[%s10123_s23 + $0x168] sm:$0xff]  ;;  %v10958_v35 = vsub.f32 %v318_v56, %v10933_v54 }
  0x99   : > { %2670 = vmatprep.subr.mxu1 %v2669_v62  ;;  %2755 = vmatprep.subr.mxu0 %v10709_v2  ;;  %v3186_v2 = vand.u32 4294901760, %v10829_v41  ;;  %v254_v62 = vld [vmem:[%s10123_s23 + $0x160] sm:$0xff]  ;;  %v10960_v21 = vand.u32 4294901760, %v255_v57 }
  0x9a   : > { %2676 = vmatpush1.msra.mxu1 %v2675_v63  ;;  %2709 = vmatprep.mubr.f32.mxu1 %v13612_v1  ;;  %v3181_v23 = vsub.f32 %v10818_v38, %v3180_v50  ;;  %v10948_v63 = vand.u32 4294901760, %v286_v8 }
  0x9b   : > { %2758 = vmatpush1.msra.mxu0 %v10715_v14  ;;  %2711 = vmatmul.mubr.f32.vlgmr.msra.gmra.mxu1 %v10113_v4  ;;  %v10862_v14 = vsub.f32 %v221_v37, %v10834_v19  ;;  %v10969_v37 = vsub.f32 %v287_v33, %v10938_v11 }
  0x9c   : > { %2761 = vmatprep.subr.mxu0 %v10722_v24  ;;  %2831 = vmatprep.subr.mxu1 %v10649_v22  ;;  %v3192_v24 = vand.u32 4294901760, %v10839_v42 }
  0x9d   : > { %2764 = vmatpush1.msra.mxu0 %v10730_v26  ;;  %2797 = vmatprep.mubr.f32.mxu0 %v13612_v1  ;;  %v3187_v26 = vsub.f32 %v10829_v41, %v3186_v2 }
  0x9e   : > { %2833 = vmatpush1.msra.mxu1 %v10653_v13  ;;  %2800 = vmatmul.mubr.f32.vlgmr.msra.gmra.mxu0 %v10118_v6 }
  0x9f   : > { %2835 = vmatprep.subr.mxu1 %v10658_v39  ;;  %2915 = vmatprep.subr.mxu0 %v2631_v55  ;;  %v10849_v55 = vsub.f32 %v253_v7, %v10820_v27  ;;  %v222_v7 = vld [vmem:[%s10123_s23 + $0x60] sm:$0xff] }
  0xa0   : > { %2837 = vmatpush1.msra.mxu1 %v10668_v18  ;;  %2919 = vmatpush1.msra.mxu0 %v2637_v60  ;;  %v10855_v60 = vsub.f32 %v252_v12, %v10826_v40  ;;  %v10966_v12 = vand.u32 4294901760, %v254_v62 }
  0xa1   : > { %2839 = vmatprep.subr.mxu1 %v10680_v25  ;;  %2923 = vmatprep.subr.mxu0 %v2643_v16  ;;  %v10870_v16 = vsub.f32 %v220_v17, %v10842_v48  ;;  %v3717_v17 = vand.u32 4294901760, %v10952_v3 }
  0xa2   : > { %2841 = vmatpush1.msra.mxu1 %v10686_v46  ;;  %2927 = vmatpush1.msra.mxu0 %v2649_v29  ;;  %v3204_v29 = vand.u32 4294901760, %v10855_v60 }
  0xa3   : > { %2843 = vmatprep.subr.mxu1 %v10694_v49  ;;  %2931 = vmatprep.subr.mxu0 %v2655_v43  ;;  %v3216_v43 = vand.u32 4294901760, %v10870_v16 }
  0xa4   : > { %2845 = vmatpush1.msra.mxu1 %v10702_v58  ;;  %2878 = vmatprep.mubr.f32.mxu1 %v13612_v1 }
  0xa5   : > { %2935 = vmatpush1.msra.mxu0 %v2661_v31  ;;  %2882 = vmatmul.mubr.f32.vlgmr.msra.gmra.mxu1 %v10129_v10  ;;  %v3205_v31 = vsub.f32 %v10855_v60, %v3204_v29 }
  0xa6   : > { %2939 = vmatprep.subr.mxu0 %v2667_v44  ;;  %3009 = vmatprep.subr.mxu1 %v10649_v22  ;;  %v3175_v22 = vsub.f32 %v10812_v20, %v3174_v45 }
  0xa7   : > { %2943 = vmatpush1.msra.mxu0 %v2673_v52  ;;  %2976 = vmatprep.mubr.f32.mxu0 %v13612_v1  ;;  %v3206_v47 = vand.u32 4294901760, %v3205_v31  ;;  %v289_v31 = vld [vmem:[%s10123_s23 + $0x278] sm:$0xff] }
  0xa8   : > { %3011 = vmatpush1.msra.mxu1 %v10653_v13  ;;  %2978 = vmatmul.mubr.f32.vlgmr.msra.gmra.mxu0 %v10113_v4  ;;  %v3198_v13 = vand.u32 4294901760, %v10849_v55  ;;  %v3176_v51 = vand.u32 4294901760, %v3175_v22 }
  0xa9   : > { %3013 = vmatprep.subr.mxu1 %v10658_v39  ;;  %3089 = vmatprep.subr.mxu0 %v10789_v9  ;;  %v3210_v39 = vand.u32 4294901760, %v10862_v14 }
  0xaa   : > { %3015 = vmatpush1.msra.mxu1 %v10668_v18  ;;  %3091 = vmatpush1.msra.mxu0 %v10793_v0  ;;  %v3193_v18 = vsub.f32 %v10839_v42, %v3192_v24  ;;  %v3199_v30 = vsub.f32 %v10849_v55, %v3198_v13 }
  0xab   : > { %3017 = vmatprep.subr.mxu1 %v10680_v25  ;;  %3093 = vmatprep.subr.mxu0 %v10798_v36  ;;  %v3182_v25 = vand.u32 4294901760, %v3181_v23 }
  0xac   : > { %3019 = vmatpush1.msra.mxu1 %v10686_v46  ;;  %3095 = vmatpush1.msra.mxu0 %v10808_v15  ;;  %v3188_v46 = vand.u32 4294901760, %v3187_v26  ;;  %v3194_v44 = vand.u32 4294901760, %v3193_v18  ;;  %v3200_v61 = vand.u32 4294901760, %v3199_v30  ;;  %v321_v30 = vld [vmem:[%s10123_s23 + $0x378] sm:$0xff] }
  0xad   : > { %3021 = vmatprep.subr.mxu1 %v10694_v49  ;;  %3097 = vmatprep.subr.mxu0 %v10820_v27  ;;  %v3211_v49 = vsub.f32 %v10862_v14, %v3210_v39 }
  0xae   : > { %3023 = vmatpush1.msra.mxu1 %v10702_v58  ;;  %3056 = vmatprep.mubr.f32.mxu1 %v13612_v1  ;;  %v3217_v58 = vsub.f32 %v10870_v16, %v3216_v43 }
  0xaf   : > { %3099 = vmatpush1.msra.mxu0 %v10826_v40  ;;  %3058 = vmatmul.mubr.f32.vlgmr.msra.gmra.mxu1 %v10113_v4  ;;  %v3212_v52 = vand.u32 4294901760, %v3211_v49  ;;  %v11069_v49 = vand.u32 4294901760, %v321_v30 }
  0xb0   : > { %3101 = vmatprep.subr.mxu0 %v10834_v19  ;;  %3177 = vmatprep.subr.mxu1 %v3176_v51  ;;  %v3218_v53 = vand.u32 4294901760, %v3217_v58  ;;  %v288_v58 = vld [vmem:[%s10123_s23 + $0x270] sm:$0xff] }
  0xb1   : > { %3103 = vmatpush1.msra.mxu0 %v10842_v48  ;;  %3183 = vmatpush1.msra.mxu1 %v3182_v25  ;;  %v11092_v56 = vsub.f32 %v321_v30, %v11069_v49  ;;  %v227_v30 = vld [vmem:[%s10123_s23 + $0x88] sm:$0xff] }
  0xb2   : > { %3136 = vmatprep.mubr.f32.mxu0 %v13612_v1  ;;  %3189 = vmatprep.subr.mxu1 %v3188_v46  ;;  %v320_v46 = vld [vmem:[%s10123_s23 + $0x370] sm:$0xff] }
  0xb3   : > { %3286 = vmatprep.subr.mxu0 %v10812_v20  ;;  %3142 = vmatmul.mubr.f32.vlgmr.msra.gmra.mxu0 %v10165_v28  ;;  %v10974_v20 = vand.u32 4294901760, %v223_v34 }
  0xb4   : > { %3195 = vmatpush1.msra.mxu1 %v3194_v44  ;;  %3289 = vmatpush1.msra.mxu0 %v10818_v38  ;;  %v10979_v38 = vsub.f32 %v286_v8, %v10948_v63  ;;  %v11073_v44 = vand.u32 4294901760, %v320_v46 }
  0xb5   : > { %3201 = vmatprep.subr.mxu1 %v3200_v61  ;;  %3292 = vmatprep.subr.mxu0 %v10829_v41  ;;  %v10982_v41 = vand.u32 4294901760, %v222_v7  ;;  %v11078_v61 = vand.u32 4294901760, %v289_v31 }
  0xb6   : > { %3207 = vmatpush1.msra.mxu1 %v3206_v47  ;;  %3295 = vmatpush1.msra.mxu0 %v10839_v42  ;;  %v3723_v42 = vand.u32 4294901760, %v10958_v35  ;;  %v257_v47 = vld [vmem:[%s10123_s23 + $0x178] sm:$0xff]  ;;  %v11098_v33 = vsub.f32 %v320_v46, %v11073_v44 }
  0xb7   : > { %3213 = vmatprep.subr.mxu1 %v3212_v52  ;;  %3298 = vmatprep.subr.mxu0 %v10849_v55  ;;  %v3729_v55 = vand.u32 4294901760, %v10969_v37  ;;  %v256_v52 = vld [vmem:[%s10123_s23 + $0x170] sm:$0xff]  ;;  %v11100_v8 = vand.u32 4294901760, %v257_v47 }
  0xb8   : > { %3219 = vmatpush1.msra.mxu1 %v3218_v53  ;;  %3252 = vmatprep.mubr.f32.mxu1 %v13612_v1  ;;  %v3724_v22 = vsub.f32 %v10958_v35, %v3723_v42  ;;  %v11088_v53 = vand.u32 4294901760, %v288_v58 }
  0xb9   : > { %3301 = vmatpush1.msra.mxu0 %v10855_v60  ;;  %3254 = vmatmul.mubr.f32.vlgmr.msra.gmra.mxu1 %v10113_v4  ;;  %v11002_v60 = vsub.f32 %v223_v34, %v10974_v20  ;;  %v11109_v34 = vsub.f32 %v289_v31, %v11078_v61 }
  0xba   : > { %3304 = vmatprep.subr.mxu0 %v10862_v14  ;;  %3374 = vmatprep.subr.mxu1 %v10789_v9  ;;  %v3735_v14 = vand.u32 4294901760, %v10979_v38 }
  0xbb   : > { %3307 = vmatpush1.msra.mxu0 %v10870_v16  ;;  %3340 = vmatprep.mubr.f32.mxu0 %v13612_v1  ;;  %v3730_v16 = vsub.f32 %v10969_v37, %v3729_v55 }
  0xbc   : > { %3376 = vmatpush1.msra.mxu1 %v10793_v0  ;;  %3343 = vmatmul.mubr.f32.vlgmr.msra.gmra.mxu0 %v10118_v6 }
  0xbd   : > { %3378 = vmatprep.subr.mxu1 %v10798_v36  ;;  %3458 = vmatprep.subr.mxu0 %v3174_v45  ;;  %v10989_v45 = vsub.f32 %v255_v57, %v10960_v21  ;;  %v224_v57 = vld [vmem:[%s10123_s23 + $0x70] sm:$0xff] }
  0xbe   : > { %3380 = vmatpush1.msra.mxu1 %v10808_v15  ;;  %3462 = vmatpush1.msra.mxu0 %v3180_v50  ;;  %v10995_v50 = vsub.f32 %v254_v62, %v10966_v12  ;;  %v11106_v62 = vand.u32 4294901760, %v256_v52 }
  0xbf   : > { %3382 = vmatprep.subr.mxu1 %v10820_v27  ;;  %3466 = vmatprep.subr.mxu0 %v3186_v2  ;;  %v11010_v2 = vsub.f32 %v222_v7, %v10982_v41  ;;  %v4260_v7 = vand.u32 4294901760, %v11092_v56 }
  0xc0   : > { %3384 = vmatpush1.msra.mxu1 %v10826_v40  ;;  %3470 = vmatpush1.msra.mxu0 %v3192_v24  ;;  %v3747_v24 = vand.u32 4294901760, %v10995_v50 }
  0xc1   : > { %3386 = vmatprep.subr.mxu1 %v10834_v19  ;;  %3474 = vmatprep.subr.mxu0 %v3198_v13  ;;  %v3759_v13 = vand.u32 4294901760, %v11010_v2 }
  0xc2   : > { %3388 = vmatpush1.msra.mxu1 %v10842_v48  ;;  %3421 = vmatprep.mubr.f32.mxu1 %v13612_v1 }
  0xc3   : > { %3478 = vmatpush1.msra.mxu0 %v3204_v29  ;;  %3425 = vmatmul.mubr.f32.vlgmr.msra.gmra.mxu1 %v10129_v10  ;;  %v3748_v29 = vsub.f32 %v10995_v50, %v3747_v24 }
  0xc4   : > { %3482 = vmatprep.subr.mxu0 %v3210_v39  ;;  %3552 = vmatprep.subr.mxu1 %v10789_v9  ;;  %v3718_v9 = vsub.f32 %v10952_v3, %v3717_v17 }
  0xc5   : > { %3486 = vmatpush1.msra.mxu0 %v3216_v43  ;;  %3519 = vmatprep.mubr.f32.mxu0 %v13612_v1  ;;  %v3749_v18 = vand.u32 4294901760, %v3748_v29  ;;  %v291_v29 = vld [vmem:[%s10123_s23 + $0x288] sm:$0xff] }
  0xc6   : > { %3554 = vmatpush1.msra.mxu1 %v10793_v0  ;;  %3521 = vmatmul.mubr.f32.vlgmr.msra.gmra.mxu0 %v10113_v4  ;;  %v3741_v0 = vand.u32 4294901760, %v10989_v45  ;;  %v3719_v23 = vand.u32 4294901760, %v3718_v9 }
  0xc7   : > { %3556 = vmatprep.subr.mxu1 %v10798_v36  ;;  %3632 = vmatprep.subr.mxu0 %v10929_v59  ;;  %v3753_v36 = vand.u32 4294901760, %v11002_v60 }
  0xc8   : > { %3558 = vmatpush1.msra.mxu1 %v10808_v15  ;;  %3634 = vmatpush1.msra.mxu0 %v10933_v54  ;;  %v3736_v15 = vsub.f32 %v10979_v38, %v3735_v14  ;;  %v3742_v26 = vsub.f32 %v10989_v45, %v3741_v0 }
  0xc9   : > { %3560 = vmatprep.subr.mxu1 %v10820_v27  ;;  %3636 = vmatprep.subr.mxu0 %v10938_v11  ;;  %v3725_v27 = vand.u32 4294901760, %v3724_v22 }
  0xca   : > { %3562 = vmatpush1.msra.mxu1 %v10826_v40  ;;  %3638 = vmatpush1.msra.mxu0 %v10948_v63  ;;  %v3731_v40 = vand.u32 4294901760, %v3730_v16  ;;  %v3737_v39 = vand.u32 4294901760, %v3736_v15  ;;  %v3743_v51 = vand.u32 4294901760, %v3742_v26  ;;  %v323_v26 = vld [vmem:[%s10123_s23 + $0x388] sm:$0xff] }
  0xcb   : > { %3564 = vmatprep.subr.mxu1 %v10834_v19  ;;  %3640 = vmatprep.subr.mxu0 %v10960_v21  ;;  %v3754_v19 = vsub.f32 %v11002_v60, %v3753_v36 }
  0xcc   : > { %3566 = vmatpush1.msra.mxu1 %v10842_v48  ;;  %3599 = vmatprep.mubr.f32.mxu1 %v13612_v1  ;;  %v3760_v48 = vsub.f32 %v11010_v2, %v3759_v13 }
  0xcd   : > { %3642 = vmatpush1.msra.mxu0 %v10966_v12  ;;  %3601 = vmatmul.mubr.f32.vlgmr.msra.gmra.mxu1 %v10113_v4  ;;  %v3755_v43 = vand.u32 4294901760, %v3754_v19  ;;  %v11209_v19 = vand.u32 4294901760, %v323_v26 }
  0xce   : > { %3644 = vmatprep.subr.mxu0 %v10974_v20  ;;  %3720 = vmatprep.subr.mxu1 %v3719_v23  ;;  %v3761_v25 = vand.u32 4294901760, %v3760_v48  ;;  %v290_v48 = vld [vmem:[%s10123_s23 + $0x280] sm:$0xff] }
  0xcf   : > { %3646 = vmatpush1.msra.mxu0 %v10982_v41  ;;  %3726 = vmatpush1.msra.mxu1 %v3725_v27  ;;  %v11232_v46 = vsub.f32 %v323_v26, %v11209_v19 }
  0xd0   : > { %3679 = vmatprep.mubr.f32.mxu0 %v13612_v1  ;;  %3732 = vmatprep.subr.mxu1 %v3731_v40  ;;  %v322_v40 = vld [vmem:[%s10123_s23 + $0x380] sm:$0xff] }
  0xd1   : > { %3829 = vmatprep.subr.mxu0 %v10952_v3  ;;  %3685 = vmatmul.mubr.f32.vlgmr.msra.gmra.mxu0 %v10165_v28  ;;  %v11114_v3 = vand.u32 4294901760, %v225_v32 }
  0xd2   : > { %3738 = vmatpush1.msra.mxu1 %v3737_v39  ;;  %3832 = vmatpush1.msra.mxu0 %v10958_v35  ;;  %v11119_v35 = vsub.f32 %v288_v58, %v11088_v53  ;;  %v11213_v39 = vand.u32 4294901760, %v322_v40 }
  0xd3   : > { %3744 = vmatprep.subr.mxu1 %v3743_v51  ;;  %3835 = vmatprep.subr.mxu0 %v10969_v37  ;;  %v11122_v37 = vand.u32 4294901760, %v224_v57  ;;  %v11218_v51 = vand.u32 4294901760, %v291_v29 }
  0xd4   : > { %3750 = vmatpush1.msra.mxu1 %v3749_v18  ;;  %3838 = vmatpush1.msra.mxu0 %v10979_v38  ;;  %v4266_v38 = vand.u32 4294901760, %v11098_v33  ;;  %v259_v18 = vld [vmem:[%s10123_s23 + $0x188] sm:$0xff]  ;;  %v11238_v31 = vsub.f32 %v322_v40, %v11213_v39 }
  0xd5   : > { %3756 = vmatprep.subr.mxu1 %v3755_v43  ;;  %3841 = vmatprep.subr.mxu0 %v10989_v45  ;;  %v4272_v45 = vand.u32 4294901760, %v11109_v34  ;;  %v258_v43 = vld [vmem:[%s10123_s23 + $0x180] sm:$0xff]  ;;  %v11240_v58 = vand.u32 4294901760, %v259_v18 }
  0xd6   : > { %3762 = vmatpush1.msra.mxu1 %v3761_v25  ;;  %3795 = vmatprep.mubr.f32.mxu1 %v13612_v1  ;;  %v4267_v9 = vsub.f32 %v11098_v33, %v4266_v38  ;;  %v11228_v25 = vand.u32 4294901760, %v290_v48 }
  0xd7   : > { %3844 = vmatpush1.msra.mxu0 %v10995_v50  ;;  %3797 = vmatmul.mubr.f32.vlgmr.msra.gmra.mxu1 %v10113_v4  ;;  %v11142_v50 = vsub.f32 %v225_v32, %v11114_v3  ;;  %v11248_v32 = vand.u32 4294901760, %v258_v43 }
  0xd8   : > { %3847 = vmatprep.subr.mxu0 %v11002_v60  ;;  %3917 = vmatprep.subr.mxu1 %v10929_v59  ;;  %v4278_v60 = vand.u32 4294901760, %v11119_v35 }
  0xd9   : > { %3850 = vmatpush1.msra.mxu0 %v11010_v2  ;;  %3883 = vmatprep.mubr.f32.mxu0 %v13612_v1  ;;  %v4273_v2 = vsub.f32 %v11109_v34, %v4272_v45 }
  0xda   : > { %3919 = vmatpush1.msra.mxu1 %v10933_v54  ;;  %3886 = vmatmul.mubr.f32.vlgmr.msra.gmra.mxu0 %v10118_v6 }
  0xdb   : > { %3921 = vmatprep.subr.mxu1 %v10938_v11  ;;  %4001 = vmatprep.subr.mxu0 %v3717_v17  ;;  %v11129_v17 = vsub.f32 %v257_v47, %v11100_v8  ;;  %v226_v47 = vld [vmem:[%s10123_s23 + $0x80] sm:$0xff] }
  0xdc   : > { %3923 = vmatpush1.msra.mxu1 %v10948_v63  ;;  %4005 = vmatpush1.msra.mxu0 %v3723_v42  ;;  %v11135_v42 = vsub.f32 %v256_v52, %v11106_v62 }
  0xdd   : > { %3925 = vmatprep.subr.mxu1 %v10960_v21  ;;  %4009 = vmatprep.subr.mxu0 %v3729_v55  ;;  %v11150_v55 = vsub.f32 %v224_v57, %v11122_v37  ;;  %v11243_v52 = vpop.f32.mrf.mxu0  ;;  %v11261_v57 = vsub.f32 %v290_v48, %v11228_v25  ;;  %v324_v48 = vld [vmem:[%s10123_s23 + $0x390] sm:$0xff] }
  0xde   : > { %3927 = vmatpush1.msra.mxu1 %v10966_v12  ;;  %4013 = vmatpush1.msra.mxu0 %v3735_v14  ;;  %v4290_v14 = vand.u32 4294901760, %v11135_v42 }
  0xdf   : > { %3929 = vmatprep.subr.mxu1 %v10974_v20  ;;  %4017 = vmatprep.subr.mxu0 %v3741_v0  ;;  %v4302_v0 = vand.u32 4294901760, %v11150_v55 }
  0xe0   : > { %3931 = vmatpush1.msra.mxu1 %v10982_v41  ;;  %3964 = vmatprep.mubr.f32.mxu1 %v13612_v1 }
  0xe1   : > { %4021 = vmatpush1.msra.mxu0 %v3747_v24  ;;  %3968 = vmatmul.mubr.f32.vlgmr.msra.gmra.mxu1 %v10129_v10  ;;  %v4291_v24 = vsub.f32 %v11135_v42, %v4290_v14 }
  0xe2   : > { %4025 = vmatprep.subr.mxu0 %v3753_v36  ;;  %4095 = vmatprep.subr.mxu1 %v10929_v59  ;;  %v4261_v59 = vsub.f32 %v11092_v56, %v4260_v7 }
  0xe3   : > { %4029 = vmatpush1.msra.mxu0 %v3759_v13  ;;  %4062 = vmatprep.mubr.f32.mxu0 %v13612_v1  ;;  %v4292_v15 = vand.u32 4294901760, %v4291_v24 }
  0xe4   : > { %4097 = vmatpush1.msra.mxu1 %v10933_v54  ;;  %4064 = vmatmul.mubr.f32.vlgmr.msra.gmra.mxu0 %v10113_v4  ;;  %v4284_v54 = vand.u32 4294901760, %v11129_v17  ;;  %v4262_v22 = vand.u32 4294901760, %v4261_v59 }
  0xe5   : > { %4099 = vmatprep.subr.mxu1 %v10938_v11  ;;  %4175 = vmatprep.subr.mxu0 %v11069_v49  ;;  %v4296_v11 = vand.u32 4294901760, %v11142_v50 }
  0xe6   : > { %4101 = vmatpush1.msra.mxu1 %v10948_v63  ;;  %4177 = vmatpush1.msra.mxu0 %v11073_v44  ;;  %v4279_v63 = vsub.f32 %v11119_v35, %v4278_v60  ;;  %v4285_v16 = vsub.f32 %v11129_v17, %v4284_v54 }
  0xe7   : > { %4103 = vmatprep.subr.mxu1 %v10960_v21  ;;  %4179 = vmatprep.subr.mxu0 %v11078_v61  ;;  %v4268_v21 = vand.u32 4294901760, %v4267_v9  ;;  %v11303_v9 = vpop.f32.mrf.mxu1 }
  0xe8   : > { %4105 = vmatpush1.msra.mxu1 %v10966_v12  ;;  %4181 = vmatpush1.msra.mxu0 %v11088_v53  ;;  %v4274_v12 = vand.u32 4294901760, %v4273_v2  ;;  %v4280_v36 = vand.u32 4294901760, %v4279_v63  ;;  %v4286_v23 = vand.u32 4294901760, %v4285_v16 }
  0xe9   : > { %4107 = vmatprep.subr.mxu1 %v10974_v20  ;;  %4183 = vmatprep.subr.mxu0 %v11100_v8  ;;  %v4297_v20 = vsub.f32 %v11142_v50, %v4296_v11 }
  0xea   : > { %4109 = vmatpush1.msra.mxu1 %v10982_v41  ;;  %4142 = vmatprep.mubr.f32.mxu1 %v13612_v1  ;;  %v4303_v41 = vsub.f32 %v11150_v55, %v4302_v0 }
  0xeb   : > { %4185 = vmatpush1.msra.mxu0 %v11106_v62  ;;  %4144 = vmatmul.mubr.f32.vlgmr.msra.gmra.mxu1 %v10113_v4  ;;  %v4298_v13 = vand.u32 4294901760, %v4297_v20 }
  0xec   : > { %4187 = vmatprep.subr.mxu0 %v11114_v3  ;;  %4263 = vmatprep.subr.mxu1 %v4262_v22  ;;  %v4304_v27 = vand.u32 4294901760, %v4303_v41 }
  0xed   : > { %4189 = vmatpush1.msra.mxu0 %v11122_v37  ;;  %4269 = vmatpush1.msra.mxu1 %v4268_v21 }
  0xee   : > { %4222 = vmatprep.mubr.f32.mxu0 %v13612_v1  ;;  %4275 = vmatprep.subr.mxu1 %v4274_v12 }
  0xef   : > { %4372 = vmatprep.subr.mxu0 %v11092_v56  ;;  %4228 = vmatmul.mubr.f32.vlgmr.msra.gmra.mxu0 %v10165_v28  ;;  %v11251_v56 = vsub.f32 %v291_v29, %v11218_v51  ;;  %v325_v29 = vld [vmem:[%s10123_s23 + $0x398] sm:$0xff] }
  0xf0   : > { %4281 = vmatpush1.msra.mxu1 %v4280_v36  ;;  %4375 = vmatpush1.msra.mxu0 %v11098_v33  ;;  %v11256_v33 = vand.u32 4294901760, %v227_v30 }
  0xf1   : > { %4287 = vmatprep.subr.mxu1 %v4286_v23  ;;  %4378 = vmatprep.subr.mxu0 %v11109_v34  ;;  %v4803_v34 = vand.u32 4294901760, %v11232_v46 }
  0xf2   : > { %4293 = vmatpush1.msra.mxu1 %v4292_v15  ;;  %4381 = vmatpush1.msra.mxu0 %v11119_v35  ;;  %v11264_v35 = vand.u32 4294901760, %v226_v47  ;;  %v11286_v59 = vsub.f32 %v227_v30, %v11256_v33 }
  0xf3   : > { %4299 = vmatprep.subr.mxu1 %v4298_v13  ;;  %4384 = vmatprep.subr.mxu0 %v11129_v17  ;;  %v11273_v17 = vpop.f32.mrf.mxu0 }
  0xf4   : > { %4305 = vmatpush1.msra.mxu1 %v4304_v27  ;;  %4338 = vmatprep.mubr.f32.mxu1 %v13612_v1 }
  0xf5   : > { %4387 = vmatpush1.msra.mxu0 %v11135_v42  ;;  %4340 = vmatmul.mubr.f32.vlgmr.msra.gmra.mxu1 %v10113_v4  ;;  %v4815_v42 = vand.u32 4294901760, %v11251_v56 }
  0xf6   : > { %4390 = vmatprep.subr.mxu0 %v11142_v50  ;;  %4460 = vmatprep.subr.mxu1 %v11069_v49  ;;  %v11294_v50 = vsub.f32 %v226_v47, %v11264_v35  ;;  %v11377_v47 = vand.u32 4294901760, %v325_v29 }
  0xf7   : > { %4393 = vmatpush1.msra.mxu0 %v11150_v55  ;;  %4426 = vmatprep.mubr.f32.mxu0 %v13612_v1 }
  0xf8   : > { %4462 = vmatpush1.msra.mxu1 %v11073_v44  ;;  %4429 = vmatmul.mubr.f32.vlgmr.msra.gmra.mxu0 %v10118_v6  ;;  %v4845_v22 = vand.u32 4294901760, %v11294_v50 }
  0xf9   : > { %4464 = vmatprep.subr.mxu1 %v11078_v61  ;;  %4544 = vmatprep.subr.mxu0 %v4260_v7  ;;  %v4809_v7 = vand.u32 4294901760, %v11238_v31 }
  0xfa   : > { %4466 = vmatpush1.msra.mxu1 %v11088_v53  ;;  %4548 = vmatpush1.msra.mxu0 %v4266_v38  ;;  %v11271_v38 = vsub.f32 %v259_v18, %v11240_v58  ;;  %v4846_v20 = vsub.f32 %v11294_v50, %v4845_v22  ;;  %v293_v18 = vld [vmem:[%s10123_s23 + $0x298] sm:$0xff] }
  0xfb   : > { %4468 = vmatprep.subr.mxu1 %v11100_v8  ;;  %4552 = vmatprep.subr.mxu0 %v4272_v45  ;;  %v11279_v45 = vsub.f32 %v258_v43, %v11248_v32  ;;  %v4810_v55 = vsub.f32 %v11238_v31, %v4809_v7 }
  0xfc   : > { %4470 = vmatpush1.msra.mxu1 %v11106_v62  ;;  %4556 = vmatpush1.msra.mxu0 %v4278_v60  ;;  %v4821_v60 = vand.u32 4294901760, %v11261_v57  ;;  %v4847_v27 = vand.u32 4294901760, %v4846_v20 }
  0xfd   : > { %4472 = vmatprep.subr.mxu1 %v11114_v3  ;;  %4560 = vmatprep.subr.mxu0 %v4284_v54  ;;  %v11305_v54 = vpop.f32.mrf.mxu0  ;;  %v4833_v2 = vand.u32 4294901760, %v11279_v45 }
  0xfe   : > { %4474 = vmatpush1.msra.mxu1 %v11122_v37  ;;  %4507 = vmatprep.mubr.f32.mxu1 %v13612_v1 }
  0xff   : > { %4564 = vmatpush1.msra.mxu0 %v4290_v14  ;;  %4511 = vmatmul.mubr.f32.vlgmr.msra.gmra.mxu1 %v10129_v10  ;;  %v4839_v14 = vand.u32 4294901760, %v11286_v59 }
 0x100   : > { %4568 = vmatprep.subr.mxu0 %v4296_v11  ;;  %4638 = vmatprep.subr.mxu1 %v11069_v49  ;;  %v4804_v49 = vsub.f32 %v11232_v46, %v4803_v34 }
 0x101   : > { %4572 = vmatpush1.msra.mxu0 %v4302_v0  ;;  %4605 = vmatprep.mubr.f32.mxu0 %v13612_v1  ;;  %v11327_v0 = vpop.f32.mrf.mxu1  ;;  %v4840_v16 = vsub.f32 %v11286_v59, %v4839_v14 }
 0x102   : > { %4640 = vmatpush1.msra.mxu1 %v11073_v44  ;;  %4607 = vmatmul.mubr.f32.vlgmr.msra.gmra.mxu0 %v10113_v4  ;;  %v4827_v44 = vand.u32 4294901760, %v11271_v38  ;;  %v4805_v11 = vand.u32 4294901760, %v4804_v49  ;;  %v11381_v49 = vand.u32 4294901760, %v324_v48 }
 0x103   : > { %4642 = vmatprep.subr.mxu1 %v11078_v61  ;;  %4718 = vmatprep.subr.mxu0 %v11209_v19  ;;  %v4816_v61 = vsub.f32 %v11251_v56, %v4815_v42  ;;  %v11341_v12 = vpop.f32.mrf.mxu1  ;;  %v4841_v23 = vand.u32 4294901760, %v4840_v16  ;;  %v11404_v16 = vsub.f32 %v325_v29, %v11377_v47 }
 0x104   : > { %4644 = vmatpush1.msra.mxu1 %v11088_v53  ;;  %4720 = vmatpush1.msra.mxu0 %v11213_v39  ;;  %v4822_v53 = vsub.f32 %v11261_v57, %v4821_v60  ;;  %v4828_v63 = vsub.f32 %v11271_v38, %v4827_v44 }
 0x105   : > { %4646 = vmatprep.subr.mxu1 %v11100_v8  ;;  %4722 = vmatprep.subr.mxu0 %v11218_v51  ;;  %v4811_v8 = vand.u32 4294901760, %v4810_v55  ;;  %v4817_v21 = vand.u32 4294901760, %v4816_v61  ;;  %v11353_v15 = vpop.f32.mrf.mxu1  ;;  %v292_v55 = vld [vmem:[%s10123_s23 + $0x290] sm:$0xff] }
 0x106   : > { %4648 = vmatpush1.msra.mxu1 %v11106_v62  ;;  %4724 = vmatpush1.msra.mxu0 %v11228_v25  ;;  %v11329_v62 = vpop.f32.mrf.mxu0  ;;  %v4829_v36 = vand.u32 4294901760, %v4828_v63 }
 0x107   : > { %4650 = vmatprep.subr.mxu1 %v11114_v3  ;;  %4726 = vmatprep.subr.mxu0 %v11240_v58  ;;  %v4834_v3 = vsub.f32 %v11279_v45, %v4833_v2  ;;  %v11359_v26 = vpop.f32.mrf.mxu1 }
 0x108   : > { %4652 = vmatpush1.msra.mxu1 %v11122_v37  ;;  %4685 = vmatprep.mubr.f32.mxu1 %v13612_v1  ;;  %v11343_v24 = vpop.f32.mrf.mxu0  ;;  %v4823_v37 = vand.u32 4294901760, %v4822_v53  ;;  %v261_v53 = vld [vmem:[%s10123_s23 + $0x198] sm:$0xff] }
 0x109   : > { %4728 = vmatpush1.msra.mxu0 %v11248_v32  ;;  %4687 = vmatmul.mubr.f32.vlgmr.msra.gmra.mxu1 %v10113_v4  ;;  %v4835_v41 = vand.u32 4294901760, %v4834_v3  ;;  %v11371_v43 = vpop.f32.mrf.mxu1  ;;  %v229_v3 = vld [vmem:[%s10123_s23 + $0x98] sm:$0xff] }
 0x10a   : > { %4730 = vmatprep.subr.mxu0 %v11256_v33  ;;  %4806 = vmatprep.subr.mxu1 %v4805_v11  ;;  %v11355_v13 = vpop.f32.mrf.mxu0  ;;  %v11388_v11 = vand.u32 4294901760, %v293_v18 }
 0x10b   : > { %4732 = vmatpush1.msra.mxu0 %v11264_v35  ;;  %4812 = vmatpush1.msra.mxu1 %v4811_v8  ;;  %v11384_v61 = vpop.f32.mrf.mxu1  ;;  %v260_v8 = vld [vmem:[%s10123_s23 + $0x190] sm:$0xff] }
 0x10c   : > { %4765 = vmatprep.mubr.f32.mxu0 %v13612_v1  ;;  %4818 = vmatprep.subr.mxu1 %v4817_v21  ;;  %v11361_v40 = vpop.f32.mrf.mxu0  ;;  %v11400_v21 = vand.u32 4294901760, %v292_v55 }
 0x10d   : > { %4915 = vmatprep.subr.mxu0 %v11232_v46  ;;  %4771 = vmatmul.mubr.f32.vlgmr.msra.gmra.mxu0 %v10165_v28  ;;  %v11410_v46 = vsub.f32 %v324_v48, %v11381_v49  ;;  %v11415_v20 = vpop.f32.mrf.mxu1 }
 0x10e   : > { %4824 = vmatpush1.msra.mxu1 %v4823_v37  ;;  %4918 = vmatpush1.msra.mxu0 %v11238_v31  ;;  %v11373_v30 = vpop.f32.mrf.mxu0  ;;  %v228_v37 = vld [vmem:[%s10123_s23 + $0x90] sm:$0xff]  ;;  %v11417_v31 = vpop.permute.xlu0 %342 }
 0x10f   : > { %4830 = vmatprep.subr.mxu1 %v4829_v36  ;;  %4921 = vmatprep.subr.mxu0 %v11251_v56  ;;  %v11425_v56 = vsub.f32 %v293_v18, %v11388_v11  ;;  %v429_v29 = vadd.f32 %v11243_v52, %v11417_v31 }
 0x110   : > { %4836 = vmatpush1.msra.mxu1 %v4835_v41  ;;  %4924 = vmatpush1.msra.mxu0 %v11261_v57  ;;  %v11395_v63 = vpop.f32.mrf.mxu0  ;;  %v11434_v41 = vpop.f32.mrf.mxu1  ;;  %v11439_v57 = vsub.f32 %v292_v55, %v11400_v21 }
 0x111   : > { %4842 = vmatprep.subr.mxu1 %v4841_v23  ;;  %4927 = vmatprep.subr.mxu0 %v11271_v38  ;;  %v11442_v23 = vand.u32 4294901760, %v228_v37  ;;  %v13598_v38 = vand.u32 4294901760, %v11410_v46 }
 0x112   : > { %4848 = vmatpush1.msra.mxu1 %v4847_v27  ;;  %4881 = vmatprep.mubr.f32.mxu1 %v13612_v1  ;;  %v11432_v36 = vpop.f32.mrf.mxu0  ;;  %v11468_v18 = vpop.f32.mrf.mxu1 }
 0x113   : > { %4930 = vmatpush1.msra.mxu0 %v11279_v45  ;;  %4883 = vmatmul.mubr.f32.vlgmr.msra.gmra.mxu1 %v10113_v4  ;;  %v11476_v52 = vsub.f32 %v228_v37, %v11442_v23 }
 0x114   : > { %4933 = vmatprep.subr.mxu0 %v11286_v59  ;;  %5003 = vmatprep.subr.mxu1 %v11209_v19  ;;  %v11451_v27 = vpop.f32.mrf.mxu0  ;;  %v13592_v59 = vand.u32 4294901760, %v11439_v57 }
 0x115   : > { %4936 = vmatpush1.msra.mxu0 %v11294_v50  ;;  %4969 = vmatprep.mubr.f32.mxu0 %v13612_v1  ;;  %v431_v50 = vadd.f32 %v11273_v17, %v11417_v31  ;;  %v11489_v55 = vpop.f32.mrf.mxu1  ;;  %v13597_v37 = vand.u32 4294901760, %v11476_v52 }
 0x116   : > { %5005 = vmatpush1.msra.mxu1 %v11213_v39  ;;  %4972 = vmatmul.mubr.f32.vlgmr.msra.gmra.mxu0 %v10118_v6 }
 0x117   : > { %5007 = vmatprep.subr.mxu1 %v11218_v51  ;;  %5087 = vmatprep.subr.mxu0 %v4803_v34  ;;  %v11412_v34 = vand.u32 4294901760, %v261_v53  ;;  %v11515_v5 = vpop.f32.mrf.mxu1 }
 0x118   : > { %5009 = vmatpush1.msra.mxu1 %v11228_v25  ;;  %5091 = vmatpush1.msra.mxu0 %v4809_v7  ;;  %v11422_v7 = vand.u32 4294901760, %v260_v8 }
 0x119   : > { %5011 = vmatprep.subr.mxu1 %v11240_v58  ;;  %5095 = vmatprep.subr.mxu0 %v4815_v42  ;;  %v11430_v42 = vand.u32 4294901760, %v229_v3 }
 0x11a   : > { %5013 = vmatpush1.msra.mxu1 %v11248_v32  ;;  %5099 = vmatpush1.msra.mxu0 %v4821_v60  ;;  %v13599_v60 = vand.u32 4294901760, %v11404_v16  ;;  %v11459_v45 = vsub.f32 %v260_v8, %v11422_v7 }
 0x11b   : > { %5015 = vmatprep.subr.mxu1 %v11256_v33  ;;  %5103 = vmatprep.subr.mxu0 %v4827_v44  ;;  %v11449_v44 = vsub.f32 %v261_v53, %v11412_v34  ;;  %v11466_v48 = vsub.f32 %v229_v3, %v11430_v42  ;;  %v541_v53 = vadd.f32 %v11303_v9, %v429_v29 }
 0x11c   : > { %5017 = vmatpush1.msra.mxu1 %v11264_v35  ;;  %5050 = vmatprep.mubr.f32.mxu1 %v13612_v1  ;;  %v13593_v17 = vand.u32 4294901760, %v11459_v45  ;;  %v5365_v9 = vsub.f32 %v11439_v57, %v13592_v59  ;;  %v543_v29 = vadd.f32 %v11327_v0, %v431_v50 }
 0x11d   : > { %5107 = vmatpush1.msra.mxu0 %v4833_v2  ;;  %5054 = vmatmul.mubr.f32.vlgmr.msra.gmra.mxu1 %v10129_v10  ;;  %v13596_v2 = vand.u32 4294901760, %v11425_v56  ;;  %v13594_v8 = vand.u32 4294901760, %v11466_v48  ;;  %v630_v59 = vadd.f32 %v11305_v54, %v541_v53 }
 0x11e   : > { %5111 = vmatprep.subr.mxu0 %v4839_v14  ;;  %5181 = vmatprep.subr.mxu1 %v11209_v19  ;;  %v5347_v19 = vsub.f32 %v11404_v16, %v13599_v60  ;;  %v13595_v14 = vand.u32 4294901760, %v11449_v44 }
 0x11f   : > { %5115 = vmatpush1.msra.mxu0 %v4845_v22  ;;  %5148 = vmatprep.mubr.f32.mxu0 %v13612_v1  ;;  %v11487_v22 = vpop.f32.mrf.mxu0  ;;  %v5383_v54 = vsub.f32 %v11466_v48, %v13594_v8  ;;  %v712_v53 = vadd.f32 %v11341_v12, %v630_v59 }
 0x120   : > { %5183 = vmatpush1.msra.mxu1 %v11213_v39  ;;  %5150 = vmatmul.mubr.f32.vlgmr.msra.gmra.mxu0 %v10113_v4  ;;  %v5353_v39 = vsub.f32 %v11410_v46, %v13598_v38  ;;  %v9421_v38 = vlaneseq }
 0x121   : > { %5185 = vmatprep.subr.mxu1 %v11218_v51  ;;  %5261 = vmatprep.subr.mxu0 %v11377_v47  ;;  %v5359_v51 = vsub.f32 %v11425_v56, %v13596_v2  ;;  %v1514_v3 = vpop.f32.mrf.mxu0  ;;  %v326_v2 = vld [vmem:[%s10123_s23 + $0x3a0] sm:$0xff] }
 0x122   : > { %5187 = vmatpush1.msra.mxu1 %v11228_v25  ;;  %5263 = vmatpush1.msra.mxu0 %v11381_v49  ;;  %v5348_v25 = vand.u32 4294901760, %v5347_v19  ;;  %v974_v19 = vadd.f32 %v11373_v30, %v11417_v31  ;;  %v972_v30 = vadd.f32 %v11361_v40, %v11417_v31  ;;  %v632_v40 = vadd.f32 %v11329_v62, %v543_v29 }
 0x123   : > { %5189 = vmatprep.subr.mxu1 %v11240_v58  ;;  %5265 = vmatprep.subr.mxu0 %v11388_v11  ;;  %v5354_v58 = vand.u32 4294901760, %v5353_v39  ;;  %v5360_v0 = vand.u32 4294901760, %v5359_v51  ;;  %v1516_v50 = vpop.f32.mrf.mxu0  ;;  %v1626_v39 = vpop.f32.mrf.mxu1  ;;  %v5366_v51 = vand.u32 4294901760, %v5365_v9  ;;  %v294_v9 = vld [vmem:[%s10123_s23 + $0x2a0] sm:$0xff]  ;;  %v5384_v29 = vand.u32 4294901760, %v5383_v54 }
 0x124   : > { %5191 = vmatpush1.msra.mxu1 %v11248_v32  ;;  %5267 = vmatpush1.msra.mxu0 %v11400_v21  ;;  %v5371_v32 = vsub.f32 %v11449_v44, %v13595_v14  ;;  %v1086_v14 = vadd.f32 %v11415_v20, %v974_v19  ;;  %v714_v62 = vadd.f32 %v11353_v15, %v632_v40  ;;  %v262_v15 = vld [vmem:[%s10123_s23 + $0x1a0] sm:$0xff]  ;;  %v11561_v54 = vand.u32 4294901760, %v294_v9 }
 0x125   : > { %5193 = vmatprep.subr.mxu1 %v11256_v33  ;;  %5269 = vmatprep.subr.mxu0 %v11412_v34  ;;  %v5377_v33 = vsub.f32 %v11459_v45, %v13593_v17  ;;  %v5389_v17 = vsub.f32 %v11476_v52, %v13597_v37  ;;  %v1517_v37 = vadd.f32 %v1516_v50, %v11417_v31  ;;  %v1715_v19 = vpop.f32.mrf.mxu0  ;;  %v11553_v50 = vand.u32 4294901760, %v326_v2 }
 0x126   : > { %5195 = vmatpush1.msra.mxu1 %v11264_v35  ;;  %5228 = vmatprep.mubr.f32.mxu1 %v13612_v1  ;;  %v327_v35 = vld [vmem:[%s10123_s23 + $0x3a8] sm:$0xff]  ;;  %v5372_v8 = vand.u32 4294901760, %v5371_v32  ;;  %v1084_v20 = vadd.f32 %v11384_v61, %v972_v30  ;;  %v1628_v32 = vpop.f32.mrf.mxu1  ;;  %v1515_v40 = vadd.f32 %v1514_v3, %v11417_v31  ;;  %v1175_v61 = vadd.f32 %v11432_v36, %v1086_v14  ;;  %v230_v3 = vld [vmem:[%s10123_s23 + $0xa0] sm:$0xff] }
 0x127   : > { %5271 = vmatpush1.msra.mxu0 %v11422_v7  ;;  %5230 = vmatmul.mubr.f32.vlgmr.msra.gmra.mxu1 %v10113_v4  ;;  %v5378_v12 = vand.u32 4294901760, %v5377_v33  ;;  %v11541_v59 = vand.u32 4294901760, %v327_v35  ;;  %v5390_v33 = vand.u32 4294901760, %v5389_v17  ;;  %v1629_v60 = vadd.f32 %v1628_v32, %v1517_v37 }
 0x128   : > { %5273 = vmatprep.subr.mxu0 %v11430_v42  ;;  %5349 = vmatprep.subr.mxu1 %v5348_v25  ;;  %v295_v25 = vld [vmem:[%s10123_s23 + $0x2a8] sm:$0xff]  ;;  %v810_v36 = vadd.f32 %v11355_v13, %v714_v62  ;;  %v1173_v14 = vadd.f32 %v11395_v63, %v1084_v20  ;;  %v1627_v37 = vadd.f32 %v1626_v39, %v1515_v40  ;;  %v11586_v13 = vshrl.u32 %v9421_v38, 7 }
 0x129   : > { %5275 = vmatpush1.msra.mxu0 %v11442_v23  ;;  %5355 = vmatpush1.msra.mxu1 %v5354_v58  ;;  %v263_v58 = vld [vmem:[%s10123_s23 + $0x1a8] sm:$0xff]  ;;  %v11559_v30 = vand.u32 4294901760, %v295_v25  ;;  %v11600_v38 = vsub.f32 %v294_v9, %v11561_v54 }
 0x12a   : > { %5308 = vmatprep.mubr.f32.mxu0 %v13612_v1  ;;  %5361 = vmatprep.subr.mxu1 %v5360_v0  ;;  %v808_v0 = vadd.f32 %v11343_v24, %v712_v53  ;;  %v231_v24 = vld [vmem:[%s10123_s23 + $0xa8] sm:$0xff]  ;;  %v1797_v53 = vpop.f32.mrf.mxu1  ;;  %13629 = vst [vmem:[#allocation3_spill] sm:$0xff] %v11586_v13  ;;  %v11589_v62 = vadd.f32 %v11371_v43, %v810_v36  ;;  %v13630_v36 = vand.u32 4294901760, %v11404_v16 }
 0x12b   : > { %5458 = vmatprep.subr.mxu0 %v11404_v16  ;;  %5314 = vmatmul.mubr.f32.vlgmr.msra.gmra.mxu0 %v10165_v28  ;;  %v11584_v28 = vand.u32 4294901760, %v231_v24  ;;  %v1255_v63 = vadd.f32 %v11434_v41, %v1173_v14  ;;  %v11603_v43 = vsub.f32 %v295_v25, %v11559_v30 }
 0x12c   : > { %5367 = vmatpush1.msra.mxu1 %v5366_v51  ;;  %5461 = vmatpush1.msra.mxu0 %v11410_v46  ;;  %v11565_v17 = vadd.f32 %v11359_v26, %v808_v0  ;;  %v11568_v51 = vand.u32 4294901760, %v263_v58  ;;  %v1257_v26 = vadd.f32 %v11468_v18, %v1175_v61  ;;  %v11578_v0 = vand.u32 4294901760, %v262_v15 }
 0x12d   : > { %5373 = vmatprep.subr.mxu1 %v5372_v8  ;;  %5464 = vmatprep.subr.mxu0 %v11425_v56  ;;  %v11571_v8 = vsub.f32 %v327_v35, %v11541_v59  ;;  %v11582_v35 = vsub.f32 %v326_v2, %v11553_v50  ;;  %v11594_v18 = vand.u32 4294901760, %v230_v3  ;;  %v11619_v25 = vsub.f32 %v231_v24, %v11584_v28 }
 0x12e   : > { %5379 = vmatpush1.msra.mxu1 %v5378_v12  ;;  %5467 = vmatpush1.msra.mxu0 %v11439_v57  ;;  %v1717_v12 = vpop.f32.mrf.mxu0  ;;  %v9069_v2 = vrot.slane %v11565_v17, 7  ;;  %v1353_v41 = vadd.f32 %v11487_v22, %v1257_v26  ;;  %v11609_v32 = vsub.f32 %v262_v15, %v11578_v0  ;;  %v11613_v40 = vsub.f32 %v263_v58, %v11568_v51 }
 0x12f   : > { %5385 = vmatprep.subr.mxu1 %v5384_v29  ;;  %5470 = vmatprep.subr.mxu0 %v11449_v44  ;;  %v1799_v29 = vpop.f32.mrf.mxu1  ;;  %v1718_v39 = vadd.f32 %v1717_v12, %v1629_v60  ;;  %v13608_v60 = vand.u32 4294901760, %v11582_v35  ;;  %v1716_v61 = vadd.f32 %v1715_v19, %v1627_v37  ;;  %v9070_v15 = vrot.slane %v11589_v62, 7 }
 0x130   : > { %5391 = vmatpush1.msra.mxu1 %v5390_v33  ;;  %5424 = vmatprep.mubr.f32.mxu1 %v13612_v1  ;;  %v1893_v20 = vpop.f32.mrf.mxu0  ;;  %v13609_v33 = vand.u32 4294901760, %v11571_v8  ;;  %v1351_v58 = vadd.f32 %v11451_v27, %v1255_v63  ;;  %v11627_v14 = vsub.f32 %v230_v3, %v11594_v18  ;;  %v11630_v26 = vadd.f32 %v11515_v5, %v1353_v41 }
 0x131   : > { %5473 = vmatpush1.msra.mxu0 %v11459_v45  ;;  %5426 = vmatmul.mubr.f32.vlgmr.msra.gmra.mxu1 %v10113_v4  ;;  %v1800_v22 = vadd.f32 %v1799_v29, %v1718_v39  ;;  %vm11633_vm1 = vcmp.gt.f32.partialorder %v11565_v17, %v9069_v2  ;;  %v13633_v24 = vand.u32 4294901760, %v11410_v46  ;;  %v13602_v16 = vand.u32 4294901760, %v11603_v43 }
 0x132   : > { %5476 = vmatprep.subr.mxu0 %v11466_v48  ;;  %5546 = vmatprep.subr.mxu1 %v11377_v47  ;;  %v1895_v12 = vpop.f32.mrf.mxu0  ;;  %v1798_v27 = vadd.f32 %v1797_v53, %v1716_v61  ;;  %v13634_v3 = vand.u32 4294901760, %v11425_v56  ;;  %v11645_v5 = vadd.f32 %v11489_v55, %v1351_v58  ;;  %v13604_v37 = vand.u32 4294901760, %v11600_v38 }
 0x133   : > { %5479 = vmatpush1.msra.mxu0 %v11476_v52  ;;  %5512 = vmatprep.mubr.f32.mxu0 %v13612_v1  ;;  %v1973_v9 = vpop.f32.mrf.mxu1  ;;  %v13603_v63 = vand.u32 4294901760, %v11613_v40  ;;  %v13605_v29 = vand.u32 4294901760, %v11609_v32  ;;  %v13635_v46 = vand.u32 4294901760, %v11439_v57  ;;  %v11656_v56 = vsub.f32 %v11571_v8, %v13609_v33 }
 0x134   : > { %5548 = vmatpush1.msra.mxu1 %v11381_v49  ;;  %5515 = vmatmul.mubr.f32.vlgmr.msra.gmra.mxu0 %v10118_v6  ;;  %v11661_v55 = vsub.f32 %v11582_v35, %v13608_v60  ;;  %v13607_v53 = vand.u32 4294901760, %v11619_v25  ;;  %v1896_v41 = vadd.f32 %v1895_v12, %v1800_v22  ;;  %v9165_v61 = vsel %vm11633_vm1, %v11565_v17, %v9069_v2 }
 0x135   : > { %5550 = vmatprep.subr.mxu1 %v11388_v11  ;;  %5630 = vmatprep.subr.mxu0 %v13630_v36  ;;  %v1975_v39 = vpop.f32.mrf.mxu1  ;;  %vm11668_vm2 = vcmp.gt.f32.partialorder %v11589_v62, %v9070_v15  ;;  %v13638_v36 = vand.u32 4294901760, %v11449_v44  ;;  %v9072_v58 = vrot.slane %v11630_v26, 7  ;;  %v11684_v2 = vsub.f32 %v11603_v43, %v13602_v16 }
 0x136   : > { %5552 = vmatpush1.msra.mxu1 %v11400_v21  ;;  %5634 = vmatpush1.msra.mxu0 %v13633_v24  ;;  %v13606_v24 = vand.u32 4294901760, %v11627_v14  ;;  %v1894_v12 = vadd.f32 %v1893_v20, %v1798_v27  ;;  %v13639_v44 = vand.u32 4294901760, %v11459_v45  ;;  %v11700_v16 = vsub.f32 %v11613_v40, %v13603_v63 }
 0x137   : > { %5554 = vmatprep.subr.mxu1 %v11412_v34  ;;  %5638 = vmatprep.subr.mxu0 %v13634_v3  ;;  %v10064_v3 = vmov 1966171168   ;;  %v11705_v20 = vsub.f32 %v11609_v32, %v13605_v29  ;;  %v13640_v45 = vmov 0   ;;  %v13643_v29 = vand.u32 4294901760, %v11476_v52 }
 0x138   : > { %5556 = vmatpush1.msra.mxu1 %v11422_v7  ;;  %5642 = vmatpush1.msra.mxu0 %v13635_v46  ;;  %v11677_v22 = vunpack.c.l.s4 %v10064_v3  ;;  %v11686_v46 = vadd.f32 %v1975_v39, %v1896_v41  ;;  %v11695_v3 = vsub.f32 %v11600_v38, %v13604_v37  ;;  %v9197_v27 = vsel %vm11633_vm1, 1, %v13640_v45 }
 0x139   : > { %5558 = vmatprep.subr.mxu1 %v11430_v42  ;;  %5646 = vmatprep.subr.mxu0 %v13638_v36  ;;  %v9071_v36 = vrot.slane %v11645_v5, 7  ;;  %v9261_v39 = vrot.slane %v9165_v61, 7  ;;  %v9166_v41 = vsel %vm11668_vm2, %v11589_v62, %v9070_v15  ;;  %v11716_v63 = vadd.f32 %v1973_v9, %v1894_v12  ;;  %v2057_v9 = vpop.f32.mrf.mxu0 }
 0x13a   : > { %5560 = vmatpush1.msra.mxu1 %v11442_v23  ;;  %5593 = vmatprep.mubr.f32.mxu1 %v13612_v1  ;;  %v11719_v37 = vsub.s32 2, %v11586_v13  ;;  %vm11725_vm3 = vcmp.gt.f32.partialorder %v11630_v26, %v9072_v58  ;;  %v5891_v52 = vand.u32 4294901760, %v11656_v56  ;;  %v5897_v15 = vand.u32 4294901760, %v11661_v55 }
 0x13b   : > { %5650 = vmatpush1.msra.mxu0 %v13639_v44  ;;  %5597 = vmatmul.mubr.f32.vlgmr.msra.gmra.mxu1 %v10129_v10  ;;  %v13641_v44 = vand.u32 4294901760, %v11466_v48  ;;  %v11732_v48 = vsub.f32 %v11619_v25, %v13607_v53  ;;  %v9074_v61 = vrot.slane %v11686_v46, 7  ;;  %v9357_v12 = vrot.slane %v9197_v27, 7 }
 0x13c   : > { %5724 = vmatprep.subr.mxu1 %v11377_v47  ;;  %13642 = vst [vmem:[#allocation4_spill] sm:$0xff] %v11719_v37  ;;  %5691 = vmatprep.mubr.f32.mxu0 %v13612_v1  ;;  %v11737_v47 = vsub.f32 %v11627_v14, %v13606_v24  ;;  %v9262_v24 = vrot.slane %v9166_v41, 7  ;;  %vm11751_vm4 = vcmp.gt.f32.partialorder %v11645_v5, %v9071_v36  ;;  %v5909_v55 = vand.u32 4294901760, %v11695_v3  ;;  %v2059_v41 = vpop.f32.mrf.mxu0 }
 0x13d   : > { %5654 = vmatprep.subr.mxu0 %v13641_v44  ;;  %5726 = vmatpush1.msra.mxu1 %v11381_v49  ;;  %v9198_v44 = vsel %vm11668_vm2, 1, %v13640_v45  ;;  %vm11756_vm5 = vcmp.gt.f32.partialorder %v11565_v17, %v9261_v39  ;;  %v9073_v57 = vrot.slane %v11716_v63, 7  ;;  %v5915_v17 = vand.u32 4294901760, %v11700_v16  ;;  %v2169_v53 = vpop.f32.mrf.mxu1 }
 0x13e   : > { %5658 = vmatpush1.msra.mxu0 %v13643_v29  ;;  %v5903_v29 = vand.u32 4294901760, %v11684_v2  ;;  %5728 = vmatprep.subr.mxu1 %v11388_v11  ;;  %v9168_v11 = vsel %vm11725_vm3, %v11630_v26, %v9072_v58  ;;  %v9358_v58 = vrot.slane %v9198_v44, 7  ;;  %vm11779_vm6 = vcmp.gt.f32.partialorder %v11686_v46, %v9074_v61  ;;  %v13664_v2 = vld [vmem:[#allocation2_spill] sm:$0xff] }
 0x13f   : > { %5693 = vmatmul.mubr.f32.vlgmr.msra.gmra.mxu0 %v10113_v4  ;;  %5804 = vmatprep.subr.mxu0 %v11541_v59  ;;  %v2058_v33 = vadd.f32 %v2057_v9, %v11417_v31  ;;  %v11786_v39 = vsel %vm11756_vm5, 2, %v9357_v12  ;;  %vm11789_vm7 = vcmp.gt.f32.partialorder %v11589_v62, %v9262_v24  ;;  %v9264_v44 = vrot.slane %v9168_v11, 7  ;;  %v328_v9 = vld [vmem:[%s10123_s23 + $0x3b0] sm:$0xff]  ;;  %v2171_v19 = vpop.f32.mrf.mxu1 }
 0x140   : > { %5730 = vmatpush1.msra.mxu1 %v11400_v21  ;;  %5806 = vmatpush1.msra.mxu0 %v11553_v50  ;;  %v329_v21 = vld [vmem:[%s10123_s23 + $0x3b8] sm:$0xff]  ;;  %vm11803_vm8 = vcmp.gt.f32.partialorder %v11716_v63, %v9073_v57  ;;  %v2258_v12 = vpop.f32.mrf.mxu0  ;;  %v9199_v56 = vsel %vm11751_vm4, 1, %v13640_v45  ;;  %v9426_v27 = vrot.slane %v11786_v39, %v11719_v37  ;;  %v11827_v49 = vand.u32 4294901760, %v328_v9 }
 0x141   : > { %5732 = vmatprep.subr.mxu1 %v11412_v34  ;;  %5808 = vmatprep.subr.mxu0 %v11559_v30  ;;  %v9167_v34 = vsel %vm11751_vm4, %v11645_v5, %v9071_v36  ;;  %v9200_v36 = vsel %vm11725_vm3, 1, %v13640_v45  ;;  %vm11823_vm13 = vcmp.gt.f32.partialorder %v11630_v26, %v9264_v44  ;;  %v9202_v26 = vsel %vm11779_vm6, 1, %v13640_v45  ;;  %vm9881_vm3 = vmor %vm11848_vm15, %vm11834_vm14 }
 0x142   : > { %5734 = vmatpush1.msra.mxu1 %v11422_v7  ;;  %5810 = vmatpush1.msra.mxu0 %v11561_v54  ;;  %v9263_v24 = vrot.slane %v9167_v34, 7  ;;  %v9360_v11 = vrot.slane %v9200_v36, 7  ;;  %v2170_v34 = vadd.f32 %v2169_v53, %v2058_v33  ;;  %v9390_v53 = vsel %vm11789_vm7, 2, %v9358_v58  ;;  %v2260_v60 = vpop.f32.mrf.mxu0 }
 0x143   : > { %5736 = vmatprep.subr.mxu1 %v11430_v42  ;;  %5812 = vmatprep.subr.mxu0 %v11568_v51  ;;  %v2060_v42 = vadd.f32 %v2059_v41, %v11417_v31  ;;  %v11817_v41 = vand.u32 4294901760, %v329_v21  ;;  %v9359_v7 = vrot.slane %v9199_v56, 7  ;;  %vm9882_vm1 = vcmask 1042434  }
 0x144   : > { %5738 = vmatpush1.msra.mxu1 %v11442_v23  ;;  %5771 = vmatprep.mubr.f32.mxu1 %v13612_v1  ;;  %v9170_v23 = vsel %vm11779_vm6, %v11686_v46, %v9074_v61  ;;  %vm11853_vm0 = vcmp.gt.f32.partialorder %v11645_v5, %v9263_v24  ;;  %vm9883_vm2 = vsmask.f32 2560  ;;  %v9201_v5 = vsel %vm11803_vm8, 1, %v13640_v45  ;;  %v264_v61 = vld [vmem:[%s10123_s23 + $0x1b0] sm:$0xff] }
 0x145   : > { %5814 = vmatpush1.msra.mxu0 %v11578_v0  ;;  %5773 = vmatmul.mubr.f32.vlgmr.msra.gmra.mxu1 %v10113_v4  ;;  %v9430_v24 = vrot.slane %v9390_v53, %v11719_v37  ;;  %v11875_v3 = vsub.f32 %v329_v21, %v11817_v41  ;;  %v13665_v16 = vand.u32 4294901760, %v11705_v20  ;;  %vm11892_vm5 = vmand %vm9882_vm1, %vm9883_vm2  ;;  %vm9886_vm6 = vcmask 1043459  }
 0x146   : > { %5816 = vmatprep.subr.mxu0 %v11584_v28  ;;  %5892 = vmatprep.subr.mxu1 %v5891_v52  ;;  %v9169_v52 = vsel %vm11803_vm8, %v11716_v63, %v9073_v57  ;;  %v2172_v57 = vadd.f32 %v2171_v19, %v2060_v42  ;;  %v2259_v42 = vadd.f32 %v2258_v12, %v2170_v34  ;;  %v9391_v20 = vsel %vm11853_vm0, 2, %v9359_v7  ;;  %vm11937_vm11 = vmor %vm11892_vm5, %vm9881_vm3 }
 0x147   : > { %5818 = vmatpush1.msra.mxu0 %v11594_v18  ;;  %5898 = vmatpush1.msra.mxu1 %v5897_v15  ;;  %v2340_v36 = vpop.f32.mrf.mxu1  ;;  %v9266_v15 = vrot.slane %v9170_v23, 7  ;;  %v9265_v44 = vrot.slane %v9169_v52, 7  ;;  %v11872_v23 = vsub.f32 %v328_v9, %v11827_v49  ;;  %v13670_v34 = vand.u32 4294901760, %v11732_v48 }
 0x148   : > { %5851 = vmatprep.mubr.f32.mxu0 %v13612_v1  ;;  %5904 = vmatprep.subr.mxu1 %v5903_v29  ;;  %v9392_v29 = vsel %vm11823_vm13, 2, %v9360_v11  ;;  %v2261_v9 = vadd.f32 %v2260_v60, %v2172_v57  ;;  %v2341_v12 = vadd.f32 %v2340_v36, %v2259_v42  ;;  %v9361_v52 = vrot.slane %v9201_v5, 7 }
 0x149   : > { %6001 = vmatprep.subr.mxu0 %v11571_v8  ;;  %5857 = vmatmul.mubr.f32.vlgmr.msra.gmra.mxu0 %v13664_v2  ;;  %v2342_v19 = vpop.f32.mrf.mxu1  ;;  %vm11886_vm4 = vcmp.gt.f32.partialorder %v11686_v46, %v9266_v15  ;;  %v9438_v11 = vrot.slane %v9392_v29, %v11719_v37  ;;  %v296_v46 = vld [vmem:[%s10123_s23 + $0x2b0] sm:$0xff]  ;;  %vm9887_vm7 = vsmask.f32 3584  ;;  %vm11905_vm8 = vcmp.eq.s32.totalorder %v11586_v13, %v9426_v27  ;;  %v11947_v29 = vld [vmem:[%s10123_s23 + $0x1b8] sm:$0xff] }
 0x14a   : > { %5910 = vmatpush1.msra.mxu1 %v5909_v55  ;;  %6004 = vmatpush1.msra.mxu0 %v11582_v35  ;;  %v9362_v55 = vrot.slane %v9202_v26, 7  ;;  %v2436_v62 = vpop.f32.mrf.mxu0  ;;  %v9685_v53 = vunpack.c.0.s8 %v11677_v22  ;;  %v13673_v26 = vand.u32 4294901760, %v11737_v47  ;;  %vm11914_vm9 = vcmp.gt.f32.partialorder %v11716_v63, %v9265_v44  ;;  %vm11953_vm12 = vmand %vm9886_vm6, %vm9887_vm7 }
 0x14b   : > { %5916 = vmatprep.subr.mxu1 %v5915_v17  ;;  %6007 = vmatprep.subr.mxu0 %v11603_v43  ;;  %v297_v17 = vld [vmem:[%s10123_s23 + $0x2b8] sm:$0xff]  ;;  %v2343_v15 = vadd.f32 %v2342_v19, %v2261_v9  ;;  %vm11919_vm10 = vcmp.eq.s32.totalorder %v11586_v13, %v9430_v24  ;;  %v6432_v47 = vand.u32 4294901760, %v11875_v3  ;;  %v9434_v7 = vrot.slane %v9391_v20, %v11719_v37  ;;  %vm9583_vm13 = vmpackc.low %vm11905_vm8, %vm11905_vm8  ;;  %v11978_v19 = vld [vmem:[%s10123_s23 + $0xb0] sm:$0xff] }
 0x14c   : > { %5922 = vmatpush1.msra.mxu1 %v13665_v16  ;;  %6010 = vmatpush1.msra.mxu0 %v11600_v38  ;;  %v11925_v22 = vand.u32 4294901760, %v297_v17  ;;  %v9394_v63 = vsel %vm11886_vm4, 2, %v9362_v55  ;;  %v2438_v57 = vpop.f32.mrf.mxu0  ;;  %v11944_v60 = vand.u32 4294901760, %v296_v46  ;;  %v11949_v33 = vand.u32 4294901760, %v264_v61  ;;  %vm9585_vm1 = vmpackc.low %vm11919_vm10, %vm11919_vm10  ;;  %v11975_v55 = vld [vmem:[%s10123_s23 + $0xb8] sm:$0xff] }
 0x14d   : > { %5928 = vmatprep.subr.mxu1 %v13670_v34  ;;  %6013 = vmatprep.subr.mxu0 %v11613_v40  ;;  %v2437_v39 = vadd.f32 %v2436_v62, %v2341_v12  ;;  %vm11961_vm14 = vcmp.eq.s32.totalorder %v11586_v13, %v9438_v11  ;;  %v9393_v42 = vsel %vm11914_vm9, 2, %v9361_v52  ;;  %vm9890_vm15 = vcmask 1044484   ;;  %vm9889_vm2 = vmor %vm11953_vm12, %vm11937_vm11 }
 0x14e   : > { %5934 = vmatpush1.msra.mxu1 %v13673_v26  ;;  %5967 = vmatprep.mubr.f32.mxu1 %v13612_v1  ;;  %vm9891_vm0 = vsmask.f32 4608  ;;  %v6438_v62 = vand.u32 4294901760, %v11872_v23  ;;  %v9446_v16 = vrot.slane %v9394_v63, %v11719_v37  ;;  %v2439_v21 = vadd.f32 %v2438_v57, %v2343_v15  ;;  %vm12009_vm3 = vmpackc.even %vm9583_vm13, %vm9583_vm13 }
 0x14f   : > { %6016 = vmatpush1.msra.mxu0 %v11609_v32  ;;  %5969 = vmatmul.mubr.f32.vlgmr.msra.gmra.mxu1 %v10113_v4  ;;  %v11983_v12 = vsub.s32 %v9685_v53, %v11586_v13  ;;  %v13685_v56 = vand.u32 4294901760, %v11571_v8  ;;  %v11989_v20 = vand.u32 4294901760, %v11947_v29  ;;  %v11994_v11 = vsub.f32 %v11875_v3, %v6432_v47  ;;  %vm12024_vm5 = vmand %vm9890_vm15, %vm9891_vm0 }
 0x150   : > { %6019 = vmatprep.subr.mxu0 %v11619_v25  ;;  %6089 = vmatprep.subr.mxu1 %v11541_v59  ;;  %v11997_v34 = vsub.f32 %v297_v17, %v11925_v22  ;;  %vm12014_vm4 = vcmp.eq.s32.totalorder %v11586_v13, %v9434_v7  ;;  %v13690_v53 = vand.u32 4294901760, %v11582_v35  ;;  %v9442_v26 = vrot.slane %v9393_v42, %v11719_v37  ;;  %vm9589_vm6 = vmpackc.low %vm11961_vm14, %vm11961_vm14 }
 0x151   : > { %6022 = vmatpush1.msra.mxu0 %v11627_v14  ;;  %6055 = vmatprep.mubr.f32.mxu0 %v13612_v1  ;;  %v2516_v24 = vpop.f32.mrf.mxu1  ;;  %13684 = vst [vmem:[#allocation2_spill] sm:$0xff] %v11983_v12  ;;  %v13693_v63 = vand.u32 4294901760, %v11603_v43  ;;  %v12035_v35 = vsub.f32 %v296_v46, %v11944_v60  ;;  %v12038_v57 = vsub.f32 %v264_v61, %v11949_v33  ;;  %v12041_v7 = vand.u32 4294901760, %v11975_v55  ;;  %vm12052_vm7 = vmpackc.even %vm9585_vm1, %vm9585_vm1 }
 0x152   : > { %6091 = vmatpush1.msra.mxu1 %v11553_v50  ;;  %6058 = vmatmul.mubr.f32.vlgmr.msra.gmra.mxu0 %v10118_v6  ;;  %v2517_v9 = vadd.f32 %v2516_v24, %v2437_v39  ;;  %v12044_v39 = vand.u32 4294901760, %v11978_v19  ;;  %v13696_v46 = vand.u32 4294901760, %v11600_v38  ;;  %v12062_v61 = vsub.f32 %v11872_v23, %v6438_v62  ;;  %vm9587_vm10 = vmpackc.low %vm12014_vm4, %vm12014_vm4 }
 0x153   : > { %6093 = vmatprep.subr.mxu1 %v11559_v30  ;;  %6173 = vmatprep.subr.mxu0 %v13685_v56  ;;  %v2518_v52 = vpop.f32.mrf.mxu1  ;;  %vm12065_vm8 = vcmp.eq.s32.totalorder %v11586_v13, %v9446_v16  ;;  %v13699_v38 = vand.u32 4294901760, %v11613_v40  ;;  %v6434_v24 = vand.u32 4294901760, %v11994_v11  ;;  %vm12084_vm13 = vmpackc.even %vm9589_vm6, %vm9589_vm6  ;;  %vm12091_vm15 = vcmp.eq.s32.totalorder %v11586_v13, %v9442_v26 }
 0x154   : > { %6095 = vmatpush1.msra.mxu1 %v11561_v54  ;;  %6177 = vmatpush1.msra.mxu0 %v13690_v53  ;;  %v9075_v48 = vrot.slane %v2517_v9, 7  ;;  %v2519_v36 = vadd.f32 %v2518_v52, %v2439_v21  ;;  %v6444_v21 = vand.u32 4294901760, %v11997_v34  ;;  %vm12102_vm14 = vmor %vm12024_vm5, %vm9889_vm2  ;;  %v12114_v5 = vsub.f32 %v11947_v29, %v11989_v20 }
 0x155   : > { %6097 = vmatprep.subr.mxu1 %v11568_v51  ;;  %6181 = vmatprep.subr.mxu0 %v13693_v63  ;;  %v13706_v63 = vand.u32 4294901760, %v11609_v32  ;;  %vm9593_vm1 = vmpackc.low %vm12065_vm8, %vm12065_vm8  ;;  %vm9894_vm11 = vcmask 1045509   ;;  %v13709_v15 = vand.u32 4294901760, %v11619_v25  ;;  %vm9895_vm5 = vsmask.f32 5632 }
 0x156   : > { %6099 = vmatpush1.msra.mxu1 %v11578_v0  ;;  %6185 = vmatpush1.msra.mxu0 %v13696_v46  ;;  %vm9139_vm9 = vcmp.gt.f32.partialorder %v2517_v9, %v9075_v48  ;;  %v9076_v27 = vrot.slane %v2519_v36, 7  ;;  %vm12123_vm12 = vmpackc.even %vm9587_vm10, %vm9587_vm10  ;;  %v13710_v17 = vand.u32 4294901760, %v11627_v14  ;;  %v12145_v25 = vsub.f32 %v11975_v55, %v12041_v7 }
 0x157   : > { %6101 = vmatprep.subr.mxu1 %v11584_v28  ;;  %6189 = vmatprep.subr.mxu0 %v13699_v38  ;;  %v9171_v56 = vsel %vm9139_vm9, %v2517_v9, %v9075_v48  ;;  %v9203_v16 = vsel %vm9139_vm9, 1, %v13640_v45  ;;  %vm9591_vm4 = vmpackc.low %vm12091_vm15, %vm12091_vm15  ;;  %v12162_v55 = vsub.f32 %v11997_v34, %v6444_v21  ;;  %v9648_v42 = vsel %vm12052_vm7, 16843009, %v13640_v45 }
 0x158   : > { %6103 = vmatpush1.msra.mxu1 %v11594_v18  ;;  %6136 = vmatprep.mubr.f32.mxu1 %v13612_v1  ;;  %v9267_v53 = vrot.slane %v9171_v56, 7  ;;  %v9363_v48 = vrot.slane %v9203_v16, 7  ;;  %vm9140_vm0 = vcmp.gt.f32.partialorder %v2519_v36, %v9076_v27  ;;  %vm12155_vm6 = vmpackc.even %vm9593_vm1, %vm9593_vm1  ;;  %v9649_v38 = vsel %vm12123_vm12, 16843009, %v13640_v45 }
 0x159   : > { %6193 = vmatpush1.msra.mxu0 %v13706_v63  ;;  %6140 = vmatmul.mubr.f32.vlgmr.msra.gmra.mxu1 %v10129_v10  ;;  %v9172_v58 = vsel %vm9140_vm0, %v2519_v36, %v9076_v27  ;;  %v9204_v26 = vsel %vm9140_vm0, 1, %v13640_v45  ;;  %v9650_v27 = vsel %vm12084_vm13, 16843009, %v13640_v45  ;;  %v6456_v56 = vand.u32 4294901760, %v12114_v5  ;;  %vm12177_vm8 = vmand %vm9894_vm11, %vm9895_vm5 }
 0x15a   : > { %6197 = vmatprep.subr.mxu0 %v13709_v15  ;;  %6267 = vmatprep.subr.mxu1 %v11541_v59  ;;  %vm9331_vm2 = vcmp.gt.f32.partialorder %v2517_v9, %v9267_v53  ;;  %v9268_v29 = vrot.slane %v9172_v58, 7  ;;  %v9364_v46 = vrot.slane %v9204_v26, 7  ;;  %v12141_v59 = vsub.f32 %v11978_v19, %v12044_v39  ;;  %vm12189_vm7 = vmpackc.even %vm9591_vm4, %vm9591_vm4 }
 0x15b   : > { %6201 = vmatpush1.msra.mxu0 %v13710_v17  ;;  %6234 = vmatprep.mubr.f32.mxu0 %v13612_v1  ;;  %v9395_v9 = vsel %vm9331_vm2, 2, %v9363_v48  ;;  %v6450_v19 = vand.u32 4294901760, %v12035_v35  ;;  %v6462_v43 = vand.u32 4294901760, %v12038_v57  ;;  %v9647_v48 = vsel %vm12009_vm3, 16843009, %v13640_v45  ;;  %vm9897_vm2 = vmor %vm12177_vm8, %vm12102_vm14 }
 0x15c   : > { %6269 = vmatpush1.msra.mxu1 %v11553_v50  ;;  %6236 = vmatmul.mubr.f32.vlgmr.msra.gmra.mxu0 %v10113_v4  ;;  %v9450_v50 = vrot.slane %v9395_v9, %v11719_v37  ;;  %vm9332_vm9 = vcmp.gt.f32.partialorder %v2519_v36, %v9268_v29  ;;  %v9680_v36 = vcombine.low %v9649_v38, %v9650_v27  ;;  %v6440_v40 = vand.u32 4294901760, %v12062_v61  ;;  %v330_v61 = vld [vmem:[%s10123_s23 + $0x3c0] sm:$0xff] }
 0x15d   : > { %6271 = vmatprep.subr.mxu1 %v11559_v30  ;;  %6347 = vmatprep.subr.mxu0 %v11817_v41  ;;  %v9396_v16 = vsel %vm9332_vm9, 2, %v9364_v46  ;;  %v9652_v63 = vsel %vm12155_vm6, 16843009, %v13640_v45  ;;  %v6468_v58 = vand.u32 4294901760, %v12145_v25  ;;  %v9679_v26 = vcombine.low %v9647_v48, %v9648_v42 }
 0x15e   : > { %6273 = vmatpush1.msra.mxu1 %v11561_v54  ;;  %6349 = vmatpush1.msra.mxu0 %v11827_v49  ;;  %vm12195_vm10 = vcmp.eq.s32.totalorder %v11586_v13, %v9450_v50  ;;  %v9454_v54 = vrot.slane %v9396_v16, %v11719_v37  ;;  %v6474_v8 = vand.u32 4294901760, %v12141_v59  ;;  %v6457_v15 = vsub.f32 %v12114_v5, %v6456_v56 }
 0x15f   : > { %6275 = vmatprep.subr.mxu1 %v11568_v51  ;;  %6351 = vmatprep.subr.mxu0 %v11925_v22  ;;  %vm9595_vm13 = vmpackc.low %vm12195_vm10, %vm12195_vm10  ;;  %v6451_v51 = vsub.f32 %v12035_v35, %v6450_v19  ;;  %vm9898_vm1 = vcmask 1046534   ;;  %vm9899_vm11 = vsmask.f32 6656  ;;  %v9696_v29 = vrot.slane %v9680_v36, %v11983_v12 }
 0x160   : > { %6277 = vmatpush1.msra.mxu1 %v11578_v0  ;;  %6353 = vmatpush1.msra.mxu0 %v11944_v60  ;;  %vm12219_vm3 = vmpackc.even %vm9595_vm13, %vm9595_vm13  ;;  %vm12224_vm15 = vcmp.eq.s32.totalorder %v11586_v13, %v9454_v54  ;;  %v9651_v0 = vsel %vm12189_vm7, 16843009, %v13640_v45  ;;  %v6446_v46 = vand.u32 4294901760, %v12162_v55  ;;  %v6463_v27 = vsub.f32 %v12038_v57, %v6462_v43  ;;  %v334_v13 = vld [vmem:[%s10123_s23 + $0x3e0] sm:$0xff] }
 0x161   : > { %6279 = vmatprep.subr.mxu1 %v11584_v28  ;;  %6355 = vmatprep.subr.mxu0 %v11989_v20  ;;  %vm9597_vm0 = vmpackc.low %vm12224_vm15, %vm12224_vm15  ;;  %v9681_v28 = vcombine.low %v9651_v0, %v9652_v63  ;;  %v6469_v17 = vsub.f32 %v12145_v25, %v6468_v58  ;;  %v9689_v14 = vrot.slane %v9679_v26, %v11983_v12  ;;  %v6452_v55 = vand.u32 4294901760, %v6451_v51  ;;  %v331_v63 = vld [vmem:[%s10123_s23 + $0x3c8] sm:$0xff]  ;;  %v9906_v51 = vld [vmem:[%s12294_s27] sm:$0xff] }
 0x162   : > { %6281 = vmatpush1.msra.mxu1 %v11594_v18  ;;  %6314 = vmatprep.mubr.f32.mxu1 %v13612_v1  ;;  %vm9598_vm12 = vmpackc.even %vm9597_vm0, %vm9597_vm0  ;;  %v9653_v18 = vsel %vm12219_vm3, 16843009, %v13640_v45  ;;  %v6475_v50 = vsub.f32 %v12141_v59, %v6474_v8  ;;  %v6458_v16 = vand.u32 4294901760, %v6457_v15  ;;  %vm9902_vm4 = vcmask 1047559   ;;  %v299_v0 = vld [vmem:[%s10123_s23 + $0x2c8] sm:$0xff] }
 0x163   : > { %6357 = vmatpush1.msra.mxu0 %v11949_v33  ;;  %6316 = vmatmul.mubr.f32.vlgmr.msra.gmra.mxu1 %v10113_v4  ;;  %v9654_v9 = vsel %vm9598_vm12, 16843009, %v13640_v45  ;;  %vm12268_vm5 = vmand %vm9898_vm1, %vm9899_vm11  ;;  %vm9903_vm6 = vsmask.f32 7680  ;;  %v9711_v11 = vcombine.low %v9689_v14, %v9696_v29  ;;  %v6464_v36 = vand.u32 4294901760, %v6463_v27  ;;  %v235_v14 = vld [vmem:[%s10123_s23 + $0xc8] sm:$0xff] }
 0x164   : > { %6359 = vmatprep.subr.mxu0 %v12041_v7  ;;  %6435 = vmatprep.subr.mxu1 %v6434_v24  ;;  %v9682_v42 = vcombine.low %v9653_v18, %v9654_v9  ;;  %v9703_v24 = vrot.slane %v9681_v28, %v11983_v12  ;;  %v6470_v53 = vand.u32 4294901760, %v6469_v17  ;;  %vm12286_vm9 = vmor %vm12268_vm5, %vm9897_vm2  ;;  %v6476_v48 = vand.u32 4294901760, %v6475_v50  ;;  %v267_v17 = vld [vmem:[%s10123_s23 + $0x1c8] sm:$0xff]  ;;  %v266_v18 = vld [vmem:[%s10123_s23 + $0x1c0] sm:$0xff] }
 0x165   : > { %6361 = vmatpush1.msra.mxu0 %v12044_v39  ;;  %6441 = vmatpush1.msra.mxu1 %v6440_v40  ;;  %vm9904_vm14 = vmand %vm9902_vm4, %vm9903_vm6  ;;  %v9719_v52 = vrot.slane %v9711_v11, %v11983_v12  ;;  %v13727_v26 = vmov 0  ;;  %v12318_v15 = vand.u32 4294901760, %v331_v63  ;;  %v12324_v28 = vand.u32 4294901760, %v330_v61  ;;  %v234_v50 = vld [vmem:[%s10123_s23 + $0xc0] sm:$0xff] }
 0x166   : > { %6394 = vmatprep.mubr.f32.mxu0 %v13612_v1  ;;  %6447 = vmatprep.subr.mxu1 %v6446_v46  ;;  %v9710_v30 = vrot.slane %v9682_v42, %v11983_v12  ;;  %vm12306_vm8 = vmor %vm9904_vm14, %vm12286_vm9  ;;  %v298_v46 = vld [vmem:[%s10123_s23 + $0x2c0] sm:$0xff]  ;;  %v12330_v27 = vand.u32 4294901760, %v299_v0  ;;  %v12355_v42 = vpop.f32.mrf.mxu0 }
 0x167   : > { %6544 = vmatprep.subr.mxu0 %v11875_v3  ;;  %6400 = vmatmul.mubr.f32.vlgmr.msra.gmra.mxu0 %v13664_v2  ;;  %v13728_v26 = vsel %vm12306_vm8, 4294967295, %v13727_v26  ;;  %v12340_v9 = vand.u32 4294901760, %v298_v46  ;;  %v12350_v3 = vsub.f32 %v330_v61, %v12324_v28 }
 0x168   : > { %6453 = vmatpush1.msra.mxu1 %v6452_v55  ;;  %6547 = vmatpush1.msra.mxu0 %v11872_v23  ;;  %v9712_v44 = vcombine.low %v9703_v24, %v9710_v30  ;;  %13729 = vst [vmem:[#allocation5_spill] sm:$0xff] %v13728_v26  ;;  %v12344_v55 = vsub.f32 %v331_v63, %v12318_v15  ;;  %v12360_v23 = vand.u32 4294901760, %v266_v18  ;;  %v12385_v38 = vpop.f32.mrf.mxu0 }
 0x169   : > { %6459 = vmatprep.subr.mxu1 %v6458_v16  ;;  %6550 = vmatprep.subr.mxu0 %v11997_v34  ;;  %v12368_v34 = vand.u32 4294901760, %v235_v14 }
 0x16a   : > { %6465 = vmatpush1.msra.mxu1 %v6464_v36  ;;  %6553 = vmatpush1.msra.mxu0 %v12035_v35  ;;  %v9726_v40 = vrot.slane %v9712_v44, %v11983_v12  ;;  %v6975_v35 = vand.u32 4294901760, %v12344_v55  ;;  %v12391_v16 = vsub.f32 %v266_v18, %v12360_v23  ;;  %v12417_v11 = vpop.f32.mrf.mxu0 }
 0x16b   : > { %6471 = vmatprep.subr.mxu1 %v6470_v53  ;;  %6556 = vmatprep.subr.mxu0 %v12114_v5  ;;  %v6981_v5 = vand.u32 4294901760, %v12350_v3 }
 0x16c   : > { %6477 = vmatpush1.msra.mxu1 %v6476_v48  ;;  %6510 = vmatprep.mubr.f32.mxu1 %v13612_v1  ;;  %v9727_v32 = vcombine.low %v9719_v52, %v9726_v40  ;;  %v7005_v24 = vand.u32 4294901760, %v12391_v16 }
 0x16d   : > { %6559 = vmatpush1.msra.mxu0 %v12038_v57  ;;  %6512 = vmatmul.mubr.f32.vlgmr.msra.gmra.mxu1 %v10113_v4 }
 0x16e   : > { %6562 = vmatprep.subr.mxu0 %v12145_v25  ;;  %6632 = vmatprep.subr.mxu1 %v11817_v41  ;;  %v9907_v29 = vsel %vm12306_vm8, %v9727_v32, %v9906_v51 }
 0x16f   : > { %6565 = vmatpush1.msra.mxu0 %v12141_v59  ;;  %6598 = vmatprep.mubr.f32.mxu0 %v13612_v1  ;;  %9908 = vst [vmem:[%s12294_s27] sm:$0xff] %v9907_v29  ;;  %v6982_v59 = vsub.f32 %v12350_v3, %v6981_v5 }
 0x170   : > { %6634 = vmatpush1.msra.mxu1 %v11827_v49  ;;  %6601 = vmatmul.mubr.f32.vlgmr.msra.gmra.mxu0 %v10118_v6 }
 0x171   : > { %6636 = vmatprep.subr.mxu1 %v11925_v22  ;;  %6716 = vmatprep.subr.mxu0 %v6432_v47  ;;  %v12352_v47 = vand.u32 4294901760, %v267_v17 }
 0x172   : > { %6638 = vmatpush1.msra.mxu1 %v11944_v60  ;;  %6720 = vmatpush1.msra.mxu0 %v6438_v62  ;;  %v12363_v62 = vsub.f32 %v299_v0, %v12330_v27 }
 0x173   : > { %6640 = vmatprep.subr.mxu1 %v11989_v20  ;;  %6724 = vmatprep.subr.mxu0 %v6444_v21  ;;  %v12373_v21 = vsub.f32 %v298_v46, %v12340_v9 }
 0x174   : > { %6642 = vmatpush1.msra.mxu1 %v11949_v33  ;;  %6728 = vmatpush1.msra.mxu0 %v6450_v19  ;;  %v12376_v19 = vand.u32 4294901760, %v234_v50  ;;  %v6987_v57 = vand.u32 4294901760, %v12363_v62 }
 0x175   : > { %6644 = vmatprep.subr.mxu1 %v12041_v7  ;;  %6732 = vmatprep.subr.mxu0 %v6456_v56  ;;  %v12383_v56 = vsub.f32 %v267_v17, %v12352_v47 }
 0x176   : > { %6646 = vmatpush1.msra.mxu1 %v12044_v39  ;;  %6679 = vmatprep.mubr.f32.mxu1 %v13612_v1  ;;  %v12406_v25 = vsub.f32 %v234_v50, %v12376_v19  ;;  %v333_v50 = vld [vmem:[%s10123_s23 + $0x3d8] sm:$0xff] }
 0x177   : > { %6736 = vmatpush1.msra.mxu0 %v6462_v43  ;;  %6683 = vmatmul.mubr.f32.vlgmr.msra.gmra.mxu1 %v10129_v10  ;;  %v12398_v43 = vsub.f32 %v235_v14, %v12368_v34 }
 0x178   : > { %6740 = vmatprep.subr.mxu0 %v6468_v58  ;;  %6810 = vmatprep.subr.mxu1 %v11817_v41  ;;  %v6976_v41 = vsub.f32 %v12344_v55, %v6975_v35  ;;  %v6993_v58 = vand.u32 4294901760, %v12373_v21  ;;  %v13610_v53 = vand.u32 4294901760, %v12406_v25 }
 0x179   : > { %6744 = vmatpush1.msra.mxu0 %v6474_v8  ;;  %6777 = vmatprep.mubr.f32.mxu0 %v13612_v1  ;;  %v12415_v8 = vpop.f32.mrf.mxu1  ;;  %v7011_v36 = vand.u32 4294901760, %v12398_v43 }
 0x17a   : > { %6812 = vmatpush1.msra.mxu1 %v11827_v49  ;;  %6779 = vmatmul.mubr.f32.vlgmr.msra.gmra.mxu0 %v10113_v4  ;;  %v6999_v49 = vand.u32 4294901760, %v12383_v56  ;;  %v6977_v30 = vand.u32 4294901760, %v6976_v41  ;;  %v7018_v51 = vsub.f32 %v12406_v25, %v13610_v53  ;;  %v332_v41 = vld [vmem:[%s10123_s23 + $0x3d0] sm:$0xff] }
 0x17b   : > { %6814 = vmatprep.subr.mxu1 %v11925_v22  ;;  %6890 = vmatprep.subr.mxu0 %v12318_v15  ;;  %v6988_v22 = vsub.f32 %v12363_v62, %v6987_v57  ;;  %v12439_v48 = vpop.f32.mrf.mxu1  ;;  %v7012_v52 = vsub.f32 %v12398_v43, %v7011_v36 }
 0x17c   : > { %6816 = vmatpush1.msra.mxu1 %v11944_v60  ;;  %6892 = vmatpush1.msra.mxu0 %v12324_v28  ;;  %v6994_v60 = vsub.f32 %v12373_v21, %v6993_v58  ;;  %v7000_v54 = vsub.f32 %v12383_v56, %v6999_v49  ;;  %v7019_v17 = vand.u32 4294901760, %v7018_v51 }
 0x17d   : > { %6818 = vmatprep.subr.mxu1 %v11989_v20  ;;  %6894 = vmatprep.subr.mxu0 %v12330_v27  ;;  %v6983_v20 = vand.u32 4294901760, %v6982_v59  ;;  %v6989_v44 = vand.u32 4294901760, %v6988_v22  ;;  %v12453_v40 = vpop.f32.mrf.mxu1  ;;  %v7013_v0 = vand.u32 4294901760, %v7012_v52  ;;  %v301_v59 = vld [vmem:[%s10123_s23 + $0x2d8] sm:$0xff] }
 0x17e   : > { %6820 = vmatpush1.msra.mxu1 %v11949_v33  ;;  %6896 = vmatpush1.msra.mxu0 %v12340_v9  ;;  %v12441_v33 = vpop.f32.mrf.mxu0  ;;  %v7001_v61 = vand.u32 4294901760, %v7000_v54  ;;  %v300_v54 = vld [vmem:[%s10123_s23 + $0x2d0] sm:$0xff]  ;;  %v269_v52 = vld [vmem:[%s10123_s23 + $0x1d8] sm:$0xff] }
 0x17f   : > { %6822 = vmatprep.subr.mxu1 %v12041_v7  ;;  %6898 = vmatprep.subr.mxu0 %v12352_v47  ;;  %v7006_v7 = vsub.f32 %v12391_v16, %v7005_v24  ;;  %v12465_v29 = vpop.f32.mrf.mxu1 }
 0x180   : > { %6824 = vmatpush1.msra.mxu1 %v12044_v39  ;;  %6857 = vmatprep.mubr.f32.mxu1 %v13612_v1  ;;  %v12455_v63 = vpop.f32.mrf.mxu0  ;;  %v6995_v39 = vand.u32 4294901760, %v6994_v60  ;;  %v12489_v60 = vand.u32 4294901760, %v333_v50 }
 0x181   : > { %6900 = vmatpush1.msra.mxu0 %v12360_v23  ;;  %6859 = vmatmul.mubr.f32.vlgmr.msra.gmra.mxu1 %v10113_v4  ;;  %v7007_v32 = vand.u32 4294901760, %v7006_v7  ;;  %v12471_v18 = vpop.f32.mrf.mxu1  ;;  %v12500_v7 = vand.u32 4294901760, %v301_v59 }
 0x182   : > { %6902 = vmatprep.subr.mxu0 %v12368_v34  ;;  %6978 = vmatprep.subr.mxu1 %v6977_v30  ;;  %v12467_v46 = vpop.f32.mrf.mxu0 }
 0x183   : > { %6904 = vmatpush1.msra.mxu0 %v12376_v19  ;;  %6984 = vmatpush1.msra.mxu1 %v6983_v20  ;;  %v12483_v22 = vpop.f32.mrf.mxu1  ;;  %v12493_v20 = vand.u32 4294901760, %v332_v41 }
 0x184   : > { %6937 = vmatprep.mubr.f32.mxu0 %v13612_v1  ;;  %6990 = vmatprep.subr.mxu1 %v6989_v44  ;;  %v12473_v14 = vpop.f32.mrf.mxu0 }
 0x185   : > { %7087 = vmatprep.subr.mxu0 %v12344_v55  ;;  %6943 = vmatmul.mubr.f32.vlgmr.msra.gmra.mxu0 %v13664_v2  ;;  %v12496_v44 = vpop.f32.mrf.mxu1  ;;  %v12522_v55 = vsub.f32 %v332_v41, %v12493_v20 }
 0x186   : > { %6996 = vmatpush1.msra.mxu1 %v6995_v39  ;;  %7090 = vmatpush1.msra.mxu0 %v12350_v3  ;;  %v12485_v30 = vpop.f32.mrf.mxu0  ;;  %v268_v39 = vld [vmem:[%s10123_s23 + $0x1d0] sm:$0xff] }
 0x187   : > { %7002 = vmatprep.subr.mxu1 %v7001_v61  ;;  %7093 = vmatprep.subr.mxu0 %v12363_v62  ;;  %v12512_v61 = vand.u32 4294901760, %v300_v54  ;;  %v12527_v53 = vpop.f32.mrf.mxu1  ;;  %v12532_v3 = vand.u32 4294901760, %v268_v39 }
 0x188   : > { %7008 = vmatpush1.msra.mxu1 %v7007_v32  ;;  %7096 = vmatpush1.msra.mxu0 %v12373_v21  ;;  %v12507_v51 = vpop.f32.mrf.mxu0  ;;  %v237_v32 = vld [vmem:[%s10123_s23 + $0xd8] sm:$0xff] }
 0x189   : > { %7014 = vmatprep.subr.mxu1 %v7013_v0  ;;  %7099 = vmatprep.subr.mxu0 %v12383_v56  ;;  %v12516_v0 = vsub.f32 %v333_v50, %v12489_v60  ;;  %v12540_v62 = vand.u32 4294901760, %v237_v32  ;;  %v12544_v50 = vpop.f32.mrf.mxu1  ;;  %v12549_v21 = vsub.f32 %v300_v54, %v12512_v61  ;;  %v12567_v54 = vsub.f32 %v268_v39, %v12532_v3 }
 0x18a   : > { %7020 = vmatpush1.msra.mxu1 %v7019_v17  ;;  %7053 = vmatprep.mubr.f32.mxu1 %v13612_v1  ;;  %v236_v17 = vld [vmem:[%s10123_s23 + $0xd0] sm:$0xff] }
 0x18b   : > { %7102 = vmatpush1.msra.mxu0 %v12391_v16  ;;  %7055 = vmatmul.mubr.f32.vlgmr.msra.gmra.mxu1 %v10113_v4  ;;  %v12552_v41 = vand.u32 4294901760, %v236_v17  ;;  %v12576_v56 = vpop.f32.mrf.mxu1 }
 0x18c   : > { %7105 = vmatprep.subr.mxu0 %v12398_v43  ;;  %7175 = vmatprep.subr.mxu1 %v12318_v15 }
 0x18d   : > { %7108 = vmatpush1.msra.mxu0 %v12406_v25  ;;  %7141 = vmatprep.mubr.f32.mxu0 %v13612_v1  ;;  %v12584_v43 = vsub.f32 %v236_v17, %v12552_v41  ;;  %v2603_v17 = vadd.f32 %v12385_v38, %v11417_v31 }
 0x18e   : > { %7177 = vmatpush1.msra.mxu1 %v12324_v28  ;;  %7144 = vmatmul.mubr.f32.vlgmr.msra.gmra.mxu0 %v10118_v6 }
 0x18f   : > { %7179 = vmatprep.subr.mxu1 %v12330_v27  ;;  %7259 = vmatprep.subr.mxu0 %v6975_v35  ;;  %v12524_v35 = vand.u32 4294901760, %v269_v52 }
 0x190   : > { %7181 = vmatpush1.msra.mxu1 %v12340_v9  ;;  %7263 = vmatpush1.msra.mxu0 %v6981_v5  ;;  %v12535_v5 = vsub.f32 %v301_v59, %v12500_v7 }
 0x191   : > { %7183 = vmatprep.subr.mxu1 %v12352_v47  ;;  %7267 = vmatprep.subr.mxu0 %v6987_v57  ;;  %v12542_v57 = vpop.f32.mrf.mxu0 }
 0x192   : > { %7185 = vmatpush1.msra.mxu1 %v12360_v23  ;;  %7271 = vmatpush1.msra.mxu0 %v6993_v58  ;;  %v13611_v58 = vand.u32 4294901760, %v12516_v0  ;;  %v13614_v16 = vand.u32 4294901760, %v12535_v5 }
 0x193   : > { %7187 = vmatprep.subr.mxu1 %v12368_v34  ;;  %7275 = vmatprep.subr.mxu0 %v6999_v49  ;;  %v12559_v49 = vsub.f32 %v269_v52, %v12524_v35  ;;  %v12561_v59 = vpop.f32.mrf.mxu0  ;;  %v12574_v52 = vsub.f32 %v237_v32, %v12540_v62 }
 0x194   : > { %7189 = vmatpush1.msra.mxu1 %v12376_v19  ;;  %7222 = vmatprep.mubr.f32.mxu1 %v13612_v1 }
 0x195   : > { %7279 = vmatpush1.msra.mxu0 %v7005_v24  ;;  %7226 = vmatmul.mubr.f32.vlgmr.msra.gmra.mxu1 %v10129_v10  ;;  %v13730_v24 = vand.u32 4294901760, %v12406_v25  ;;  %v13615_v25 = vand.u32 4294901760, %v12549_v21  ;;  %v13616_v32 = vand.u32 4294901760, %v12559_v49 }
 0x196   : > { %7283 = vmatprep.subr.mxu0 %v7011_v36  ;;  %7353 = vmatprep.subr.mxu1 %v12318_v15  ;;  %v7519_v15 = vsub.f32 %v12516_v0, %v13611_v58  ;;  %v2601_v36 = vadd.f32 %v12355_v42, %v11417_v31  ;;  %v12597_v58 = vpop.f32.mrf.mxu1 }
 0x197   : > { %7287 = vmatpush1.msra.mxu0 %v13730_v24  ;;  %7320 = vmatprep.mubr.f32.mxu0 %v13612_v1  ;;  %v12595_v24 = vpop.f32.mrf.mxu0 }
 0x198   : > { %7355 = vmatpush1.msra.mxu1 %v12324_v28  ;;  %7322 = vmatmul.mubr.f32.vlgmr.msra.gmra.mxu0 %v10113_v4  ;;  %v13731_v28 = vand.u32 4294901760, %v12522_v55  ;;  %v2713_v38 = vadd.f32 %v12415_v8, %v2601_v36  ;;  %v13733_v8 = vand.u32 4294901760, %v12567_v54  ;;  %v2715_v36 = vadd.f32 %v12439_v48, %v2603_v17 }
 0x199   : > { %7357 = vmatprep.subr.mxu1 %v12330_v27  ;;  %7433 = vmatprep.subr.mxu0 %v12489_v60  ;;  %v7531_v27 = vsub.f32 %v12535_v5, %v13614_v16  ;;  %v3686_v1 = vpop.f32.mrf.mxu0  ;;  %v7537_v16 = vsub.f32 %v12549_v21, %v13615_v25  ;;  %v13732_v25 = vmov 0.0   ;;  %v13735_v48 = vand.u32 4294901760, %v12584_v43 }
 0x19a   : > { %v7525_v39 = vsub.f32 %v12522_v55, %v13731_v28  ;;  %7359 = vmatpush1.msra.mxu1 %v12340_v9  ;;  %7435 = vmatpush1.msra.mxu0 %v12493_v20  ;;  %v7520_v9 = vand.u32 4294901760, %v7519_v15  ;;  %v3146_v15 = vadd.f32 %v12485_v30, %v11417_v31  ;;  %v12624_v28 = vpop.f32.mrf.mxu1  ;;  %v3144_v30 = vadd.f32 %v12473_v14, %v11417_v31 }
 0x19b   : > { %7361 = vmatprep.subr.mxu1 %v12352_v47  ;;  %7437 = vmatprep.subr.mxu0 %v12500_v7  ;;  %v7532_v42 = vand.u32 4294901760, %v7531_v27  ;;  %v3688_v27 = vpop.f32.mrf.mxu0  ;;  %v7561_v17 = vsub.f32 %v12584_v43, %v13735_v48  ;;  %v2802_v26 = vadd.f32 %v12417_v11, %v2713_v38  ;;  %v2804_v37 = vadd.f32 %v12441_v33, %v2715_v36  ;;  %v303_v38 = vld [vmem:[%s10123_s23 + $0x2e8] sm:$0xff] }
 0x19c   : > { %7363 = vmatpush1.msra.mxu1 %v12360_v23  ;;  %7439 = vmatpush1.msra.mxu0 %v12512_v61  ;;  %v7526_v47 = vand.u32 4294901760, %v7525_v39  ;;  %v7543_v23 = vsub.f32 %v12559_v49, %v13616_v32  ;;  %v3798_v32 = vpop.f32.mrf.mxu1  ;;  %v3258_v12 = vadd.f32 %v12527_v53, %v3146_v15  ;;  %v3256_v53 = vadd.f32 %v12496_v44, %v3144_v30 }
 0x19d   : > { %7365 = vmatprep.subr.mxu1 %v12368_v34  ;;  %7441 = vmatprep.subr.mxu0 %v12524_v35  ;;  %v7549_v34 = vsub.f32 %v12567_v54, %v13733_v8  ;;  %v7538_v8 = vand.u32 4294901760, %v7537_v16  ;;  %v3689_v16 = vadd.f32 %v3688_v27, %v11417_v31  ;;  %v2884_v48 = vadd.f32 %v12453_v40, %v2802_v26 }
 0x19e   : > { %7367 = vmatpush1.msra.mxu1 %v12376_v19  ;;  %7400 = vmatprep.mubr.f32.mxu1 %v13732_v25  ;;  %v13734_v19 = vand.u32 4294901760, %v12574_v52  ;;  %v7544_v14 = vand.u32 4294901760, %v7543_v23  ;;  %v3887_v23 = vpop.f32.mrf.mxu0  ;;  %v12659_v33 = vand.u32 4294901760, %v334_v13  ;;  %v3687_v26 = vadd.f32 %v3686_v1, %v11417_v31 }
 0x19f   : > { %7443 = vmatpush1.msra.mxu0 %v12532_v3  ;;  %7402 = vmatmul.mubr.f32.vlgmr.msra.gmra.mxu1 %v10113_v4  ;;  %v2886_v40 = vadd.f32 %v12465_v29, %v2804_v37  ;;  %v3347_v44 = vadd.f32 %v12542_v57, %v3258_v12  ;;  %v12667_v30 = vand.u32 4294901760, %v303_v38  ;;  %v2980_v27 = vadd.f32 %v12455_v63, %v2884_v48 }
 0x1a0   : > { %v7555_v39 = vsub.f32 %v12574_v52, %v13734_v19  ;;  %7445 = vmatprep.subr.mxu0 %v12540_v62  ;;  %7521 = vmatprep.subr.mxu1 %v7520_v9  ;;  %v335_v19 = vld [vmem:[%s10123_s23 + $0x3e8] sm:$0xff]  ;;  %v7550_v9 = vand.u32 4294901760, %v7549_v34  ;;  %v302_v34 = vld [vmem:[%s10123_s23 + $0x2e0] sm:$0xff]  ;;  %v3345_v1 = vadd.f32 %v12507_v51, %v3256_v53  ;;  %v3889_v12 = vpop.f32.mrf.mxu0  ;;  %v12675_v29 = vsub.f32 %v334_v13, %v12659_v33 }
 0x1a1   : > { %7447 = vmatpush1.msra.mxu0 %v12552_v41  ;;  %7527 = vmatpush1.msra.mxu1 %v7526_v47  ;;  %v3800_v47 = vpop.f32.mrf.mxu1  ;;  %v12657_v15 = vand.u32 4294901760, %v335_v19  ;;  %v3429_v37 = vadd.f32 %v12576_v56, %v3347_v44  ;;  %v12677_v57 = vand.u32 4294901760, %v302_v34  ;;  %v12686_v51 = vadd.f32 %v12471_v18, %v2980_v27  ;;  %v238_v44 = vld [vmem:[%s10123_s23 + $0xe0] sm:$0xff] }
 0x1a2   : > { %7480 = vmatprep.mubr.f32.mxu0 %v13732_v25  ;;  %7533 = vmatprep.subr.mxu1 %v7532_v42  ;;  %v7556_v11 = vand.u32 4294901760, %v7555_v39  ;;  %v7562_v42 = vand.u32 4294901760, %v7561_v17  ;;  %v3801_v39 = vadd.f32 %v3800_v47, %v3689_v16  ;;  %v270_v17 = vld [vmem:[%s10123_s23 + $0x1e0] sm:$0xff]  ;;  %v3427_v13 = vadd.f32 %v12544_v50, %v3345_v1 }
 0x1a3   : > { %7630 = vmatprep.subr.mxu0 %v12516_v0  ;;  %7486 = vmatmul.mubr.f32.vlgmr.msra.gmra.mxu0 %v13664_v2  ;;  %v3969_v36 = vpop.f32.mrf.mxu1  ;;  %v12682_v63 = vsub.f32 %v335_v19, %v12657_v15  ;;  %v3525_v50 = vadd.f32 %v12595_v24, %v3429_v37  ;;  %v12704_v48 = vand.u32 4294901760, %v270_v17  ;;  %v12709_v53 = vsub.f32 %v302_v34, %v12677_v57 }
 0x1a4   : > { %7539 = vmatpush1.msra.mxu1 %v7538_v8  ;;  %7633 = vmatpush1.msra.mxu0 %v12522_v55  ;;  %v271_v8 = vld [vmem:[%s10123_s23 + $0x1e8] sm:$0xff]  ;;  %v4065_v16 = vpop.f32.mrf.mxu0  ;;  %v13736_v24 = vand.u32 4294901760, %v12516_v0 }
 0x1a5   : > { %7545 = vmatprep.subr.mxu1 %v7544_v14  ;;  %7636 = vmatprep.subr.mxu0 %v12535_v5  ;;  %v3799_v14 = vadd.f32 %v3798_v32, %v3687_v26  ;;  %v3971_v56 = vpop.f32.mrf.mxu1  ;;  %v12694_v32 = vsub.f32 %v303_v38, %v12667_v30  ;;  %v12702_v19 = vand.u32 4294901760, %v271_v8  ;;  %v8061_v38 = vand.u32 4294901760, %v12682_v63 }
 0x1a6   : > { %7551 = vmatpush1.msra.mxu1 %v7550_v9  ;;  %7639 = vmatpush1.msra.mxu0 %v12549_v21  ;;  %v2982_v9 = vadd.f32 %v12467_v46, %v2886_v40  ;;  %v3890_v46 = vadd.f32 %v3889_v12, %v3801_v39  ;;  %v9077_v26 = vrot.slane %v12686_v51, 7  ;;  %v3523_v40 = vadd.f32 %v12561_v59, %v3427_v13  ;;  %v4067_v27 = vpop.f32.mrf.mxu0 }
 0x1a7   : > { %7557 = vmatprep.subr.mxu1 %v7556_v11  ;;  %7642 = vmatprep.subr.mxu0 %v12559_v49  ;;  %v3888_v47 = vadd.f32 %v3887_v23, %v3799_v14  ;;  %v8067_v39 = vand.u32 4294901760, %v12675_v29  ;;  %v12721_v34 = vadd.f32 %v12624_v28, %v3525_v50  ;;  %v13737_v23 = vand.u32 4294901760, %v12522_v55 }
 0x1a8   : > { %7563 = vmatpush1.msra.mxu1 %v7562_v42  ;;  %7596 = vmatprep.mubr.f32.mxu1 %v13732_v25  ;;  %v12697_v18 = vadd.f32 %v12483_v22, %v2982_v9  ;;  %v239_v22 = vld [vmem:[%s10123_s23 + $0xe8] sm:$0xff]  ;;  %v3972_v42 = vadd.f32 %v3971_v56, %v3890_v46  ;;  %v8073_v1 = vand.u32 4294901760, %v12694_v32  ;;  %v13738_v59 = vand.u32 4294901760, %v12535_v5 }
 0x1a9   : > { %7645 = vmatpush1.msra.mxu0 %v12567_v54  ;;  %7598 = vmatmul.mubr.f32.vlgmr.msra.gmra.mxu1 %v10113_v4  ;;  %v3970_v37 = vadd.f32 %v3969_v36, %v3888_v47  ;;  %v12732_v12 = vsub.f32 %v270_v17, %v12704_v48  ;;  %v12735_v28 = vadd.f32 %v12597_v58, %v3523_v40  ;;  %v12737_v14 = vand.u32 4294901760, %v239_v22 }
 0x1aa   : > { %7648 = vmatprep.subr.mxu0 %v12574_v52  ;;  %7718 = vmatprep.subr.mxu1 %v12489_v60  ;;  %v9078_v0 = vrot.slane %v12697_v18, 7  ;;  %v13739_v36 = vand.u32 4294901760, %v12549_v21  ;;  %v12745_v9 = vsub.f32 %v12682_v63, %v8061_v38  ;;  %v12747_v5 = vand.u32 4294901760, %v238_v44 }
 0x1ab   : > { %7651 = vmatpush1.msra.mxu0 %v12584_v43  ;;  %7684 = vmatprep.mubr.f32.mxu0 %v13732_v25  ;;  %v4145_v11 = vpop.f32.mrf.mxu1  ;;  %v8079_v17 = vand.u32 4294901760, %v12709_v53  ;;  %v4068_v13 = vadd.f32 %v4067_v27, %v3972_v42  ;;  %vm12751_vm7 = vcmp.gt.f32.partialorder %v12686_v51, %v9077_v26  ;;  %v13742_v21 = vand.u32 4294901760, %v12559_v49 }
 0x1ac   : > { %7720 = vmatpush1.msra.mxu1 %v12493_v20  ;;  %7687 = vmatmul.mubr.f32.vlgmr.msra.gmra.mxu0 %v10118_v6  ;;  %v12761_v56 = vsub.f32 %v12675_v29, %v8067_v39  ;;  %v9080_v46 = vrot.slane %v12721_v34, 7  ;;  %v12765_v50 = vsub.f32 %v271_v8, %v12702_v19  ;;  %v12772_v47 = vsub.f32 %v12694_v32, %v8073_v1 }
 0x1ad   : > { %7722 = vmatprep.subr.mxu1 %v12500_v7  ;;  %7802 = vmatprep.subr.mxu0 %v13736_v24  ;;  %v4147_v55 = vpop.f32.mrf.mxu1  ;;  %v4066_v49 = vadd.f32 %v4065_v16, %v3970_v37  ;;  %vm12777_vm10 = vcmp.gt.f32.partialorder %v12697_v18, %v9078_v0  ;;  %v13745_v8 = vand.u32 4294901760, %v12567_v54  ;;  %v9079_v40 = vrot.slane %v12735_v28, 7 }
 0x1ae   : > { %7724 = vmatpush1.msra.mxu1 %v12512_v61  ;;  %7806 = vmatpush1.msra.mxu0 %v13737_v23  ;;  %v12774_v42 = vadd.f32 %v4147_v55, %v4068_v13  ;;  %v12786_v27 = vsub.f32 %v239_v22, %v12737_v14  ;;  %v9173_v16 = vsel %vm12751_vm7, %v12686_v51, %v9077_v26  ;;  %v13746_v23 = vand.u32 4294901760, %v12574_v52 }
 0x1af   : > { %7726 = vmatprep.subr.mxu1 %v12524_v35  ;;  %7810 = vmatprep.subr.mxu0 %v13738_v59  ;;  %v12797_v54 = vsub.f32 %v12709_v53, %v8079_v17  ;;  %v13625_v37 = vand.u32 4294901760, %v12732_v12  ;;  %v12800_v59 = vadd.f32 %v4145_v11, %v4066_v49  ;;  %v13747_v22 = vand.u32 4294901760, %v12584_v43 }
 0x1b0   : > { %7728 = vmatpush1.msra.mxu1 %v12532_v3  ;;  %7814 = vmatpush1.msra.mxu0 %v13739_v36  ;;  %v8063_v26 = vand.u32 4294901760, %v12745_v9  ;;  %v12807_v52 = vsub.f32 %v238_v44, %v12747_v5  ;;  %vm12810_vm13 = vcmp.gt.f32.partialorder %v12721_v34, %v9080_v46  ;;  %v8085_v55 = vand.u32 4294901760, %v12765_v50  ;;  %v4229_v36 = vpop.f32.mrf.mxu0 }
 0x1b1   : > { %7730 = vmatprep.subr.mxu1 %v12540_v62  ;;  %7818 = vmatprep.subr.mxu0 %v13742_v21  ;;  %v9174_v43 = vsel %vm12777_vm10, %v12697_v18, %v9078_v0  ;;  %v8069_v11 = vand.u32 4294901760, %v12761_v56  ;;  %v8075_v44 = vand.u32 4294901760, %v12772_v47  ;;  %v9082_v9 = vrot.slane %v12774_v42, 7 }
 0x1b2   : > { %7732 = vmatpush1.msra.mxu1 %v12552_v41  ;;  %7765 = vmatprep.mubr.f32.mxu1 %v13732_v25  ;;  %v9205_v13 = vsel %vm12751_vm7, 1, %v13640_v45  ;;  %v9269_v21 = vrot.slane %v9173_v16, 7  ;;  %vm12829_vm3 = vcmp.gt.f32.partialorder %v12735_v28, %v9079_v40  ;;  %v13626_v0 = vand.u32 4294901760, %v12786_v27  ;;  %v4231_v16 = vpop.f32.mrf.mxu0 }
 0x1b3   : > { %7822 = vmatpush1.msra.mxu0 %v13745_v8  ;;  %7769 = vmatmul.mubr.f32.vlgmr.msra.gmra.mxu1 %v10129_v10  ;;  %v9176_v58 = vsel %vm12810_vm13, %v12721_v34, %v9080_v46  ;;  %v8081_v56 = vand.u32 4294901760, %v12797_v54  ;;  %v9081_v47 = vrot.slane %v12800_v59, 7  ;;  %v9206_v49 = vsel %vm12777_vm10, 1, %v13640_v45 }
 0x1b4   : > { %7826 = vmatprep.subr.mxu0 %v13746_v23  ;;  %7896 = vmatprep.subr.mxu1 %v12489_v60  ;;  %v12854_v46 = vsub.f32 %v12765_v50, %v8085_v55  ;;  %v13627_v8 = vand.u32 4294901760, %v12807_v52  ;;  %vm12863_vm15 = vcmp.gt.f32.partialorder %v12774_v42, %v9082_v9  ;;  %vm12869_vm0 = vcmp.gt.f32.partialorder %v12686_v51, %v9269_v21 }
 0x1b5   : > { %7830 = vmatpush1.msra.mxu0 %v13747_v22  ;;  %7863 = vmatprep.mubr.f32.mxu0 %v13732_v25  ;;  %v4341_v23 = vpop.f32.mrf.mxu1  ;;  %v9365_v22 = vrot.slane %v9205_v13, 7  ;;  %v12881_v13 = vsub.f32 %v12786_v27, %v13626_v0  ;;  %vm12887_vm1 = vcmp.gt.f32.partialorder %v12800_v59, %v9081_v47  ;;  %v4232_v60 = vadd.f32 %v4231_v16, %v11417_v31 }
 0x1b6   : > { %7898 = vmatpush1.msra.mxu1 %v12493_v20  ;;  %7865 = vmatmul.mubr.f32.vlgmr.msra.gmra.mxu0 %v10113_v4  ;;  %v9177_v20 = vsel %vm12887_vm1, %v12800_v59, %v9081_v47 }
 0x1b7   : > { %7900 = vmatprep.subr.mxu1 %v12500_v7  ;;  %7976 = vmatprep.subr.mxu0 %v12657_v15  ;;  %v12843_v7 = vsub.f32 %v12732_v12, %v13625_v37  ;;  %v8087_v37 = vand.u32 4294901760, %v12854_v46 }
 0x1b8   : > { %7902 = vmatpush1.msra.mxu1 %v12512_v61  ;;  %7978 = vmatpush1.msra.mxu0 %v12659_v33  ;;  %v9270_v61 = vrot.slane %v9174_v43, 7  ;;  %v4230_v43 = vadd.f32 %v4229_v36, %v11417_v31  ;;  %v9366_v36 = vrot.slane %v9206_v49, 7  ;;  %v4343_v49 = vpop.f32.mrf.mxu1  ;;  %v4430_v16 = vpop.f32.mrf.mxu0 }
 0x1b9   : > { %7904 = vmatprep.subr.mxu1 %v12524_v35  ;;  %7980 = vmatprep.subr.mxu0 %v12667_v30  ;;  %v9175_v35 = vsel %vm12829_vm3, %v12735_v28, %v9079_v40  ;;  %v9272_v40 = vrot.slane %v9176_v58, 7  ;;  %v8093_v51 = vand.u32 4294901760, %v12843_v7  ;;  %v9178_v7 = vsel %vm12863_vm15, %v12774_v42, %v9082_v9  ;;  %v13767_v9 = vld [vmem:[#allocation3_spill] sm:$0xff] }
 0x1ba   : > { %7906 = vmatpush1.msra.mxu1 %v12532_v3  ;;  %7982 = vmatpush1.msra.mxu0 %v12677_v57  ;;  %v9208_v3 = vsel %vm12810_vm13, 1, %v13640_v45  ;;  %vm12893_vm11 = vcmp.gt.f32.partialorder %v12697_v18, %v9270_v61  ;;  %v9271_v58 = vrot.slane %v9175_v35, 7  ;;  %v9397_v18 = vsel %vm12869_vm0, 2, %v9365_v22 }
 0x1bb   : > { %7908 = vmatprep.subr.mxu1 %v12540_v62  ;;  %7984 = vmatprep.subr.mxu0 %v12702_v19  ;;  %v9207_v61 = vsel %vm12829_vm3, 1, %v13640_v45  ;;  %v9368_v35 = vrot.slane %v9208_v3, 7  ;;  %v4342_v0 = vadd.f32 %v4341_v23, %v4230_v43  ;;  %vm12913_vm12 = vcmp.gt.f32.partialorder %v12721_v34, %v9272_v40  ;;  %v13762_v23 = vld [vmem:[#allocation4_spill] sm:$0xff]  ;;  %v12993_v3 = vld [vmem:[%s10123_s23 + $0x1f8] sm:$0xff] }
 0x1bc   : > { %7910 = vmatpush1.msra.mxu1 %v12552_v41  ;;  %7943 = vmatprep.mubr.f32.mxu1 %v13732_v25  ;;  %v8104_v41 = vsub.f32 %v12807_v52, %v13627_v8  ;;  %v8099_v22 = vand.u32 4294901760, %v12881_v13  ;;  %v9210_v34 = vsel %vm12863_vm15, 1, %v13640_v45  ;;  %v4344_v46 = vadd.f32 %v4343_v49, %v4232_v60  ;;  %v240_v62 = vld [vmem:[%s10123_s23 + $0xf0] sm:$0xff] }
 0x1bd   : > { %7986 = vmatpush1.msra.mxu0 %v12704_v48  ;;  %7945 = vmatmul.mubr.f32.vlgmr.msra.gmra.mxu1 %v10113_v4  ;;  %v9458_v43 = vrot.slane %v9397_v18, %v13762_v23  ;;  %vm12930_vm2 = vcmp.gt.f32.partialorder %v12735_v28, %v9271_v58  ;;  %v9367_v47 = vrot.slane %v9207_v61, 7  ;;  %v9400_v24 = vsel %vm12913_vm12, 2, %v9368_v35  ;;  %v337_v28 = vld [vmem:[%s10123_s23 + $0x3f8] sm:$0xff]  ;;  %v304_v61 = vld [vmem:[%s10123_s23 + $0x2f0] sm:$0xff] }
 0x1be   : > { %7988 = vmatprep.subr.mxu0 %v12737_v14  ;;  %8064 = vmatprep.subr.mxu1 %v8063_v26  ;;  %v9398_v26 = vsel %vm12893_vm11, 2, %v9366_v36  ;;  %v8105_v40 = vand.u32 4294901760, %v8104_v41  ;;  %v9209_v13 = vsel %vm12887_vm1, 1, %v13640_v45  ;;  %v9273_v36 = vrot.slane %v9177_v20, 7 }
 0x1bf   : > { %7990 = vmatpush1.msra.mxu0 %v12747_v5  ;;  %8070 = vmatpush1.msra.mxu1 %v8069_v11  ;;  %v4512_v8 = vpop.f32.mrf.mxu1  ;;  %v9274_v11 = vrot.slane %v9178_v7, 7  ;;  %v4431_v60 = vadd.f32 %v4430_v16, %v4342_v0  ;;  %v9462_v21 = vrot.slane %v9398_v26, %v13762_v23  ;;  %v9370_v58 = vrot.slane %v9210_v34, 7  ;;  %v305_v7 = vld [vmem:[%s10123_s23 + $0x2f8] sm:$0xff] }
 0x1c0   : > { %8023 = vmatprep.mubr.f32.mxu0 %v13732_v25  ;;  %8076 = vmatprep.subr.mxu1 %v8075_v44  ;;  %v4432_v44 = vpop.f32.mrf.mxu0  ;;  %v9399_v16 = vsel %vm12930_vm2, 2, %v9367_v47  ;;  %v9470_v18 = vrot.slane %v9400_v24, %v13762_v23  ;;  %v9369_v35 = vrot.slane %v9209_v13, 7  ;;  %vm12963_vm4 = vcmp.eq.s32.totalorder %v13767_v9, %v9458_v43 }
 0x1c1   : > { %8173 = vmatprep.subr.mxu0 %v12682_v63  ;;  %8029 = vmatmul.mubr.f32.vlgmr.msra.gmra.mxu0 %v13664_v2  ;;  %v4514_v41 = vpop.f32.mrf.mxu1  ;;  %vm12951_vm5 = vcmp.gt.f32.partialorder %v12774_v42, %v9274_v11  ;;  %v4433_v0 = vadd.f32 %v4432_v44, %v4344_v46  ;;  %v4513_v49 = vadd.f32 %v4512_v8, %v4431_v60  ;;  %v272_v8 = vld [vmem:[%s10123_s23 + $0x1f0] sm:$0xff]  ;;  %v12978_v26 = vand.u32 4294901760, %v305_v7  ;;  %vm9599_vm14 = vmpackc.low %vm12963_vm4, %vm12963_vm4  ;;  %v13015_v60 = vld [vmem:[%s10123_s23 + $0xf8] sm:$0xff] }
 0x1c2   : > { %8082 = vmatpush1.msra.mxu1 %v8081_v56  ;;  %8176 = vmatpush1.msra.mxu0 %v12675_v29  ;;  %v4608_v54 = vpop.f32.mrf.mxu0  ;;  %v336_v56 = vld [vmem:[%s10123_s23 + $0x3f0] sm:$0xff]  ;;  %vm12970_vm6 = vcmp.gt.f32.partialorder %v12800_v59, %v9273_v36  ;;  %v9402_v34 = vsel %vm12951_vm5, 2, %v9370_v58  ;;  %vm12983_vm9 = vcmp.eq.s32.totalorder %v13767_v9, %v9462_v21  ;;  %v9466_v59 = vrot.slane %v9399_v16, %v13762_v23  ;;  %vm13040_vm13 = vmpackc.even %vm9599_vm14, %vm9599_vm14 }
 0x1c3   : > { %8088 = vmatprep.subr.mxu1 %v8087_v37  ;;  %8179 = vmatprep.subr.mxu0 %v12694_v32  ;;  %v12976_v20 = vand.u32 4294901760, %v336_v56  ;;  %v12990_v43 = vand.u32 4294901760, %v304_v61  ;;  %v4609_v47 = vadd.f32 %v4608_v54, %v4513_v49  ;;  %vm12999_vm7 = vcmp.eq.s32.totalorder %v13767_v9, %v9470_v18  ;;  %vm9601_vm10 = vmpackc.low %vm12983_vm9, %vm12983_vm9 }
 0x1c4   : > { %8094 = vmatpush1.msra.mxu1 %v8093_v51  ;;  %8182 = vmatpush1.msra.mxu0 %v12709_v53  ;;  %v12959_v51 = vand.u32 4294901760, %v337_v28  ;;  %v4610_v11 = vpop.f32.mrf.mxu0  ;;  %v13005_v44 = vand.u32 4294901760, %v272_v8  ;;  %v9401_v24 = vsel %vm12970_vm6, 2, %v9369_v35  ;;  %v9478_v21 = vrot.slane %v9402_v34, %v13762_v23  ;;  %vm9605_vm15 = vmpackc.low %vm12999_vm7, %vm12999_vm7 }
 0x1c5   : > { %8100 = vmatprep.subr.mxu1 %v8099_v22  ;;  %8185 = vmatprep.subr.mxu0 %v12765_v50  ;;  %v4515_v22 = vadd.f32 %v4514_v41, %v4433_v0  ;;  %v13028_v54 = vand.u32 4294901760, %v12993_v3  ;;  %v13032_v0 = vsub.f32 %v305_v7, %v12978_v26  ;;  %vm13045_vm3 = vcmp.eq.s32.totalorder %v13767_v9, %v9466_v59  ;;  %vm13075_vm0 = vmpackc.even %vm9601_vm10, %vm9601_vm10 }
 0x1c6   : > { %8106 = vmatpush1.msra.mxu1 %v8105_v40  ;;  %8139 = vmatprep.mubr.f32.mxu1 %v13732_v25  ;;  %v13010_v13 = vsub.f32 %v337_v28, %v12959_v51  ;;  %v13025_v28 = vsub.f32 %v336_v56, %v12976_v20  ;;  %v9474_v56 = vrot.slane %v9401_v24, %v13762_v23  ;;  %v13066_v29 = vand.u32 4294901760, %v13015_v60  ;;  %vm9603_vm12 = vmpackc.low %vm13045_vm3, %vm13045_vm3 }
 0x1c7   : > { %8188 = vmatpush1.msra.mxu0 %v12732_v12  ;;  %8141 = vmatmul.mubr.f32.vlgmr.msra.gmra.mxu1 %v10113_v4  ;;  %v4611_v58 = vadd.f32 %v4610_v11, %v4515_v22  ;;  %v13060_v18 = vsub.f32 %v304_v61, %v12990_v43  ;;  %v13063_v35 = vsub.f32 %v272_v8, %v13005_v44  ;;  %vm13104_vm2 = vmpackc.even %vm9605_vm15, %vm9605_vm15  ;;  %v13788_v11 = vand.u32 4294901760, %v12732_v12 }
 0x1c8   : > { %8191 = vmatprep.subr.mxu0 %v12786_v27  ;;  %8261 = vmatprep.subr.mxu1 %v12657_v15  ;;  %vm13085_vm1 = vcmp.eq.s32.totalorder %v13767_v9, %v9478_v21  ;;  %v8610_v53 = vand.u32 4294901760, %v13025_v28  ;;  %vm13111_vm5 = vcmp.eq.s32.totalorder %v13767_v9, %v9474_v56  ;;  %v13128_v59 = vsub.f32 %v12993_v3, %v13028_v54  ;;  %vm13137_vm9 = vmpackc.even %vm9603_vm12, %vm9603_vm12 }
 0x1c9   : > { %8194 = vmatpush1.msra.mxu0 %v12807_v52  ;;  %8227 = vmatprep.mubr.f32.mxu0 %v13732_v25  ;;  %v4688_v36 = vpop.f32.mrf.mxu1  ;;  %vm9609_vm6 = vmpackc.low %vm13085_vm1, %vm13085_vm1  ;;  %v13791_v24 = vand.u32 4294901760, %v12786_v27  ;;  %v13161_v27 = vsub.f32 %v13015_v60, %v13066_v29  ;;  %v9657_v56 = vsel %vm13137_vm9, 16843009, %v13640_v45 }
 0x1ca   : > { %8263 = vmatpush1.msra.mxu1 %v12659_v33  ;;  %8230 = vmatmul.mubr.f32.vlgmr.msra.gmra.mxu0 %v10118_v6  ;;  %v4689_v41 = vadd.f32 %v4688_v36, %v4609_v47  ;;  %vm9607_vm7 = vmpackc.low %vm13111_vm5, %vm13111_vm5 }
 0x1cb   : > { %8265 = vmatprep.subr.mxu1 %v12667_v30  ;;  %8345 = vmatprep.subr.mxu0 %v8061_v38  ;;  %v4690_v49 = vpop.f32.mrf.mxu1  ;;  %vm13171_vm10 = vmpackc.even %vm9609_vm6, %vm9609_vm6  ;;  %v9656_v38 = vsel %vm13075_vm0, 16843009, %v13640_v45  ;;  %v8640_v50 = vand.u32 4294901760, %v13161_v27 }
 0x1cc   : > { %8267 = vmatpush1.msra.mxu1 %v12677_v57  ;;  %8349 = vmatpush1.msra.mxu0 %v8067_v39  ;;  %v9083_v7 = vrot.slane %v4689_v41, 7  ;;  %v4691_v16 = vadd.f32 %v4690_v49, %v4611_v58  ;;  %v8604_v39 = vand.u32 4294901760, %v13010_v13  ;;  %v9658_v58 = vsel %vm13104_vm2, 16843009, %v13640_v45  ;;  %vm13197_vm15 = vmpackc.even %vm9607_vm7, %vm9607_vm7 }
 0x1cd   : > { %8269 = vmatprep.subr.mxu1 %v12702_v19  ;;  %8353 = vmatprep.subr.mxu0 %v8073_v1  ;;  %v13082_v1 = vand.u32 4294901760, %v240_v62  ;;  %v13792_v49 = vand.u32 4294901760, %v12807_v52  ;;  %v9660_v22 = vsel %vm13171_vm10, 16843009, %v13640_v45 }
 0x1ce   : > { %8271 = vmatpush1.msra.mxu1 %v12704_v48  ;;  %8357 = vmatpush1.msra.mxu0 %v8079_v17  ;;  %vm9147_vm11 = vcmp.gt.f32.partialorder %v4689_v41, %v9083_v7  ;;  %v9084_v42 = vrot.slane %v4691_v16, 7  ;;  %v8616_v17 = vand.u32 4294901760, %v13032_v0  ;;  %v13121_v46 = vsub.f32 %v13010_v13, %v8604_v39 }
 0x1cf   : > { %8273 = vmatprep.subr.mxu1 %v12737_v14  ;;  %8361 = vmatprep.subr.mxu0 %v8085_v55  ;;  %v9179_v8 = vsel %vm9147_vm11, %v4689_v41, %v9083_v7  ;;  %v9211_v37 = vsel %vm9147_vm11, 1, %v13640_v45  ;;  %v13145_v3 = vsub.f32 %v240_v62, %v13082_v1  ;;  %v8622_v62 = vand.u32 4294901760, %v13060_v18 }
 0x1d0   : > { %8275 = vmatpush1.msra.mxu1 %v12747_v5  ;;  %8308 = vmatprep.mubr.f32.mxu1 %v13732_v25  ;;  %v9275_v55 = vrot.slane %v9179_v8, 7  ;;  %v9371_v34 = vrot.slane %v9211_v37, 7  ;;  %vm9148_vm4 = vcmp.gt.f32.partialorder %v4691_v16, %v9084_v42  ;;  %v8617_v60 = vsub.f32 %v13032_v0, %v8616_v17 }
 0x1d1   : > { %8365 = vmatpush1.msra.mxu0 %v13788_v11  ;;  %8312 = vmatmul.mubr.f32.vlgmr.msra.gmra.mxu1 %v10129_v10  ;;  %v9180_v47 = vsel %vm9148_vm4, %v4691_v16, %v9084_v42  ;;  %v9212_v40 = vsel %vm9148_vm4, 1, %v13640_v45  ;;  %v8628_v7 = vand.u32 4294901760, %v13128_v59  ;;  %v9729_v42 = vcombine.low %v9657_v56, %v9658_v58 }
 0x1d2   : > { %8369 = vmatprep.subr.mxu0 %v13791_v24  ;;  %8439 = vmatprep.subr.mxu1 %v12657_v15  ;;  %vm9339_vm14 = vcmp.gt.f32.partialorder %v4689_v41, %v9275_v55  ;;  %v9276_v36 = vrot.slane %v9180_v47, 7  ;;  %v9372_v21 = vrot.slane %v9212_v40, 7  ;;  %v8611_v15 = vsub.f32 %v13025_v28, %v8610_v53  ;;  %v13801_v47 = vld [vmem:[#allocation2_spill] sm:$0xff] }
 0x1d3   : > { %8373 = vmatpush1.msra.mxu0 %v13792_v49  ;;  %8406 = vmatprep.mubr.f32.mxu0 %v13732_v25  ;;  %v9403_v41 = vsel %vm9339_vm14, 2, %v9371_v34  ;;  %v9655_v8 = vsel %vm13040_vm13, 16843009, %v13640_v45  ;;  %v8606_v37 = vand.u32 4294901760, %v13121_v46  ;;  %v8646_v63 = vand.u32 4294901760, %v13145_v3 }
 0x1d4   : > { %8441 = vmatpush1.msra.mxu1 %v12659_v33  ;;  %8408 = vmatmul.mubr.f32.vlgmr.msra.gmra.mxu0 %v10113_v4  ;;  %v9482_v33 = vrot.slane %v9403_v41, %v13762_v23  ;;  %vm9340_vm3 = vcmp.gt.f32.partialorder %v4691_v16, %v9276_v36  ;;  %v9728_v55 = vcombine.low %v9655_v8, %v9656_v38  ;;  %v8612_v11 = vand.u32 4294901760, %v8611_v15 }
 0x1d5   : > { %8443 = vmatprep.subr.mxu1 %v12667_v30  ;;  %8519 = vmatprep.subr.mxu0 %v12959_v51  ;;  %v9404_v61 = vsel %vm9340_vm3, 2, %v9372_v21  ;;  %v8634_v30 = vand.u32 4294901760, %v13063_v35  ;;  %v8629_v46 = vsub.f32 %v13128_v59, %v8628_v7  ;;  %v9745_v40 = vrot.slane %v9729_v42, %v13801_v47 }
 0x1d6   : > { %8445 = vmatpush1.msra.mxu1 %v12677_v57  ;;  %8521 = vmatpush1.msra.mxu0 %v12976_v20  ;;  %vm13203_vm0 = vcmp.eq.s32.totalorder %v13767_v9, %v9482_v33  ;;  %v9486_v57 = vrot.slane %v9404_v61, %v13762_v23  ;;  %v8641_v36 = vsub.f32 %v13161_v27, %v8640_v50 }
 0x1d7   : > { %8447 = vmatprep.subr.mxu1 %v12702_v19  ;;  %8523 = vmatprep.subr.mxu0 %v12978_v26  ;;  %vm9611_vm1 = vmpackc.low %vm13203_vm0, %vm13203_vm0  ;;  %v8623_v19 = vsub.f32 %v13060_v18, %v8622_v62  ;;  %v8635_v24 = vsub.f32 %v13063_v35, %v8634_v30  ;;  %v9738_v58 = vrot.slane %v9728_v55, %v13801_v47  ;;  %v8630_v52 = vand.u32 4294901760, %v8629_v46  ;;  %v4772_v55 = vpop.f32.mrf.mxu0 }
 0x1d8   : > { %8449 = vmatpush1.msra.mxu1 %v12704_v48  ;;  %8525 = vmatpush1.msra.mxu0 %v12990_v43  ;;  %vm13227_vm13 = vmpackc.even %vm9611_vm1, %vm9611_vm1  ;;  %vm9566_vm11 = vcmp.eq.s32.totalorder %v13767_v9, %v9486_v57  ;;  %v9659_v48 = vsel %vm13197_vm15, 16843009, %v13640_v45  ;;  %v8647_v15 = vsub.f32 %v13145_v3, %v8646_v63  ;;  %v8642_v61 = vand.u32 4294901760, %v8641_v36 }
 0x1d9   : > { %8451 = vmatprep.subr.mxu1 %v12737_v14  ;;  %8527 = vmatprep.subr.mxu0 %v13028_v54  ;;  %vm9613_vm12 = vmpackc.low %vm9566_vm11, %vm9566_vm11  ;;  %v9730_v12 = vcombine.low %v9659_v48, %v9660_v22  ;;  %v8618_v14 = vand.u32 4294901760, %v8617_v60  ;;  %v8624_v49 = vand.u32 4294901760, %v8623_v19  ;;  %v9760_v60 = vcombine.low %v9738_v58, %v9745_v40 }
 0x1da   : > { %8453 = vmatpush1.msra.mxu1 %v12747_v5  ;;  %8486 = vmatprep.mubr.f32.mxu1 %v13732_v25  ;;  %vm9614_vm2 = vmpackc.even %vm9613_vm12, %vm9613_vm12  ;;  %v9661_v5 = vsel %vm13227_vm13, 16843009, %v13640_v45  ;;  %v8636_v38 = vand.u32 4294901760, %v8635_v24  ;;  %v8648_v42 = vand.u32 4294901760, %v8647_v15 }
 0x1db   : > { %8529 = vmatpush1.msra.mxu0 %v13005_v44  ;;  %8488 = vmatmul.mubr.f32.vlgmr.msra.gmra.mxu1 %v10113_v4  ;;  %v9662_v21 = vsel %vm9614_vm2, 16843009, %v13640_v45  ;;  %v9752_v33 = vrot.slane %v9730_v12, %v13801_v47  ;;  %v9768_v32 = vrot.slane %v9760_v60, %v13801_v47 }
 0x1dc   : > { %8531 = vmatprep.subr.mxu0 %v13066_v29  ;;  %8607 = vmatprep.subr.mxu1 %v8606_v37  ;;  %v9731_v41 = vcombine.low %v9661_v5, %v9662_v21 }
 0x1dd   : > { %8533 = vmatpush1.msra.mxu0 %v13082_v1  ;;  %8613 = vmatpush1.msra.mxu1 %v8612_v11 }
 0x1de   : > { %8566 = vmatprep.mubr.f32.mxu0 %v13732_v25  ;;  %8619 = vmatprep.subr.mxu1 %v8618_v14  ;;  %v9759_v56 = vrot.slane %v9731_v41, %v13801_v47 }
 0x1df   : > { %8716 = vmatprep.subr.mxu0 %v13010_v13  ;;  %8572 = vmatmul.mubr.f32.vlgmr.msra.gmra.mxu0 %v13664_v2  ;;  %v9909_v2 = vld [vmem:[%s12294_s27 + $0x8] sm:$0xff] }
 0x1e0   : > { %8625 = vmatpush1.msra.mxu1 %v8624_v49  ;;  %8719 = vmatpush1.msra.mxu0 %v13025_v28  ;;  %v9761_v16 = vcombine.low %v9752_v33, %v9759_v56 }
 0x1e1   : > { %8631 = vmatprep.subr.mxu1 %v8630_v52  ;;  %8722 = vmatprep.subr.mxu0 %v13032_v0 }
 0x1e2   : > { %8637 = vmatpush1.msra.mxu1 %v8636_v38  ;;  %8725 = vmatpush1.msra.mxu0 %v13060_v18  ;;  %v9775_v57 = vrot.slane %v9761_v16, %v13801_v47 }
 0x1e3   : > { %8643 = vmatprep.subr.mxu1 %v8642_v61  ;;  %8728 = vmatprep.subr.mxu0 %v13128_v59 }
 0x1e4   : > { %8649 = vmatpush1.msra.mxu1 %v8648_v42  ;;  %8682 = vmatprep.mubr.f32.mxu1 %v13732_v25  ;;  %v9776_v8 = vcombine.low %v9768_v32, %v9775_v57 }
 0x1e5   : > { %8731 = vmatpush1.msra.mxu0 %v13063_v35  ;;  %8684 = vmatmul.mubr.f32.vlgmr.msra.gmra.mxu1 %v10113_v4 }
 0x1e6   : > { %8734 = vmatprep.subr.mxu0 %v13161_v27  ;;  %8804 = vmatprep.subr.mxu1 %v12959_v51  ;;  %v9910_v22 = vsel %vm12306_vm8, %v9776_v8, %v9909_v2 }
 0x1e7   : > { %8737 = vmatpush1.msra.mxu0 %v13145_v3  ;;  %8770 = vmatprep.mubr.f32.mxu0 %v13732_v25  ;;  %9911 = vst [vmem:[%s12294_s27 + $0x8] sm:$0xff] %v9910_v22  ;;  %v4773_v3 = vadd.f32 %v4772_v55, %v11417_v31 }
 0x1e8   : > { %8806 = vmatpush1.msra.mxu1 %v12976_v20  ;;  %8773 = vmatmul.mubr.f32.vlgmr.msra.gmra.mxu0 %v10118_v6  ;;  %v4774_v6 = vpop.f32.mrf.mxu0 }
 0x1e9   : > { %8808 = vmatprep.subr.mxu1 %v12978_v26  ;;  %8888 = vmatprep.subr.mxu0 %v8604_v39 }
 0x1ea   : > { %8810 = vmatpush1.msra.mxu1 %v12990_v43  ;;  %8892 = vmatpush1.msra.mxu0 %v8610_v53  ;;  %v4973_v13 = vpop.f32.mrf.mxu0 }
 0x1eb   : > { %8812 = vmatprep.subr.mxu1 %v13028_v54  ;;  %8896 = vmatprep.subr.mxu0 %v8616_v17 }
 0x1ec   : > { %8814 = vmatpush1.msra.mxu1 %v13005_v44  ;;  %8900 = vmatpush1.msra.mxu0 %v8622_v62  ;;  %v4975_v28 = vpop.f32.mrf.mxu0 }
 0x1ed   : > { %8816 = vmatprep.subr.mxu1 %v13066_v29  ;;  %8904 = vmatprep.subr.mxu0 %v8628_v7 }
 0x1ee   : > { %8818 = vmatpush1.msra.mxu1 %v13082_v1  ;;  %8851 = vmatprep.mubr.f32.mxu1 %v13732_v25 }
 0x1ef   : > { %8908 = vmatpush1.msra.mxu0 %v8634_v30  ;;  %8855 = vmatmul.mubr.f32.vlgmr.msra.gmra.mxu1 %v10129_v10  ;;  %v4884_v10 = vpop.f32.mrf.mxu1  ;;  %v4775_v30 = vadd.f32 %v4774_v6, %v11417_v31 }
 0x1f0   : > { %8912 = vmatprep.subr.mxu0 %v8640_v50  ;;  %8982 = vmatprep.subr.mxu1 %v12959_v51 }
 0x1f1   : > { %8916 = vmatpush1.msra.mxu0 %v8646_v63  ;;  %8949 = vmatprep.mubr.f32.mxu0 %v13732_v25  ;;  %v4886_v51 = vpop.f32.mrf.mxu1 }
 0x1f2   : > { %8984 = vmatpush1.msra.mxu1 %v12976_v20  ;;  %8951 = vmatmul.mubr.f32.vlgmr.msra.gmra.mxu0 %v10113_v4  ;;  %v4887_v11 = vadd.f32 %v4886_v51, %v4775_v30 }
 0x1f3   : > { %8986 = vmatprep.subr.mxu1 %v12978_v26  ;;  %9029 = vmatprep.mubr.f32.mxu1 %v13732_v25  ;;  %v5055_v20 = vpop.f32.mrf.mxu1  ;;  %v5151_v26 = vpop.f32.mrf.mxu0 }
 0x1f4   : > { %8988 = vmatpush1.msra.mxu1 %v12990_v43  ;;  %v4976_v5 = vadd.f32 %v4975_v28, %v4887_v11 }
 0x1f5   : > { %8990 = vmatprep.subr.mxu1 %v13028_v54  ;;  %v5057_v0 = vpop.f32.mrf.mxu1  ;;  %v5153_v25 = vpop.f32.mrf.mxu0 }
 0x1f6   : > { %8992 = vmatpush1.msra.mxu1 %v13005_v44  ;;  %v5058_v41 = vadd.f32 %v5057_v0, %v4976_v5 }
 0x1f7   : > { %8994 = vmatprep.subr.mxu1 %v13066_v29  ;;  %v5231_v18 = vpop.f32.mrf.mxu1  ;;  %v5315_v35 = vpop.f32.mrf.mxu0 }
 0x1f8   : > { %8996 = vmatpush1.msra.mxu1 %v13082_v1  ;;  %v5316_v46 = vadd.f32 %v5315_v35, %v11417_v31  ;;  %v5154_v57 = vadd.f32 %v5153_v25, %v5058_v41 }
 0x1f9   : > { %9031 = vmatmul.mubr.f32.vlgmr.msra.gmra.mxu1 %v10113_v4  ;;  %v5233_v39 = vpop.f32.mrf.mxu1  ;;  %v5317_v43 = vpop.f32.mrf.mxu0  ;;  %v4885_v4 = vadd.f32 %v4884_v10, %v4773_v3 }
 0x1fa   : > { %v5318_v19 = vadd.f32 %v5317_v43, %v11417_v31  ;;  %v5234_v6 = vadd.f32 %v5233_v39, %v5154_v57 }
 0x1fb   : > { %v5427_v53 = vpop.f32.mrf.mxu1  ;;  %v5516_v54 = vpop.f32.mrf.mxu0  ;;  %v4974_v63 = vadd.f32 %v4973_v13, %v4885_v4 }
 0x1fc   : > { %v5428_v21 = vadd.f32 %v5427_v53, %v5316_v46  ;;  %v9086_v35 = vrot.slane %v5234_v6, 7 }
 0x1fd   : > { %v5429_v17 = vpop.f32.mrf.mxu1  ;;  %v5518_v44 = vpop.f32.mrf.mxu0  ;;  %v5056_v40 = vadd.f32 %v5055_v20, %v4974_v63 }
 0x1fe   : > { %v5430_v12 = vadd.f32 %v5429_v17, %v5318_v19  ;;  %v5517_v56 = vadd.f32 %v5516_v54, %v5428_v21  ;;  %vm9150_vm4 = vcmp.gt.f32.partialorder %v5234_v6, %v9086_v35 }
 0x1ff   : > { %v5598_v59 = vpop.f32.mrf.mxu1  ;;  %v5694_v29 = vpop.f32.mrf.mxu0  ;;  %v5152_v49 = vadd.f32 %v5151_v26, %v5056_v40  ;;  %v9182_v4 = vsel %vm9150_vm4, %v5234_v6, %v9086_v35 }
 0x200   : > { %v5519_v52 = vadd.f32 %v5518_v44, %v5430_v12  ;;  %v5599_v2 = vadd.f32 %v5598_v59, %v5517_v56 }
 0x201   : > { %v5600_v27 = vpop.f32.mrf.mxu1  ;;  %v5696_v1 = vpop.f32.mrf.mxu0  ;;  %v5232_v33 = vadd.f32 %v5231_v18, %v5152_v49 }
 0x202   : > { %v5601_v61 = vadd.f32 %v5600_v27, %v5519_v52  ;;  %v5695_v20 = vadd.f32 %v5694_v29, %v5599_v2 }
 0x203   : > { %v9085_v22 = vrot.slane %v5232_v33, 7 }
 0x204   : > { %v5697_v10 = vadd.f32 %v5696_v1, %v5601_v61 }
 0x205   : > { %v5774_v62 = vpop.f32.mrf.mxu1  ;;  %vm9149_vm5 = vcmp.gt.f32.partialorder %v5232_v33, %v9085_v22 }
 0x206   : > { %v5775_v43 = vadd.f32 %v5774_v62, %v5695_v20  ;;  %v9181_v44 = vsel %vm9149_vm5, %v5232_v33, %v9085_v22  ;;  %v9213_v27 = vsel %vm9149_vm5, 1, %v13640_v45 }
 0x207   : > { %v5776_v50 = vpop.f32.mrf.mxu1  ;;  %v9277_v1 = vrot.slane %v9181_v44, 7  ;;  %v9373_v30 = vrot.slane %v9213_v27, 7 }
 0x208   : > { %v5777_v26 = vadd.f32 %v5776_v50, %v5697_v10  ;;  %v9087_v59 = vrot.slane %v5775_v43, 7  ;;  %v9214_v50 = vsel %vm9150_vm4, 1, %v13640_v45 }
 0x209   : > { %v5858_v7 = vpop.f32.mrf.mxu0  ;;  %vm9341_vm14 = vcmp.gt.f32.partialorder %v5232_v33, %v9277_v1  ;;  %v9374_v21 = vrot.slane %v9214_v50, 7 }
 0x20a   : > { %v5859_v58 = vadd.f32 %v5858_v7, %v11417_v31  ;;  %v9088_v54 = vrot.slane %v5777_v26, 7  ;;  %vm13328_vm9 = vcmp.gt.f32.partialorder %v5775_v43, %v9087_v59  ;;  %v9405_v5 = vsel %vm9341_vm14, 2, %v9373_v30 }
 0x20b   : > { %v5860_v34 = vpop.f32.mrf.mxu0  ;;  %v9183_v40 = vsel %vm13328_vm9, %v5775_v43, %v9087_v59  ;;  %v9215_v41 = vsel %vm13328_vm9, 1, %v13640_v45 }
 0x20c   : > { %v5861_v14 = vadd.f32 %v5860_v34, %v11417_v31  ;;  %vm9152_vm6 = vcmp.gt.f32.partialorder %v5777_v26, %v9088_v54  ;;  %v9279_v52 = vrot.slane %v9183_v40, 7  ;;  %v9375_v2 = vrot.slane %v9215_v41, 7 }
 0x20d   : > { %v9184_v19 = vsel %vm9152_vm6, %v5777_v26, %v9088_v54  ;;  %v9216_v12 = vsel %vm9152_vm6, 1, %v13640_v45 }
 0x20e   : > { %v9376_v33 = vrot.slane %v9216_v12, 7  ;;  %vm9343_vm0 = vcmp.gt.f32.partialorder %v5775_v43, %v9279_v52 }
 0x20f   : > { %v5970_v48 = vpop.f32.mrf.mxu1 }
 0x210   : > { %v5971_v42 = vadd.f32 %v5970_v48, %v5859_v58  ;;  %v9278_v48 = vrot.slane %v9182_v4, 7 }
 0x211   : > { %v5972_v24 = vpop.f32.mrf.mxu1 }
 0x212   : > { %v6059_v36 = vpop.f32.mrf.mxu0  ;;  %v5973_v60 = vadd.f32 %v5972_v24, %v5861_v14  ;;  %v9280_v14 = vrot.slane %v9184_v19, 7  ;;  %vm9342_vm3 = vcmp.gt.f32.partialorder %v5234_v6, %v9278_v48 }
 0x213   : > { %v6060_v13 = vadd.f32 %v6059_v36, %v5971_v42  ;;  %v9406_v57 = vsel %vm9342_vm3, 2, %v9374_v21 }
 0x214   : > { %v6061_v38 = vpop.f32.mrf.mxu0  ;;  %vm9344_vm15 = vcmp.gt.f32.partialorder %v5777_v26, %v9280_v14  ;;  %v9494_v20 = vrot.slane %v9406_v57, %v13762_v23 }
 0x215   : > { %v6062_v8 = vadd.f32 %v6061_v38, %v5973_v60  ;;  %v9408_v10 = vsel %vm9344_vm15, 2, %v9376_v33 }
 0x216   : > { %vm13368_vm12 = vcmp.eq.s32.totalorder %v13767_v9, %v9494_v20 }
 0x217   : > { %vm9617_vm4 = vmpackc.low %vm13368_vm12, %vm13368_vm12 }
 0x219   : > { %v6141_v15 = vpop.f32.mrf.mxu1 }
 0x21a   : > { %v6142_v0 = vadd.f32 %v6141_v15, %v6060_v13 }
 0x21b   : > { %v6143_v16 = vpop.f32.mrf.mxu1 }
 0x21c   : > { %v6237_v32 = vpop.f32.mrf.mxu0  ;;  %v6144_v51 = vadd.f32 %v6143_v16, %v6062_v8 }
 0x21d   : > { %v6238_v17 = vadd.f32 %v6237_v32, %v6142_v0  ;;  %v9490_v32 = vrot.slane %v9405_v5, %v13762_v23 }
 0x21e   : > { %v6239_v28 = vpop.f32.mrf.mxu0 }
 0x21f   : > { %v6240_v53 = vadd.f32 %v6239_v28, %v6144_v51  ;;  %vm13362_vm13 = vcmp.eq.s32.totalorder %v13767_v9, %v9490_v32 }
 0x220   : > { %vm9615_vm2 = vmpackc.low %vm13362_vm13, %vm13362_vm13 }
 0x221   : > { %vm13385_vm6 = vmpackc.even %vm9615_vm2, %vm9615_vm2 }
 0x223   : > { %v6317_v55 = vpop.f32.mrf.mxu1 }
 0x224   : > { %v6318_v3 = vadd.f32 %v6317_v55, %v6238_v17 }
 0x225   : > { %v6319_v18 = vpop.f32.mrf.mxu1 }
 0x226   : > { %v6320_v25 = vadd.f32 %v6319_v18, %v6240_v53  ;;  %v9089_v62 = vrot.slane %v6318_v3, 7  ;;  %v9407_v18 = vsel %vm9343_vm0, 2, %v9375_v2  ;;  %v9502_v53 = vrot.slane %v9408_v10, %v13762_v23 }
 0x227   : > { %v6401_v39 = vpop.f32.mrf.mxu0 }
 0x228   : > { %v9090_v29 = vrot.slane %v6320_v25, 7  ;;  %v6402_v46 = vadd.f32 %v6401_v39, %v11417_v31  ;;  %vm13341_vm10 = vcmp.gt.f32.partialorder %v6318_v3, %v9089_v62  ;;  %vm13377_vm5 = vcmp.eq.s32.totalorder %v13767_v9, %v9502_v53 }
 0x229   : > { %v6403_v63 = vpop.f32.mrf.mxu0  ;;  %v9185_v38 = vsel %vm13341_vm10, %v6318_v3, %v9089_v62  ;;  %v9217_v22 = vsel %vm13341_vm10, 1, %v13640_v45  ;;  %vm9621_vm14 = vmpackc.low %vm13377_vm5, %vm13377_vm5 }
 0x22a   : > { %vm13333_vm7 = vcmp.gt.f32.partialorder %v6320_v25, %v9090_v29  ;;  %v6404_v36 = vadd.f32 %v6403_v63, %v11417_v31  ;;  %v9281_v55 = vrot.slane %v9185_v38, 7  ;;  %v9377_v35 = vrot.slane %v9217_v22, 7  ;;  %vm9622_vm0 = vmpackc.even %vm9621_vm14, %vm9621_vm14 }
 0x22b   : > { %v9186_v58 = vsel %vm13333_vm7, %v6320_v25, %v9090_v29  ;;  %v9218_v61 = vsel %vm13333_vm7, 1, %v13640_v45  ;;  %vm13398_vm7 = vmpackc.even %vm9617_vm4, %vm9617_vm4 }
 0x22c   : > { %v9282_v42 = vrot.slane %v9186_v58, 7  ;;  %v9378_v13 = vrot.slane %v9218_v61, 7  ;;  %vm9345_vm11 = vcmp.gt.f32.partialorder %v6318_v3, %v9281_v55 }
 0x22d   : > { %v6513_v34 = vpop.f32.mrf.mxu1  ;;  %v9409_v27 = vsel %vm9345_vm11, 2, %v9377_v35 }
 0x22e   : > { %v6514_v60 = vadd.f32 %v6513_v34, %v6402_v46  ;;  %vm9346_vm1 = vcmp.gt.f32.partialorder %v6320_v25, %v9282_v42  ;;  %v9498_v25 = vrot.slane %v9407_v18, %v13762_v23  ;;  %v9506_v19 = vrot.slane %v9409_v27, %v13762_v23  ;;  %v9912_v18 = vld [vmem:[%s12294_s27 + $0x10] sm:$0xff] }
 0x22f   : > { %v6515_v49 = vpop.f32.mrf.mxu1  ;;  %v9410_v17 = vsel %vm9346_vm1, 2, %v9378_v13  ;;  %v9663_v42 = vsel %vm13385_vm6, 16843009, %v13640_v45 }
 0x230   : > { %v6602_v15 = vpop.f32.mrf.mxu0  ;;  %v6516_v16 = vadd.f32 %v6515_v49, %v6404_v36  ;;  %v9510_v29 = vrot.slane %v9410_v17, %v13762_v23  ;;  %vm13390_vm9 = vcmp.eq.s32.totalorder %v13767_v9, %v9498_v25  ;;  %vm13412_vm1 = vcmp.eq.s32.totalorder %v13767_v9, %v9506_v19 }
 0x231   : > { %v6603_v6 = vadd.f32 %v6602_v15, %v6514_v60  ;;  %vm9619_vm15 = vmpackc.low %vm13390_vm9, %vm13390_vm9  ;;  %v9666_v15 = vsel %vm9622_vm0, 16843009, %v13640_v45  ;;  %v9664_v60 = vsel %vm13398_vm7, 16843009, %v13640_v45 }
 0x232   : > { %v6604_v8 = vpop.f32.mrf.mxu0  ;;  %vm13403_vm10 = vcmp.eq.s32.totalorder %v13767_v9, %v9510_v29  ;;  %vm9620_vm12 = vmpackc.even %vm9619_vm15, %vm9619_vm15  ;;  %v9777_v32 = vcombine.low %v9663_v42, %v9664_v60 }
 0x233   : > { %v6605_v26 = vadd.f32 %v6604_v8, %v6516_v16  ;;  %vm9625_vm11 = vmpackc.low %vm13403_vm10, %vm13403_vm10  ;;  %v9665_v33 = vsel %vm9620_vm12, 16843009, %v13640_v45 }
 0x234   : > { %vm9623_vm5 = vmpackc.low %vm13412_vm1, %vm13412_vm1 }
 0x235   : > { %vm9626_vm4 = vmpackc.even %vm9625_vm11, %vm9625_vm11 }
 0x236   : > { %vm9624_vm14 = vmpackc.even %vm9623_vm5, %vm9623_vm5  ;;  %v9668_v16 = vsel %vm9626_vm4, 16843009, %v13640_v45 }
 0x237   : > { %v6684_v56 = vpop.f32.mrf.mxu1  ;;  %v9667_v57 = vsel %vm9624_vm14, 16843009, %v13640_v45 }
 0x238   : > { %v6685_v0 = vadd.f32 %v6684_v56, %v6603_v6  ;;  %v9778_v56 = vcombine.low %v9665_v33, %v9666_v15  ;;  %v9779_v8 = vcombine.low %v9667_v57, %v9668_v16  ;;  %v9787_v6 = vrot.slane %v9777_v32, %v13801_v47 }
 0x239   : > { %v6686_v51 = vpop.f32.mrf.mxu1 }
 0x23a   : > { %v6780_v28 = vpop.f32.mrf.mxu0  ;;  %v6687_v54 = vadd.f32 %v6686_v51, %v6605_v26  ;;  %v9794_v2 = vrot.slane %v9778_v56, %v13801_v47  ;;  %v9801_v51 = vrot.slane %v9779_v8, %v13801_v47 }
 0x23b   : > { %v6781_v39 = vadd.f32 %v6780_v28, %v6685_v0 }
 0x23c   : > { %v6782_v44 = vpop.f32.mrf.mxu0  ;;  %v9809_v13 = vcombine.low %v9787_v6, %v9794_v2 }
 0x23d   : > { %v6783_v4 = vadd.f32 %v6782_v44, %v6687_v54 }
 0x23e   : > { %v9817_v26 = vrot.slane %v9809_v13, %v13801_v47 }
 0x241   : > { %v6860_v1 = vpop.f32.mrf.mxu1 }
 0x242   : > { %v6861_v7 = vadd.f32 %v6860_v1, %v6781_v39 }
 0x243   : > { %v6862_v62 = vpop.f32.mrf.mxu1 }
 0x244   : > { %v9091_v63 = vrot.slane %v6861_v7, 7  ;;  %v6863_v34 = vadd.f32 %v6862_v62, %v6783_v4 }
 0x245   : > { %v6944_v53 = vpop.f32.mrf.mxu0 }
 0x246   : > { %vm9155_vm3 = vcmp.gt.f32.partialorder %v6861_v7, %v9091_v63  ;;  %v9092_v46 = vrot.slane %v6863_v34, 7  ;;  %v6945_v11 = vadd.f32 %v6944_v53, %v11417_v31 }
 0x247   : > { %v9187_v40 = vsel %vm9155_vm3, %v6861_v7, %v9091_v63  ;;  %v9219_v12 = vsel %vm9155_vm3, 1, %v13640_v45  ;;  %v6946_v54 = vpop.f32.mrf.mxu0 }
 0x248   : > { %v9283_v24 = vrot.slane %v9187_v40, 7  ;;  %v9379_v36 = vrot.slane %v9219_v12, 7  ;;  %vm9156_vm13 = vcmp.gt.f32.partialorder %v6863_v34, %v9092_v46 }
 0x249   : > { %v9188_v5 = vsel %vm9156_vm13, %v6863_v34, %v9092_v46  ;;  %v9220_v21 = vsel %vm9156_vm13, 1, %v13640_v45 }
 0x24a   : > { %vm9347_vm2 = vcmp.gt.f32.partialorder %v6861_v7, %v9283_v24  ;;  %v9284_v58 = vrot.slane %v9188_v5, 7  ;;  %v9380_v49 = vrot.slane %v9220_v21, 7 }
 0x24b   : > { %v9411_v41 = vsel %vm9347_vm2, 2, %v9379_v36  ;;  %v7056_v17 = vpop.f32.mrf.mxu1  ;;  %v6947_v36 = vadd.f32 %v6946_v54, %v11417_v31 }
 0x24c   : > { %v9514_v52 = vrot.slane %v9411_v41, %v13762_v23  ;;  %vm9348_vm9 = vcmp.gt.f32.partialorder %v6863_v34, %v9284_v58  ;;  %v7057_v14 = vadd.f32 %v7056_v17, %v6945_v11 }
 0x24d   : > { %v9412_v38 = vsel %vm9348_vm9, 2, %v9380_v49  ;;  %v7058_v59 = vpop.f32.mrf.mxu1 }
 0x24e   : > { %vm9573_vm10 = vcmp.eq.s32.totalorder %v13767_v9, %v9514_v52  ;;  %v9518_v61 = vrot.slane %v9412_v38, %v13762_v23  ;;  %v7145_v44 = vpop.f32.mrf.mxu0  ;;  %v7059_v41 = vadd.f32 %v7058_v59, %v6947_v36 }
 0x24f   : > { %vm9627_vm3 = vmpackc.low %vm9573_vm10, %vm9573_vm10  ;;  %v7146_v58 = vadd.f32 %v7145_v44, %v7057_v14 }
 0x250   : > { %vm9628_vm15 = vmpackc.even %vm9627_vm3, %vm9627_vm3  ;;  %vm9574_vm7 = vcmp.eq.s32.totalorder %v13767_v9, %v9518_v61  ;;  %v7147_v25 = vpop.f32.mrf.mxu0 }
 0x251   : > { %vm9629_vm0 = vmpackc.low %vm9574_vm7, %vm9574_vm7  ;;  %v9669_v22 = vsel %vm9628_vm15, 16843009, %v13640_v45  ;;  %v7148_v42 = vadd.f32 %v7147_v25, %v7059_v41 }
 0x252   : > { %vm9630_vm1 = vmpackc.even %vm9629_vm0, %vm9629_vm0 }
 0x253   : > { %v9670_v55 = vsel %vm9630_vm1, 16843009, %v13640_v45 }
 0x254   : > { %v9780_v10 = vcombine.low %v9669_v22, %v9670_v55 }
 0x255   : > { %v7227_v39 = vpop.f32.mrf.mxu1 }
 0x256   : > { %v9808_v28 = vrot.slane %v9780_v10, %v13801_v47  ;;  %v7228_v60 = vadd.f32 %v7227_v39, %v7146_v58 }
 0x257   : > { %v7229_v1 = vpop.f32.mrf.mxu1 }
 0x258   : > { %v9810_v20 = vcombine.low %v9801_v51, %v9808_v28  ;;  %v7323_v27 = vpop.f32.mrf.mxu0  ;;  %v7230_v8 = vadd.f32 %v7229_v1, %v7148_v42 }
 0x259   : > { %v7324_v57 = vadd.f32 %v7323_v27, %v7228_v60 }
 0x25a   : > { %v9824_v0 = vrot.slane %v9810_v20, %v13801_v47  ;;  %v7325_v3 = vpop.f32.mrf.mxu0 }
 0x25c   : > { %v9825_v35 = vcombine.low %v9817_v26, %v9824_v0  ;;  %v7326_v0 = vadd.f32 %v7325_v3, %v7230_v8 }
 0x25e   : > { %v9913_v43 = vsel %vm12306_vm8, %v9825_v35, %v9912_v18 }
 0x25f   : > { %9914 = vst [vmem:[%s12294_s27 + $0x10] sm:$0xff] %v9913_v43  ;;  %v7403_v29 = vpop.f32.mrf.mxu1 }
 0x260   : > { %v7404_v6 = vadd.f32 %v7403_v29, %v7324_v57 }
 0x261   : > { %v7405_v7 = vpop.f32.mrf.mxu1 }
 0x262   : > { %v9093_v43 = vrot.slane %v7404_v6, 7  ;;  %v7406_v54 = vadd.f32 %v7405_v7, %v7326_v0 }
 0x263   : > { %v7487_v4 = vpop.f32.mrf.mxu0 }
 0x264   : > { %v7488_v52 = vadd.f32 %v7487_v4, %v11417_v31  ;;  %vm9157_vm6 = vcmp.gt.f32.partialorder %v7404_v6, %v9093_v43  ;;  %v9094_v4 = vrot.slane %v7406_v54, 7 }
 0x265   : > { %v7489_v62 = vpop.f32.mrf.mxu0 }
 0x266   : > { %v7490_v21 = vadd.f32 %v7489_v62, %v11417_v31  ;;  %vm9158_vm13 = vcmp.gt.f32.partialorder %v7406_v54, %v9094_v4 }
 0x267   : > { %v9190_v14 = vsel %vm9158_vm13, %v7406_v54, %v9094_v4 }
 0x269   : > { %v7599_v30 = vpop.f32.mrf.mxu1 }
 0x26a   : > { %v7600_v16 = vadd.f32 %v7599_v30, %v7488_v52 }
 0x26b   : > { %v7601_v19 = vpop.f32.mrf.mxu1 }
 0x26c   : > { %v7688_v50 = vpop.f32.mrf.mxu0  ;;  %v7602_v33 = vadd.f32 %v7601_v19, %v7490_v21 }
 0x26d   : > { %v7689_v13 = vadd.f32 %v7688_v50, %v7600_v16 }
 0x26e   : > { %v7690_v63 = vpop.f32.mrf.mxu0 }
 0x26f   : > { %v7691_v22 = vadd.f32 %v7690_v63, %v7602_v33  ;;  %v9189_v63 = vsel %vm9157_vm6, %v7404_v6, %v9093_v43 }
 0x273   : > { %v7770_v34 = vpop.f32.mrf.mxu1 }
 0x274   : > { %v7771_v18 = vadd.f32 %v7770_v34, %v7689_v13 }
 0x275   : > { %v7772_v46 = vpop.f32.mrf.mxu1 }
 0x276   : > { %v7866_v48 = vpop.f32.mrf.mxu0  ;;  %v7773_v51 = vadd.f32 %v7772_v46, %v7691_v22  ;;  %v9221_v46 = vsel %vm9157_vm6, 1, %v13640_v45 }
 0x277   : > { %v7867_v39 = vadd.f32 %v7866_v48, %v7771_v18  ;;  %v9381_v36 = vrot.slane %v9221_v46, 7 }
 0x278   : > { %v7868_v40 = vpop.f32.mrf.mxu0 }
 0x279   : > { %v7869_v17 = vadd.f32 %v7868_v40, %v7773_v51  ;;  %v9285_v40 = vrot.slane %v9189_v63, 7 }
 0x27b   : > { %vm9349_vm2 = vcmp.gt.f32.partialorder %v7404_v6, %v9285_v40 }
 0x27c   : > { %v9413_v42 = vsel %vm9349_vm2, 2, %v9381_v36 }
 0x27d   : > { %v7946_v12 = vpop.f32.mrf.mxu1 }
 0x27e   : > { %v7947_v62 = vadd.f32 %v7946_v12, %v7867_v39 }
 0x27f   : > { %v7948_v5 = vpop.f32.mrf.mxu1 }
 0x280   : > { %v7949_v27 = vadd.f32 %v7948_v5, %v7869_v17  ;;  %v9095_v34 = vrot.slane %v7947_v62, 7  ;;  %v9222_v5 = vsel %vm9158_vm13, 1, %v13640_v45 }
 0x281   : > { %v8030_v24 = vpop.f32.mrf.mxu0  ;;  %v9382_v16 = vrot.slane %v9222_v5, 7 }
 0x282   : > { %v8031_v32 = vadd.f32 %v8030_v24, %v11417_v31  ;;  %v9096_v50 = vrot.slane %v7949_v27, 7  ;;  %vm13456_vm12 = vcmp.gt.f32.partialorder %v7947_v62, %v9095_v34 }
 0x283   : > { %v8032_v49 = vpop.f32.mrf.mxu0  ;;  %v9191_v60 = vsel %vm13456_vm12, %v7947_v62, %v9095_v34  ;;  %v9223_v8 = vsel %vm13456_vm12, 1, %v13640_v45 }
 0x284   : > { %v8033_v38 = vadd.f32 %v8032_v49, %v11417_v31  ;;  %vm9160_vm11 = vcmp.gt.f32.partialorder %v7949_v27, %v9096_v50  ;;  %v9287_v22 = vrot.slane %v9191_v60, 7  ;;  %v9383_v0 = vrot.slane %v9223_v8, 7 }
 0x285   : > { %v9192_v21 = vsel %vm9160_vm11, %v7949_v27, %v9096_v50  ;;  %v9224_v33 = vsel %vm9160_vm11, 1, %v13640_v45 }
 0x286   : > { %v9384_v6 = vrot.slane %v9224_v33, 7  ;;  %vm9351_vm10 = vcmp.gt.f32.partialorder %v7947_v62, %v9287_v22 }
 0x287   : > { %v8142_v15 = vpop.f32.mrf.mxu1 }
 0x288   : > { %v8143_v28 = vadd.f32 %v8142_v15, %v8031_v32  ;;  %v9286_v15 = vrot.slane %v9190_v14, 7 }
 0x289   : > { %v8144_v56 = vpop.f32.mrf.mxu1 }
 0x28a   : > { %v8231_v61 = vpop.f32.mrf.mxu0  ;;  %v8145_v55 = vadd.f32 %v8144_v56, %v8033_v38  ;;  %v9288_v38 = vrot.slane %v9192_v21, 7  ;;  %vm9350_vm9 = vcmp.gt.f32.partialorder %v7406_v54, %v9286_v15 }
 0x28b   : > { %v8232_v44 = vadd.f32 %v8231_v61, %v8143_v28 }
 0x28c   : > { %v8233_v10 = vpop.f32.mrf.mxu0  ;;  %vm9352_vm14 = vcmp.gt.f32.partialorder %v7949_v27, %v9288_v38 }
 0x28d   : > { %v8234_v35 = vadd.f32 %v8233_v10, %v8145_v55  ;;  %v9416_v54 = vsel %vm9352_vm14, 2, %v9384_v6 }
 0x28e   : > { %v9534_v62 = vrot.slane %v9416_v54, %v13762_v23 }
 0x290   : > { %vm13505_vm6 = vcmp.eq.s32.totalorder %v13767_v9, %v9534_v62 }
 0x291   : > { %v8313_v2 = vpop.f32.mrf.mxu1  ;;  %vm9637_vm2 = vmpackc.low %vm13505_vm6, %vm13505_vm6 }
 0x292   : > { %v8314_v1 = vadd.f32 %v8313_v2, %v8232_v44 }
 0x293   : > { %v8315_v20 = vpop.f32.mrf.mxu1 }
 0x294   : > { %v8409_v26 = vpop.f32.mrf.mxu0  ;;  %v8316_v59 = vadd.f32 %v8315_v20, %v8234_v35  ;;  %v9522_v20 = vrot.slane %v9413_v42, %v13762_v23 }
 0x295   : > { %v8410_v19 = vadd.f32 %v8409_v26, %v8314_v1  ;;  %v9414_v26 = vsel %vm9350_vm9, 2, %v9382_v16  ;;  %v9415_v1 = vsel %vm9351_vm10, 2, %v9383_v0  ;;  %vm9638_vm10 = vmpackc.even %vm9637_vm2, %vm9637_vm2 }
 0x296   : > { %v8411_v25 = vpop.f32.mrf.mxu0  ;;  %vm13490_vm15 = vcmp.eq.s32.totalorder %v13767_v9, %v9522_v20 }
 0x297   : > { %v8412_v30 = vadd.f32 %v8411_v25, %v8316_v59  ;;  %v9526_v25 = vrot.slane %v9414_v26, %v13762_v23  ;;  %vm9631_vm1 = vmpackc.low %vm13490_vm15, %vm13490_vm15 }
 0x298   : > { %vm13513_vm11 = vmpackc.even %vm9631_vm1, %vm9631_vm1 }
 0x299   : > { %vm13496_vm0 = vcmp.eq.s32.totalorder %v13767_v9, %v9526_v25  ;;  %v9915_v25 = vld [vmem:[%s12294_s27 + $0x18] sm:$0xff] }
 0x29a   : > { %vm9633_vm13 = vmpackc.low %vm13496_vm0, %vm13496_vm0 }
 0x29b   : > { %v8489_v53 = vpop.f32.mrf.mxu1 }
 0x29c   : > { %v8490_v11 = vadd.f32 %v8489_v53, %v8410_v19 }
 0x29d   : > { %v8491_v29 = vpop.f32.mrf.mxu1 }
 0x29e   : > { %v8492_v3 = vadd.f32 %v8491_v29, %v8412_v30  ;;  %v9097_v12 = vrot.slane %v8490_v11, 7 }
 0x29f   : > { %v8573_v7 = vpop.f32.mrf.mxu0 }
 0x2a0   : > { %v9098_v48 = vrot.slane %v8492_v3, 7  ;;  %v8574_v52 = vadd.f32 %v8573_v7, %v11417_v31  ;;  %vm13469_vm4 = vcmp.gt.f32.partialorder %v8490_v11, %v9097_v12 }
 0x2a1   : > { %v8575_v58 = vpop.f32.mrf.mxu0  ;;  %v9193_v10 = vsel %vm13469_vm4, %v8490_v11, %v9097_v12  ;;  %v9225_v35 = vsel %vm13469_vm4, 1, %v13640_v45 }
 0x2a2   : > { %vm13461_vm5 = vcmp.gt.f32.partialorder %v8492_v3, %v9098_v48  ;;  %v8576_v61 = vadd.f32 %v8575_v58, %v11417_v31  ;;  %v9289_v43 = vrot.slane %v9193_v10, 7  ;;  %v9385_v29 = vrot.slane %v9225_v35, 7 }
 0x2a3   : > { %v9194_v32 = vsel %vm13461_vm5, %v8492_v3, %v9098_v48  ;;  %v9226_v31 = vsel %vm13461_vm5, 1, %v13640_v45  ;;  %vm13526_vm5 = vmpackc.even %vm9633_vm13, %vm9633_vm13 }
 0x2a4   : > { %v9290_v51 = vrot.slane %v9194_v32, 7  ;;  %v9386_v17 = vrot.slane %v9226_v31, 7  ;;  %vm9353_vm7 = vcmp.gt.f32.partialorder %v8490_v11, %v9289_v43  ;;  %v9672_v22 = vsel %vm13526_vm5, 16843009, %v13640_v45 }
 0x2a5   : > { %v8685_v49 = vpop.f32.mrf.mxu1  ;;  %v9417_v7 = vsel %vm9353_vm7, 2, %v9385_v29  ;;  %v9671_v31 = vsel %vm13513_vm11, 16843009, %v13640_v45 }
 0x2a6   : > { %v8686_v55 = vadd.f32 %v8685_v49, %v8574_v52  ;;  %vm9354_vm3 = vcmp.gt.f32.partialorder %v8492_v3, %v9290_v51  ;;  %v9530_v3 = vrot.slane %v9415_v1, %v13762_v23  ;;  %v9538_v5 = vrot.slane %v9417_v7, %v13762_v23 }
 0x2a7   : > { %v8687_v57 = vpop.f32.mrf.mxu1  ;;  %v9418_v50 = vsel %vm9354_vm3, 2, %v9386_v17 }
 0x2a8   : > { %v8774_v2 = vpop.f32.mrf.mxu0  ;;  %v8688_v28 = vadd.f32 %v8687_v57, %v8576_v61  ;;  %v9542_v40 = vrot.slane %v9418_v50, %v13762_v23  ;;  %vm13518_vm12 = vcmp.eq.s32.totalorder %v13767_v9, %v9530_v3  ;;  %vm13540_vm3 = vcmp.eq.s32.totalorder %v13767_v9, %v9538_v5 }
 0x2a9   : > { %v8775_v53 = vadd.f32 %v8774_v2, %v8686_v55  ;;  %vm9635_vm14 = vmpackc.low %vm13518_vm12, %vm13518_vm12  ;;  %v9674_v57 = vsel %vm9638_vm10, 16843009, %v13640_v45 }
 0x2aa   : > { %v8776_v18 = vpop.f32.mrf.mxu0  ;;  %vm13531_vm4 = vcmp.eq.s32.totalorder %v13767_v9, %v9542_v40  ;;  %vm9636_vm0 = vmpackc.even %vm9635_vm14, %vm9635_vm14 }
 0x2ab   : > { %v8777_v39 = vadd.f32 %v8776_v18, %v8688_v28  ;;  %vm9641_vm7 = vmpackc.low %vm13531_vm4, %vm13531_vm4  ;;  %v9673_v55 = vsel %vm9636_vm0, 16843009, %v13640_v45  ;;  %v9826_v28 = vcombine.low %v9671_v31, %v9672_v22 }
 0x2ac   : > { %vm9639_vm6 = vmpackc.low %vm13540_vm3, %vm13540_vm3  ;;  %v9827_v10 = vcombine.low %v9673_v55, %v9674_v57 }
 0x2ad   : > { %vm9642_vm13 = vmpackc.even %vm9641_vm7, %vm9641_vm7  ;;  %v9836_v35 = vrot.slane %v9826_v28, %v13801_v47 }
 0x2ae   : > { %vm9640_vm2 = vmpackc.even %vm9639_vm6, %vm9639_vm6  ;;  %v9676_v51 = vsel %vm9642_vm13, 16843009, %v13640_v45  ;;  %v9843_v26 = vrot.slane %v9827_v10, %v13801_v47 }
 0x2af   : > { %v8856_v13 = vpop.f32.mrf.mxu1  ;;  %v9675_v20 = vsel %vm9640_vm2, 16843009, %v13640_v45 }
 0x2b0   : > { %v8857_v27 = vadd.f32 %v8856_v13, %v8775_v53  ;;  %v9828_v0 = vcombine.low %v9675_v20, %v9676_v51  ;;  %v9858_v53 = vcombine.low %v9836_v35, %v9843_v26 }
 0x2b1   : > { %v8858_v44 = vpop.f32.mrf.mxu1 }
 0x2b2   : > { %v8952_v59 = vpop.f32.mrf.mxu0  ;;  %v8859_v30 = vadd.f32 %v8858_v44, %v8777_v39  ;;  %v9850_v54 = vrot.slane %v9828_v0, %v13801_v47  ;;  %v9866_v44 = vrot.slane %v9858_v53, %v13801_v47 }
 0x2b3   : > { %v8953_v34 = vadd.f32 %v8952_v59, %v8857_v27 }
 0x2b4   : > { %v8954_v19 = vpop.f32.mrf.mxu0 }
 0x2b5   : > { %v8955_v48 = vadd.f32 %v8954_v19, %v8859_v30 }
 0x2b9   : > { %v9032_v46 = vpop.f32.mrf.mxu1 }
 0x2ba   : > { %v9033_v14 = vadd.f32 %v9032_v46, %v8953_v34 }
 0x2bb   : > { %v9034_v24 = vpop.f32.mrf.mxu1 }
 0x2bc   : > { %v9099_v21 = vrot.slane %v9033_v14, 7  ;;  %v9035_v58 = vadd.f32 %v9034_v24, %v8955_v48 }
 0x2be   : > { %vm9163_vm9 = vcmp.gt.f32.partialorder %v9033_v14, %v9099_v21  ;;  %v9100_v41 = vrot.slane %v9035_v58, 7 }
 0x2bf   : > { %v9195_v52 = vsel %vm9163_vm9, %v9033_v14, %v9099_v21  ;;  %v9227_v60 = vsel %vm9163_vm9, 1, %v13640_v45 }
 0x2c0   : > { %v9291_v38 = vrot.slane %v9195_v52, 7  ;;  %v9387_v56 = vrot.slane %v9227_v60, 7  ;;  %vm9164_vm15 = vcmp.gt.f32.partialorder %v9035_v58, %v9100_v41 }
 0x2c1   : > { %v9196_v61 = vsel %vm9164_vm15, %v9035_v58, %v9100_v41  ;;  %v9228_v42 = vsel %vm9164_vm15, 1, %v13640_v45 }
 0x2c2   : > { %vm9355_vm1 = vcmp.gt.f32.partialorder %v9033_v14, %v9291_v38  ;;  %v9292_v16 = vrot.slane %v9196_v61, 7  ;;  %v9388_v32 = vrot.slane %v9228_v42, 7 }
 0x2c3   : > { %v9419_v2 = vsel %vm9355_vm1, 2, %v9387_v56 }
 0x2c4   : > { %v9546_v8 = vrot.slane %v9419_v2, %v13762_v23  ;;  %vm9356_vm12 = vcmp.gt.f32.partialorder %v9035_v58, %v9292_v16 }
 0x2c5   : > { %v9420_v6 = vsel %vm9356_vm12, 2, %v9388_v32 }
 0x2c6   : > { %vm9581_vm4 = vcmp.eq.s32.totalorder %v13767_v9, %v9546_v8  ;;  %v9550_v13 = vrot.slane %v9420_v6, %v13762_v23 }
 0x2c7   : > { %vm9643_vm9 = vmpackc.low %vm9581_vm4, %vm9581_vm4 }
 0x2c8   : > { %vm9644_vm14 = vmpackc.even %vm9643_vm9, %vm9643_vm9  ;;  %vm9582_vm5 = vcmp.eq.s32.totalorder %v13767_v9, %v9550_v13 }
 0x2c9   : > { %vm9645_vm10 = vmpackc.low %vm9582_vm5, %vm9582_vm5  ;;  %v9677_v23 = vsel %vm9644_vm14, 16843009, %v13640_v45 }
 0x2ca   : > { %vm9646_vm3 = vmpackc.even %vm9645_vm10, %vm9645_vm10 }
 0x2cb   : > { %v9678_v18 = vsel %vm9646_vm3, 16843009, %v13640_v45 }
 0x2cc   : > { %v9829_v43 = vcombine.low %v9677_v23, %v9678_v18 }
 0x2ce   : > { %v9857_v9 = vrot.slane %v9829_v43, %v13801_v47 }
 0x2d0   : > { %v9859_v17 = vcombine.low %v9850_v54, %v9857_v9 }
 0x2d2   : > { %v9873_v59 = vrot.slane %v9859_v17, %v13801_v47 }
 0x2d4   : > { %v9874_v39 = vcombine.low %v9866_v44, %v9873_v59 }
 0x2d6   : > { %v9916_v27 = vsel %vm12306_vm8, %v9874_v39, %v9915_v25 }
 0x2d7   : > { %9917 = vst [vmem:[%s12294_s27 + $0x18] sm:$0xff] %v9916_v27 }
 0x2d8 PF: > { %s13_s14 = sadd.s32 1, %s10060_s14   ;;  %s13847_s12 = smov %s10056_s13 }
 0x2d9   : > { %p10_p5 = scmp.ge.s32.totalorder %s13_s14, 4   ;;  %s13848_s13 = smov %s13850_s15 }
 0x2db   :  { %12 = sbr.rel (!%p10_p5) target bundleno = 2 (0x2), region = 62 }

</bundles_post_ra>
